<compile_context>
chip_gen: v7x
topology: tpu7x:2x2x1
jax: 0.10.0
libtpu: 0.0.40
codegen_flags: <defaults>
</compile_context>

<pallas_src>
import jax
import jax.numpy as jnp
from jax.experimental import pallas as pl
from jax.experimental.pallas import tpu as pltpu

EPS = 1e-5
LANES = 128


def _round_up(x, m):
    return (x + m - 1) // m * m


def _make_conv_kernel(offsets, m_rows, cin, fuse_k):
    """3x3 conv over one (batch, row-tile) block + masked BN partial sums.

    The padded tile arrives flattened row-major over (tile_h+2, W+2), so every
    tap (kh, kw) is a pure static sublane-offset slice at offset kh*(W+2)+kw.
    With fuse_k=True the 9 tap slices are concatenated along the lane/K axis
    and the whole conv is ONE MXU matmul with K = 9*Cin.
    """

    def kernel(xf_ref, w_ref, mask_ref, y_ref, s_ref, q_ref):
        xv = xf_ref[0, 0]                                       # (Lpad, Cin)
        taps = [xv[off:off + m_rows, :] for off in offsets]     # 9 x (M, Cin)
        if fuse_k:
            patches = jnp.concatenate(taps, axis=-1)            # (M, 9*Cin)
            acc = jnp.dot(patches, w_ref[...],
                          preferred_element_type=jnp.float32)   # (M, Cp)
        else:
            # Fallback: 9 accumulated dots (same math, no lane concat).
            acc = jnp.zeros((m_rows, w_ref.shape[-1]), jnp.float32)
            for t, tap in enumerate(taps):
                acc = acc + jnp.dot(tap, w_ref[t * cin:(t + 1) * cin, :],
                                    preferred_element_type=jnp.float32)

        y_ref[0, 0] = acc.astype(y_ref.dtype)                   # lane-dense store

        # BN partial sums over valid pixels only (mask zeroes the W+2 garbage
        # columns introduced by the flattened-row trick).  Two separate stores,
        # no concatenate.
        masked = acc * mask_ref[...]                            # (M, Cp)
        s_ref[0, 0] = jnp.sum(masked, axis=0, keepdims=True)
        q_ref[0, 0] = jnp.sum(masked * acc, axis=0, keepdims=True)

    return kernel


def _bn_relu_kernel(y_ref, scale_ref, shift_ref, o_ref):
    # y_ref/o_ref: (1, 1, M, Cp) lane-dense blocks; scale/shift: (1, Cp)
    o = y_ref[0, 0] * scale_ref[...] + shift_ref[...]
    o_ref[0, 0] = jnp.maximum(o, 0.0).astype(o_ref.dtype)


def double_conv3_3(x_nchw, w_oihw, bias, gamma, beta, *, tile_h=None,
                   compute_dtype=jnp.float32):
    """Conv2d(3x3, pad=1) -> BatchNorm2d(train) -> ReLU.

    compute_dtype=jnp.bfloat16 halves conv-input / y DMA bytes and reaches the
    bf16 MXU peak on v6e/v7x; accumulation and BN statistics stay in f32.
    """
    # Conv bias is exactly cancelled by the train-mode BatchNorm mean
    # subtraction, so it never touches the hot path.  (Fold it into `shift`
    # below if this is ever switched to eval-mode running statistics.)
    del bias

    N, Cin, H, W = x_nchw.shape
    Cout = w_oihw.shape[0]

    if tile_h is None:  # largest divisor of H that keeps blocks modest
        tile_h = next(t for t in range(min(H, 64), 0, -1) if H % t == 0)
    assert H % tile_h == 0
    n_h = H // tile_h
    Wp = W + 2                          # padded width (row stride of the tile)
    M = tile_h * Wp                     # matmul rows per tile (incl. 2 junk cols/row)
    Lt = (tile_h + 2) * Wp              # flattened padded tile length
    Lpad = _round_up(M + 2 * Wp + 2, 8)  # room for the largest tap offset
    Cp = _round_up(Cout, LANES)         # lane-dense output channels

    # ---- glue: NHWC, zero-pad, per-row-tile halo blocks, flatten ------------
    x = jnp.transpose(x_nchw, (0, 2, 3, 1)).astype(compute_dtype)   # NHWC
    xpad = jnp.pad(x, ((0, 0), (1, 1), (1, 1), (0, 0)))             # (N,H+2,Wp,Cin)
    tiles = jnp.stack(
        [xpad[:, t * tile_h: t * tile_h + tile_h + 2] for t in range(n_h)],
        axis=1)                                  # (N, n_h, tile_h+2, Wp, Cin): 2-row halo
    xf = tiles.reshape(N, n_h, Lt, Cin)
    xf = jnp.pad(xf, ((0, 0), (0, 0), (0, Lpad - Lt), (0, 0)))

    # folded weights: row index = (kh*3 + kw)*Cin + ci ; Cout zero-padded to Cp
    w_mat = jnp.transpose(w_oihw, (2, 3, 1, 0)).reshape(9 * Cin, Cout)
    w_mat = jnp.pad(w_mat, ((0, 0), (0, Cp - Cout))).astype(compute_dtype)

    # valid-pixel mask for BN statistics (zeros on the 2 wrap-around columns)
    mask = (jnp.arange(M) % Wp < W).astype(jnp.float32).reshape(M, 1)

    offsets = tuple(kh * Wp + kw for kh in range(3) for kw in range(3))

    # ---- kernel 1: conv (single folded matmul) + per-tile BN partial sums ---
    # TODO(synk): at production sizes (Cout tile > 128, tile_h*Wp > ~512) move
    # the accumulator to a VMEM scratch with a K grid axis (P3) to avoid spills.
    def conv_call(fuse_k):
        return pl.pallas_call(
            _make_conv_kernel(offsets, M, Cin, fuse_k),
            grid=(N, n_h),
            in_specs=[
                pl.BlockSpec((1, 1, Lpad, Cin), lambda n, h: (n, h, 0, 0)),
                pl.BlockSpec((9 * Cin, Cp), lambda n, h: (0, 0)),
                pl.BlockSpec((M, 1), lambda n, h: (0, 0)),
            ],
            out_specs=[
                pl.BlockSpec((1, 1, M, Cp), lambda n, h: (n, h, 0, 0)),
                pl.BlockSpec((1, 1, 1, Cp), lambda n, h: (n, h, 0, 0)),
                pl.BlockSpec((1, 1, 1, Cp), lambda n, h: (n, h, 0, 0)),
            ],
            out_shape=[
                jax.ShapeDtypeStruct((N, n_h, M, Cp), compute_dtype),
                jax.ShapeDtypeStruct((N, n_h, 1, Cp), jnp.float32),
                jax.ShapeDtypeStruct((N, n_h, 1, Cp), jnp.float32),
            ],
            compiler_params=pltpu.CompilerParams(
                dimension_semantics=("parallel", "parallel")),
        )(xf, w_mat, mask)

    try:
        y, s_sum, sq_sum = jax.block_until_ready(conv_call(fuse_k=True))
    except Exception:  # noqa: BLE001 — Mosaic w/o unaligned lane-concat support
        y, s_sum, sq_sum = conv_call(fuse_k=False)

    # ---- tiny cross-tile finish of the BN reduction (a few elems / channel) --
    count = float(N * H * W)
    total_s = jnp.sum(s_sum, axis=(0, 1, 2))            # (Cp,)
    total_q = jnp.sum(sq_sum, axis=(0, 1, 2))           # (Cp,)
    mean = total_s / count
    var = jnp.maximum(total_q / count - mean * mean, 0.0)   # biased (train mode)
    inv_std = 1.0 / jnp.sqrt(var + EPS)
    gamma_p = jnp.pad(gamma.astype(jnp.float32), (0, Cp - Cout))
    beta_p = jnp.pad(beta.astype(jnp.float32), (0, Cp - Cout))
    scale = (gamma_p * inv_std).reshape(1, Cp)
    shift = (beta_p - mean * gamma_p * inv_std).reshape(1, Cp)
    # TODO(synk): BatchNorm running-stat update (training side effect) is not
    # emitted — it is not part of the module's returned tensor.

    # ---- kernel 2: fused BatchNorm affine + ReLU on lane-dense blocks --------
    out = pl.pallas_call(
        _bn_relu_kernel,
        grid=(N, n_h),
        in_specs=[
            pl.BlockSpec((1, 1, M, Cp), lambda n, h: (n, h, 0, 0)),
            pl.BlockSpec((1, Cp), lambda n, h: (0, 0)),
            pl.BlockSpec((1, Cp), lambda n, h: (0, 0)),
        ],
        out_specs=pl.BlockSpec((1, 1, M, Cp), lambda n, h: (n, h, 0, 0)),
        out_shape=jax.ShapeDtypeStruct((N, n_h, M, Cp), jnp.float32),
        compiler_params=pltpu.CompilerParams(
            dimension_semantics=("parallel", "parallel")),
    )(y, scale, shift)

    # ---- strip W-pad junk columns and channel padding, back to NCHW ----------
    out = out.reshape(N, n_h, tile_h, Wp, Cp)[:, :, :, :W, :Cout]
    out = out.reshape(N, H, W, Cout)
    return jnp.transpose(out, (0, 3, 1, 2))


def _reference(x, w_oihw, bias, gamma, beta):
    y = jax.lax.conv_general_dilated(
        x, w_oihw, window_strides=(1, 1), padding="SAME",
        dimension_numbers=("NCHW", "OIHW", "NCHW"))
    y = y + bias[None, :, None, None]
    mean = y.mean(axis=(0, 2, 3), keepdims=True)
    var = ((y - mean) ** 2).mean(axis=(0, 2, 3), keepdims=True)
    yn = (y - mean) / jnp.sqrt(var + EPS)
    yn = yn * gamma[None, :, None, None] + beta[None, :, None, None]
    return jnp.maximum(yn, 0.0)


if __name__ == "__main__":
    key = jax.random.PRNGKey(0)
    k_x, k_w, k_b, k_g, k_be = jax.random.split(key, 5)

    N, Cin, Cout, H, W = 2, 4, 8, 16, 16
    x = jax.random.normal(k_x, (N, Cin, H, W), jnp.float32)
    w = jax.random.normal(k_w, (Cout, Cin, 3, 3), jnp.float32) * 0.1
    b = jax.random.normal(k_b, (Cout,), jnp.float32) * 0.05
    gamma = 1.0 + 0.1 * jax.random.normal(k_g, (Cout,), jnp.float32)
    beta = 0.1 * jax.random.normal(k_be, (Cout,), jnp.float32)

    out = double_conv3_3(x, w, b, gamma, beta, tile_h=8)
    out = jax.block_until_ready(out)

    ref = _reference(x, w, b, gamma, beta)
    assert out.shape == (N, Cout, H, W)
    assert jnp.allclose(out, ref, rtol=1e-3, atol=1e-3), (
        "max abs err = %g" % float(jnp.max(jnp.abs(out - ref))))

    print("KERNEL_OK")
</pallas_src>

<mosaic_0001>
module attributes {stable_mosaic.version = 11 : i64} {
  func.func @kernel(%arg0: i32, %arg1: i32, %arg2: memref<1x1x184x4xf32, #tpu.memory_space<vmem>>, %arg3: memref<36x128xf32, #tpu.memory_space<vmem>>, %arg4: memref<144x1xf32, #tpu.memory_space<vmem>>, %arg5: memref<1x1x144x128xf32, #tpu.memory_space<vmem>>, %arg6: memref<1x1x1x128xf32, #tpu.memory_space<vmem>>, %arg7: memref<1x1x1x128xf32, #tpu.memory_space<vmem>>) attributes {dimension_semantics = [#tpu.dimension_semantics<parallel>, #tpu.dimension_semantics<parallel>], iteration_bounds = array<i64: 2, 2>, scalar_prefetch = 0 : i64, scratch_operands = 0 : i64, tpu.core_type = #tpu.core_type<tc>, window_params = [{transform_indices = @transform_0, window_bounds = array<i64: 1, 1, 184, 4>}, {pipeline_mode = #tpu.pipeline_mode<synchronous>, transform_indices = @transform_1, window_bounds = array<i64: 36, 128>}, {pipeline_mode = #tpu.pipeline_mode<synchronous>, transform_indices = @transform_2, window_bounds = array<i64: 144, 1>}, {transform_indices = @transform_3, window_bounds = array<i64: 1, 1, 144, 128>}, {transform_indices = @transform_4, window_bounds = array<i64: 1, 1, 1, 128>}, {transform_indices = @transform_5, window_bounds = array<i64: 1, 1, 1, 128>}]} {
    %c0 = arith.constant 0 : index
    %c0_0 = arith.constant 0 : index
    %c0_1 = arith.constant 0 : index
    %c0_2 = arith.constant 0 : index
    %0 = vector.load %arg2[%c0, %c0_0, %c0_1, %c0_2] : memref<1x1x184x4xf32, #tpu.memory_space<vmem>>, vector<1x1x184x4xf32>
    %1 = vector.shape_cast %0 : vector<1x1x184x4xf32> to vector<184x4xf32>
    %2 = vector.extract_strided_slice %1 {offsets = [0, 0], sizes = [144, 4], strides = [1, 1]} : vector<184x4xf32> to vector<144x4xf32>
    %3 = vector.extract_strided_slice %1 {offsets = [1, 0], sizes = [144, 4], strides = [1, 1]} : vector<184x4xf32> to vector<144x4xf32>
    %4 = vector.extract_strided_slice %1 {offsets = [2, 0], sizes = [144, 4], strides = [1, 1]} : vector<184x4xf32> to vector<144x4xf32>
    %5 = vector.extract_strided_slice %1 {offsets = [18, 0], sizes = [144, 4], strides = [1, 1]} : vector<184x4xf32> to vector<144x4xf32>
    %6 = vector.extract_strided_slice %1 {offsets = [19, 0], sizes = [144, 4], strides = [1, 1]} : vector<184x4xf32> to vector<144x4xf32>
    %7 = vector.extract_strided_slice %1 {offsets = [20, 0], sizes = [144, 4], strides = [1, 1]} : vector<184x4xf32> to vector<144x4xf32>
    %8 = vector.extract_strided_slice %1 {offsets = [36, 0], sizes = [144, 4], strides = [1, 1]} : vector<184x4xf32> to vector<144x4xf32>
    %9 = vector.extract_strided_slice %1 {offsets = [37, 0], sizes = [144, 4], strides = [1, 1]} : vector<184x4xf32> to vector<144x4xf32>
    %10 = vector.extract_strided_slice %1 {offsets = [38, 0], sizes = [144, 4], strides = [1, 1]} : vector<184x4xf32> to vector<144x4xf32>
    %11 = tpu.concatenate %2, %3, %4, %5, %6, %7, %8, %9, %10 in 1 : vector<144x4xf32>, vector<144x4xf32>, vector<144x4xf32>, vector<144x4xf32>, vector<144x4xf32>, vector<144x4xf32>, vector<144x4xf32>, vector<144x4xf32>, vector<144x4xf32> -> vector<144x36xf32>
    %c0_3 = arith.constant 0 : index
    %c0_4 = arith.constant 0 : index
    %12 = vector.load %arg3[%c0_3, %c0_4] : memref<36x128xf32, #tpu.memory_space<vmem>>, vector<36x128xf32>
    %cst = arith.constant dense<0.000000e+00> : vector<144x128xf32>
    %13 = tpu.matmul %11, %12, %cst {dimension_numbers = #tpu.dot_dimension_numbers<[1], [0], [0], [1], [0, 0, 1, 1], [], []>} : vector<144x36xf32>, vector<36x128xf32>, vector<144x128xf32> -> vector<144x128xf32>
    %c0_5 = arith.constant 0 : index
    %c0_6 = arith.constant 0 : index
    %c0_7 = arith.constant 0 : index
    %c0_8 = arith.constant 0 : index
    %14 = vector.load %arg5[%c0_5, %c0_6, %c0_7, %c0_8] : memref<1x1x144x128xf32, #tpu.memory_space<vmem>>, vector<1x1x144x128xf32>
    %15 = vector.shape_cast %14 : vector<1x1x144x128xf32> to vector<144x128xf32>
    %16 = vector.shape_cast %13 : vector<144x128xf32> to vector<1x1x144x128xf32>
    tpu.vector_store %arg5[%c0_5, %c0_6, %c0_7, %c0_8], %16 {strides = array<i32>} : memref<1x1x144x128xf32, #tpu.memory_space<vmem>>, vector<1x1x144x128xf32>,
    %c0_9 = arith.constant 0 : index
    %c0_10 = arith.constant 0 : index
    %17 = vector.load %arg4[%c0_9, %c0_10] : memref<144x1xf32, #tpu.memory_space<vmem>>, vector<144x1xf32>
    %18 = vector.broadcast %17 : vector<144x1xf32> to vector<144x128xf32>
    %19 = arith.mulf %13, %18 : vector<144x128xf32>
    %cst_11 = arith.constant dense<0.000000e+00> : vector<128xf32>
    %20 = vector.multi_reduction <add>, %19, %cst_11 [0] : vector<144x128xf32> to vector<128xf32>
    %21 = vector.shape_cast %20 : vector<128xf32> to vector<1x128xf32>
    %c0_12 = arith.constant 0 : index
    %c0_13 = arith.constant 0 : index
    %c0_14 = arith.constant 0 : index
    %c0_15 = arith.constant 0 : index
    %22 = vector.load %arg6[%c0_12, %c0_13, %c0_14, %c0_15] : memref<1x1x1x128xf32, #tpu.memory_space<vmem>>, vector<1x1x1x128xf32>
    %23 = vector.shape_cast %22 : vector<1x1x1x128xf32> to vector<1x128xf32>
    %24 = vector.shape_cast %21 : vector<1x128xf32> to vector<1x1x1x128xf32>
    tpu.vector_store %arg6[%c0_12, %c0_13, %c0_14, %c0_15], %24 {strides = array<i32>} : memref<1x1x1x128xf32, #tpu.memory_space<vmem>>, vector<1x1x1x128xf32>,
    %25 = arith.mulf %19, %13 : vector<144x128xf32>
    %cst_16 = arith.constant dense<0.000000e+00> : vector<128xf32>
    %26 = vector.multi_reduction <add>, %25, %cst_16 [0] : vector<144x128xf32> to vector<128xf32>
    %27 = vector.shape_cast %26 : vector<128xf32> to vector<1x128xf32>
    %c0_17 = arith.constant 0 : index
    %c0_18 = arith.constant 0 : index
    %c0_19 = arith.constant 0 : index
    %c0_20 = arith.constant 0 : index
    %28 = vector.load %arg7[%c0_17, %c0_18, %c0_19, %c0_20] : memref<1x1x1x128xf32, #tpu.memory_space<vmem>>, vector<1x1x1x128xf32>
    %29 = vector.shape_cast %28 : vector<1x1x1x128xf32> to vector<1x128xf32>
    %30 = vector.shape_cast %27 : vector<1x128xf32> to vector<1x1x1x128xf32>
    tpu.vector_store %arg7[%c0_17, %c0_18, %c0_19, %c0_20], %30 {strides = array<i32>} : memref<1x1x1x128xf32, #tpu.memory_space<vmem>>, vector<1x1x1x128xf32>,
    return
  }
  func.func @transform_0(%arg0: i32, %arg1: i32) -> (i32, i32, i32, i32) {
    %c0_i32 = arith.constant 0 : i32
    %c0_i32_0 = arith.constant 0 : i32
    %c0_i32_1 = arith.constant 0 : i32
    return %arg0, %arg1, %c0_i32, %c0_i32_0 : i32, i32, i32, i32
  }
  func.func @transform_1(%arg0: i32, %arg1: i32) -> (i32, i32) {
    %c0_i32 = arith.constant 0 : i32
    %c0_i32_0 = arith.constant 0 : i32
    %c0_i32_1 = arith.constant 0 : i32
    return %c0_i32, %c0_i32_0 : i32, i32
  }
  func.func @transform_2(%arg0: i32, %arg1: i32) -> (i32, i32) {
    %c0_i32 = arith.constant 0 : i32
    %c0_i32_0 = arith.constant 0 : i32
    %c0_i32_1 = arith.constant 0 : i32
    return %c0_i32, %c0_i32_0 : i32, i32
  }
  func.func @transform_3(%arg0: i32, %arg1: i32) -> (i32, i32, i32, i32) {
    %c0_i32 = arith.constant 0 : i32
    %c0_i32_0 = arith.constant 0 : i32
    %c0_i32_1 = arith.constant 0 : i32
    return %arg0, %arg1, %c0_i32, %c0_i32_0 : i32, i32, i32, i32
  }
  func.func @transform_4(%arg0: i32, %arg1: i32) -> (i32, i32, i32, i32) {
    %c0_i32 = arith.constant 0 : i32
    %c0_i32_0 = arith.constant 0 : i32
    %c0_i32_1 = arith.constant 0 : i32
    return %arg0, %arg1, %c0_i32, %c0_i32_0 : i32, i32, i32, i32
  }
  func.func @transform_5(%arg0: i32, %arg1: i32) -> (i32, i32, i32, i32) {
    %c0_i32 = arith.constant 0 : i32
    %c0_i32_0 = arith.constant 0 : i32
    %c0_i32_1 = arith.constant 0 : i32
    return %arg0, %arg1, %c0_i32, %c0_i32_0 : i32, i32, i32, i32
  }
}

module attributes {stable_mosaic.version = 11 : i64} {
  func.func @kernel(%arg0: i32, %arg1: i32, %arg2: memref<1x1x184x4xf32, #tpu.memory_space<vmem>>, %arg3: memref<36x128xf32, #tpu.memory_space<vmem>>, %arg4: memref<144x1xf32, #tpu.memory_space<vmem>>, %arg5: memref<1x1x144x128xf32, #tpu.memory_space<vmem>>, %arg6: memref<1x1x1x128xf32, #tpu.memory_space<vmem>>, %arg7: memref<1x1x1x128xf32, #tpu.memory_space<vmem>>) attributes {dimension_semantics = [#tpu.dimension_semantics<parallel>, #tpu.dimension_semantics<parallel>], iteration_bounds = array<i64: 2, 2>, scalar_prefetch = 0 : i64, scratch_operands = 0 : i64, tpu.core_type = #tpu.core_type<tc>, window_params = [{transform_indices = @transform_0, window_bounds = array<i64: 1, 1, 184, 4>}, {pipeline_mode = #tpu.pipeline_mode<synchronous>, transform_indices = @transform_1, window_bounds = array<i64: 36, 128>}, {pipeline_mode = #tpu.pipeline_mode<synchronous>, transform_indices = @transform_2, window_bounds = array<i64: 144, 1>}, {transform_indices = @transform_3, window_bounds = array<i64: 1, 1, 144, 128>}, {transform_indices = @transform_4, window_bounds = array<i64: 1, 1, 1, 128>}, {transform_indices = @transform_5, window_bounds = array<i64: 1, 1, 1, 128>}]} {
    %c0 = arith.constant 0 : index
    %c0_0 = arith.constant 0 : index
    %c0_1 = arith.constant 0 : index
    %c0_2 = arith.constant 0 : index
    %0 = vector.load %arg2[%c0, %c0_0, %c0_1, %c0_2] : memref<1x1x184x4xf32, #tpu.memory_space<vmem>>, vector<1x1x184x4xf32>
    %1 = vector.shape_cast %0 : vector<1x1x184x4xf32> to vector<184x4xf32>
    %2 = vector.extract_strided_slice %1 {offsets = [0, 0], sizes = [144, 4], strides = [1, 1]} : vector<184x4xf32> to vector<144x4xf32>
    %3 = vector.extract_strided_slice %1 {offsets = [1, 0], sizes = [144, 4], strides = [1, 1]} : vector<184x4xf32> to vector<144x4xf32>
    %4 = vector.extract_strided_slice %1 {offsets = [2, 0], sizes = [144, 4], strides = [1, 1]} : vector<184x4xf32> to vector<144x4xf32>
    %5 = vector.extract_strided_slice %1 {offsets = [18, 0], sizes = [144, 4], strides = [1, 1]} : vector<184x4xf32> to vector<144x4xf32>
    %6 = vector.extract_strided_slice %1 {offsets = [19, 0], sizes = [144, 4], strides = [1, 1]} : vector<184x4xf32> to vector<144x4xf32>
    %7 = vector.extract_strided_slice %1 {offsets = [20, 0], sizes = [144, 4], strides = [1, 1]} : vector<184x4xf32> to vector<144x4xf32>
    %8 = vector.extract_strided_slice %1 {offsets = [36, 0], sizes = [144, 4], strides = [1, 1]} : vector<184x4xf32> to vector<144x4xf32>
    %9 = vector.extract_strided_slice %1 {offsets = [37, 0], sizes = [144, 4], strides = [1, 1]} : vector<184x4xf32> to vector<144x4xf32>
    %10 = vector.extract_strided_slice %1 {offsets = [38, 0], sizes = [144, 4], strides = [1, 1]} : vector<184x4xf32> to vector<144x4xf32>
    %cst = arith.constant 0.000000e+00 : f32
    %11 = vector.broadcast %cst : f32 to vector<144x128xf32>
    %c0_3 = arith.constant 0 : index
    %c0_4 = arith.constant 0 : index
    %12 = vector.load %arg3[%c0_3, %c0_4] : memref<36x128xf32, #tpu.memory_space<vmem>>, vector<4x128xf32>
    %cst_5 = arith.constant dense<0.000000e+00> : vector<144x128xf32>
    %13 = tpu.matmul %2, %12, %cst_5 {dimension_numbers = #tpu.dot_dimension_numbers<[1], [0], [0], [1], [0, 0, 1, 1], [], []>} : vector<144x4xf32>, vector<4x128xf32>, vector<144x128xf32> -> vector<144x128xf32>
    %14 = arith.addf %11, %13 : vector<144x128xf32>
    %c4 = arith.constant 4 : index
    %c0_6 = arith.constant 0 : index
    %15 = vector.load %arg3[%c4, %c0_6] : memref<36x128xf32, #tpu.memory_space<vmem>>, vector<4x128xf32>
    %cst_7 = arith.constant dense<0.000000e+00> : vector<144x128xf32>
    %16 = tpu.matmul %3, %15, %cst_7 {dimension_numbers = #tpu.dot_dimension_numbers<[1], [0], [0], [1], [0, 0, 1, 1], [], []>} : vector<144x4xf32>, vector<4x128xf32>, vector<144x128xf32> -> vector<144x128xf32>
    %17 = arith.addf %14, %16 : vector<144x128xf32>
    %c8 = arith.constant 8 : index
    %c0_8 = arith.constant 0 : index
    %18 = vector.load %arg3[%c8, %c0_8] : memref<36x128xf32, #tpu.memory_space<vmem>>, vector<4x128xf32>
    %cst_9 = arith.constant dense<0.000000e+00> : vector<144x128xf32>
    %19 = tpu.matmul %4, %18, %cst_9 {dimension_numbers = #tpu.dot_dimension_numbers<[1], [0], [0], [1], [0, 0, 1, 1], [], []>} : vector<144x4xf32>, vector<4x128xf32>, vector<144x128xf32> -> vector<144x128xf32>
    %20 = arith.addf %17, %19 : vector<144x128xf32>
    %c12 = arith.constant 12 : index
    %c0_10 = arith.constant 0 : index
    %21 = vector.load %arg3[%c12, %c0_10] : memref<36x128xf32, #tpu.memory_space<vmem>>, vector<4x128xf32>
    %cst_11 = arith.constant dense<0.000000e+00> : vector<144x128xf32>
    %22 = tpu.matmul %5, %21, %cst_11 {dimension_numbers = #tpu.dot_dimension_numbers<[1], [0], [0], [1], [0, 0, 1, 1], [], []>} : vector<144x4xf32>, vector<4x128xf32>, vector<144x128xf32> -> vector<144x128xf32>
    %23 = arith.addf %20, %22 : vector<144x128xf32>
    %c16 = arith.constant 16 : index
    %c0_12 = arith.constant 0 : index
    %24 = vector.load %arg3[%c16, %c0_12] : memref<36x128xf32, #tpu.memory_space<vmem>>, vector<4x128xf32>
    %cst_13 = arith.constant dense<0.000000e+00> : vector<144x128xf32>
    %25 = tpu.matmul %6, %24, %cst_13 {dimension_numbers = #tpu.dot_dimension_numbers<[1], [0], [0], [1], [0, 0, 1, 1], [], []>} : vector<144x4xf32>, vector<4x128xf32>, vector<144x128xf32> -> vector<144x128xf32>
    %26 = arith.addf %23, %25 : vector<144x128xf32>
    %c20 = arith.constant 20 : index
    %c0_14 = arith.constant 0 : index
    %27 = vector.load %arg3[%c20, %c0_14] : memref<36x128xf32, #tpu.memory_space<vmem>>, vector<4x128xf32>
    %cst_15 = arith.constant dense<0.000000e+00> : vector<144x128xf32>
    %28 = tpu.matmul %7, %27, %cst_15 {dimension_numbers = #tpu.dot_dimension_numbers<[1], [0], [0], [1], [0, 0, 1, 1], [], []>} : vector<144x4xf32>, vector<4x128xf32>, vector<144x128xf32> -> vector<144x128xf32>
    %29 = arith.addf %26, %28 : vector<144x128xf32>
    %c24 = arith.constant 24 : index
    %c0_16 = arith.constant 0 : index
    %30 = vector.load %arg3[%c24, %c0_16] : memref<36x128xf32, #tpu.memory_space<vmem>>, vector<4x128xf32>
    %cst_17 = arith.constant dense<0.000000e+00> : vector<144x128xf32>
    %31 = tpu.matmul %8, %30, %cst_17 {dimension_numbers = #tpu.dot_dimension_numbers<[1], [0], [0], [1], [0, 0, 1, 1], [], []>} : vector<144x4xf32>, vector<4x128xf32>, vector<144x128xf32> -> vector<144x128xf32>
    %32 = arith.addf %29, %31 : vector<144x128xf32>
    %c28 = arith.constant 28 : index
    %c0_18 = arith.constant 0 : index
    %33 = vector.load %arg3[%c28, %c0_18] : memref<36x128xf32, #tpu.memory_space<vmem>>, vector<4x128xf32>
    %cst_19 = arith.constant dense<0.000000e+00> : vector<144x128xf32>
    %34 = tpu.matmul %9, %33, %cst_19 {dimension_numbers = #tpu.dot_dimension_numbers<[1], [0], [0], [1], [0, 0, 1, 1], [], []>} : vector<144x4xf32>, vector<4x128xf32>, vector<144x128xf32> -> vector<144x128xf32>
    %35 = arith.addf %32, %34 : vector<144x128xf32>
    %c32 = arith.constant 32 : index
    %c0_20 = arith.constant 0 : index
    %36 = vector.load %arg3[%c32, %c0_20] : memref<36x128xf32, #tpu.memory_space<vmem>>, vector<4x128xf32>
    %cst_21 = arith.constant dense<0.000000e+00> : vector<144x128xf32>
    %37 = tpu.matmul %10, %36, %cst_21 {dimension_numbers = #tpu.dot_dimension_numbers<[1], [0], [0], [1], [0, 0, 1, 1], [], []>} : vector<144x4xf32>, vector<4x128xf32>, vector<144x128xf32> -> vector<144x128xf32>
    %38 = arith.addf %35, %37 : vector<144x128xf32>
    %c0_22 = arith.constant 0 : index
    %c0_23 = arith.constant 0 : index
    %c0_24 = arith.constant 0 : index
    %c0_25 = arith.constant 0 : index
    %39 = vector.load %arg5[%c0_22, %c0_23, %c0_24, %c0_25] : memref<1x1x144x128xf32, #tpu.memory_space<vmem>>, vector<1x1x144x128xf32>
    %40 = vector.shape_cast %39 : vector<1x1x144x128xf32> to vector<144x128xf32>
    %41 = vector.shape_cast %38 : vector<144x128xf32> to vector<1x1x144x128xf32>
    tpu.vector_store %arg5[%c0_22, %c0_23, %c0_24, %c0_25], %41 {strides = array<i32>} : memref<1x1x144x128xf32, #tpu.memory_space<vmem>>, vector<1x1x144x128xf32>,
    %c0_26 = arith.constant 0 : index
    %c0_27 = arith.constant 0 : index
    %42 = vector.load %arg4[%c0_26, %c0_27] : memref<144x1xf32, #tpu.memory_space<vmem>>, vector<144x1xf32>
    %43 = vector.broadcast %42 : vector<144x1xf32> to vector<144x128xf32>
    %44 = arith.mulf %38, %43 : vector<144x128xf32>
    %cst_28 = arith.constant dense<0.000000e+00> : vector<128xf32>
    %45 = vector.multi_reduction <add>, %44, %cst_28 [0] : vector<144x128xf32> to vector<128xf32>
    %46 = vector.shape_cast %45 : vector<128xf32> to vector<1x128xf32>
    %c0_29 = arith.constant 0 : index
    %c0_30 = arith.constant 0 : index
    %c0_31 = arith.constant 0 : index
    %c0_32 = arith.constant 0 : index
    %47 = vector.load %arg6[%c0_29, %c0_30, %c0_31, %c0_32] : memref<1x1x1x128xf32, #tpu.memory_space<vmem>>, vector<1x1x1x128xf32>
    %48 = vector.shape_cast %47 : vector<1x1x1x128xf32> to vector<1x128xf32>
    %49 = vector.shape_cast %46 : vector<1x128xf32> to vector<1x1x1x128xf32>
    tpu.vector_store %arg6[%c0_29, %c0_30, %c0_31, %c0_32], %49 {strides = array<i32>} : memref<1x1x1x128xf32, #tpu.memory_space<vmem>>, vector<1x1x1x128xf32>,
    %50 = arith.mulf %44, %38 : vector<144x128xf32>
    %cst_33 = arith.constant dense<0.000000e+00> : vector<128xf32>
    %51 = vector.multi_reduction <add>, %50, %cst_33 [0] : vector<144x128xf32> to vector<128xf32>
    %52 = vector.shape_cast %51 : vector<128xf32> to vector<1x128xf32>
    %c0_34 = arith.constant 0 : index
    %c0_35 = arith.constant 0 : index
    %c0_36 = arith.constant 0 : index
    %c0_37 = arith.constant 0 : index
    %53 = vector.load %arg7[%c0_34, %c0_35, %c0_36, %c0_37] : memref<1x1x1x128xf32, #tpu.memory_space<vmem>>, vector<1x1x1x128xf32>
    %54 = vector.shape_cast %53 : vector<1x1x1x128xf32> to vector<1x128xf32>
    %55 = vector.shape_cast %52 : vector<1x128xf32> to vector<1x1x1x128xf32>
    tpu.vector_store %arg7[%c0_34, %c0_35, %c0_36, %c0_37], %55 {strides = array<i32>} : memref<1x1x1x128xf32, #tpu.memory_space<vmem>>, vector<1x1x1x128xf32>,
    return
  }
  func.func @transform_0(%arg0: i32, %arg1: i32) -> (i32, i32, i32, i32) {
    %c0_i32 = arith.constant 0 : i32
    %c0_i32_0 = arith.constant 0 : i32
    %c0_i32_1 = arith.constant 0 : i32
    return %arg0, %arg1, %c0_i32, %c0_i32_0 : i32, i32, i32, i32
  }
  func.func @transform_1(%arg0: i32, %arg1: i32) -> (i32, i32) {
    %c0_i32 = arith.constant 0 : i32
    %c0_i32_0 = arith.constant 0 : i32
    %c0_i32_1 = arith.constant 0 : i32
    return %c0_i32, %c0_i32_0 : i32, i32
  }
  func.func @transform_2(%arg0: i32, %arg1: i32) -> (i32, i32) {
    %c0_i32 = arith.constant 0 : i32
    %c0_i32_0 = arith.constant 0 : i32
    %c0_i32_1 = arith.constant 0 : i32
    return %c0_i32, %c0_i32_0 : i32, i32
  }
  func.func @transform_3(%arg0: i32, %arg1: i32) -> (i32, i32, i32, i32) {
    %c0_i32 = arith.constant 0 : i32
    %c0_i32_0 = arith.constant 0 : i32
    %c0_i32_1 = arith.constant 0 : i32
    return %arg0, %arg1, %c0_i32, %c0_i32_0 : i32, i32, i32, i32
  }
  func.func @transform_4(%arg0: i32, %arg1: i32) -> (i32, i32, i32, i32) {
    %c0_i32 = arith.constant 0 : i32
    %c0_i32_0 = arith.constant 0 : i32
    %c0_i32_1 = arith.constant 0 : i32
    return %arg0, %arg1, %c0_i32, %c0_i32_0 : i32, i32, i32, i32
  }
  func.func @transform_5(%arg0: i32, %arg1: i32) -> (i32, i32, i32, i32) {
    %c0_i32 = arith.constant 0 : i32
    %c0_i32_0 = arith.constant 0 : i32
    %c0_i32_1 = arith.constant 0 : i32
    return %arg0, %arg1, %c0_i32, %c0_i32_0 : i32, i32, i32, i32
  }
}

</mosaic_0001>

<bundles_post_ra>
// kernel: tpu_custom_call.1
= control target key start
LH: loop header
LB: loop body
LE: loop exit
PB: predicated region body
PF: predicated region fallthrough
CT: control target
= control target key end

     0   :  { %s3358_s0 = inlined_call_operand.vmem [shape: f32[2,2,184,4], index: 0, kind: input, shape index: {}]   ;;  %s3359_s1 = inlined_call_operand.vmem [shape: f32[36,128], index: 1, kind: input, shape index: {}]   ;;  %s3360_s2 = inlined_call_operand.vmem [shape: f32[144,1], index: 2, kind: input, shape index: {}]   ;;  %s3361_s3 = inlined_call_operand.hbm [shape: f32[2,2,144,128], index: 3, kind: output, shape index: {0}]   ;;  %s3362_s4 = inlined_call_operand.hbm [shape: f32[2,2,1,128], index: 4, kind: output, shape index: {1}]   ;;  %s3363_s5 = inlined_call_operand.hbm [shape: f32[2,2,1,128], index: 5, kind: output, shape index: {2}]  }
   0x1   :  { %3367 = sst [smem:[#allocation9_spill]] %s3358_s0 }
   0x2   :  { %11 = vsyncpa [#allocation3], 0 }
   0x3   :  { %13 = vsyncpa [#allocation3 + $0x1], 0 }
   0x4   :  { %14 = vsyncpa [#allocation5], 0 }
   0x5   :  { %16 = vsyncpa [#allocation5 + $0x1], 0  ;;  %s2172_s18 = smov 0   ;;  %s2174_s19 = smov 0  }
   0x6   :  { %s2176_s20 = smov 0   ;;  %s2178_s21 = smov 0  }
   0x7   :  { %s2180_s22 = smov 0   ;;  %s2182_s23 = smov 0  }
   0x8   :  { %s2184_s24 = smov 0   ;;  %s2186_s25 = smov 0  }
   0x9 LB: > { %s3365_s26 = sadd.s32 4294967295, %s2127_s25   ;;  %s3364_s27 = sadd.s32 4294967294, %s2127_s25   ;;  %s2127_s25 = sphi %s2186_s25, %s22_s25   ;;  %s2123_s24 = sphi %s2184_s24, %s3381_s24   ;;  %s2119_s23 = sphi %s2182_s23, %s3380_s23   ;;  %s2115_s22 = sphi %s2180_s22, %s3379_s22   ;;  %s2111_s21 = sphi %s2178_s21, %s3378_s21   ;;  %s2107_s20 = sphi %s2176_s20, %s3377_s20   ;;  %s2103_s19 = sphi %s2174_s19, %s3376_s19   ;;  %s2099_s18 = sphi %s2172_s18, %s3375_s18  }
   0xa   : > { %s31_s28 = sadd.s32 1, %s2119_s23  ;;  %s34_s29 = sadd.s32 1, %s2123_s24 }
   0xb   : > { %p32_p0 = scmp.ge.s32.totalorder %s31_s28, 2  ;;  %p123_p1 = scmp.ne.s32.totalorder %s2107_s20, %s2103_s19 }
   0xc   : > { %p124_p2 = scmp.eq.s32.totalorder %s3365_s26, 3  ;;  %p129_p5 = scmp.ne.s32.totalorder %s2103_s19, %s2099_s18 }
   0xd   : > { %s3383_s28 = smov (%p32_p0, %s31_s28), 0  ;;  %s3385_s29 = smov (!%p32_p0, %s34_s29), %s2123_s24 }
   0xe   : > { %s109_s30 = ssub.s32 %s2119_s23, %s3383_s28  ;;  %p2225_p3 = por %p124_p2, %p123_p1 }
   0xf   : > { %p36_p4 = scmp.ge.s32.totalorder %s3385_s29, 2  ;;  %p130_p6 = scmp.eq.s32.totalorder %s3364_s27, 3 }
  0x10   : > { %p1765_p7 = scmp.ge.s32.totalorder %s2127_s25, 1  ;;  %p222_p9 = scmp.lt.s32.totalorder %s2127_s25, 5 }
  0x11   : > { %s3387_s29 = smov (%p36_p4, %s3385_s29), 0  ;;  %p2236_p8 = por %p130_p6, %p129_p5 }
  0x12   : > { %s108_s8 = ssub.s32 %s2123_s24, %s3387_s29  ;;  %s113_s9 = sadd.s32 1, %s2107_s20 }
  0x13   : > { %s110_s10 = sor.u32 %s109_s30, %s108_s8  ;;  %p223_p10 = pnand %p1765_p7, %p222_p9 }
  0x14   : > { %p111_p11 = scmp.eq.s32.totalorder %s110_s10, 0  ;;  %p262_p12 = scmp.lt.s32.totalorder (!%p223_p10), %s2115_s22, 1  ;;  %vm313_vm0 = vcmask (!%p223_p10), 1046528   ;;  %vm405_vm1 = vcmask (!%p223_p10), 1045504   ;;  %vm557_vm2 = vcmask (!%p223_p10), 1044480   ;;  %vm649_vm3 = vcmask (!%p223_p10), 1043456  }
  0x15   : > { %226 = sbr.rel (%p223_p10) target bundleno = 721 (0x2d1), region = 32  ;;  %p264_p13 = scmp.lt.s32.totalorder (!%p223_p10), %s2111_s21, 1  ;;  %vm801_vm4 = vcmask (!%p223_p10), 1042432   ;;  %vm893_vm5 = vcmask (!%p223_p10), 1041408   ;;  %vm985_vm6 = vcmask (!%p223_p10), 31744   ;;  %vm1004_vm7 = vcmask (!%p223_p10), 64512  }
  0x16   : > { %s2245_s11 = scalar_select %p111_p11, %s2107_s20, %s113_s9  }
  0x17   : > { %s3370_s0 = sld [smem:[#allocation9_spill]] (!%p223_p10)  ;;  %s2129_s26 = smov (!%p223_p10), 4   ;;  %vm1023_vm8 = vcmask (!%p223_p10), 97280   ;;  %vm1042_vm9 = vcmask (!%p223_p10), 130048   ;;  %vm1061_vm10 = vcmask (!%p223_p10), 162816   ;;  %vm1080_vm11 = vcmask (!%p223_p10), 195584  }
  0x18   : > { %s2130_s27 = smov (!%p223_p10), 8   ;;  %s2131_s8 = smov (!%p223_p10), 12   ;;  %vm1099_vm12 = vcmask (!%p223_p10), 228352   ;;  %vm1118_vm13 = vcmask (!%p223_p10), 261120   ;;  %vm1142_vm14 = vcmask (!%p223_p10), 293888  }
  0x19   : > { %s2132_s9 = smov (!%p223_p10), 16   ;;  %s2133_s10 = smov (!%p223_p10), 20  }
  0x1c   : > { %s263_s12 = scalar_select %p262_p12, %s2115_s22, 1 }
  0x1d   : > { %s265_s13 = scalar_select %p264_p13, %s2111_s21, 1 }
  0x1e   : > { %s1869_s14 = smul.u32 46, %s263_s12  ;;  %s2134_s12 = smov 24  }
  0x1f   : > { %s1868_s15 = smul.u32 23, %s265_s13 }
  0x20   : > { %s1870_s13 = smul.u32 18, %s2111_s21 }
  0x21   : > { %s268_s16 = sadd.s32 %s1869_s14, %s1868_s15  ;;  %s2136_s14 = smov 32  }
  0x22   : > { %s1766_s17 = sshll.u32 %s268_s16, 3  ;;  %s2135_s16 = smov 28  }
  0x23   : > { %s2254_s30 = scalar_lea.vmem %s3370_s0, %s1766_s17 }
  0x24   : > { %v2257_v0 = vld [vmem:[%s2254_s30 + $0x10] sm:$0xff]  ;;  %v2260_v1 = vld [vmem:[%s2254_s30 + $0x18] sm:$0xff]  ;;  %v2263_v2 = vld [vmem:[%s2254_s30] sm:$0xff] }
  0x25   : > { %v317_v3 = vrot.slane %v2257_v0, 1  ;;  %v319_v4 = vrot.slane %v2260_v1, 1  ;;  %v2268_v5 = vld [vmem:[%s2254_s30 + $0x8] sm:$0xff]  ;;  %v314_v6 = vrot.slane %v2263_v2, 1  ;;  %v2272_v7 = vld [vmem:[%s2254_s30 + $0x20] sm:$0xff]  ;;  %v2280_v11 = vld [vmem:[%s2254_s30 + $0x30] sm:$0xff] }
  0x26   : > { %v315_v8 = vrot.slane %v2268_v5, 1  ;;  %v321_v9 = vrot.slane %v2272_v7, 1  ;;  %v2277_v10 = vld [vmem:[%s2254_s30 + $0x28] sm:$0xff]  ;;  %v325_v16 = vrot.slane %v2280_v11, 1  ;;  %v2291_v18 = vld [vmem:[%s2254_s30 + $0x38] sm:$0xff]  ;;  %v2294_v19 = vld [vmem:[%s2254_s30 + $0x40] sm:$0xff] }
  0x27   : > { %v320_v12 = vsel %vm313_vm0, %v317_v3, %v319_v4  ;;  %v323_v15 = vrot.slane %v2277_v10, 1  ;;  %v327_v21 = vrot.slane %v2291_v18, 1  ;;  %v329_v22 = vrot.slane %v2294_v19, 1  ;;  %v2303_v24 = vld [vmem:[%s2254_s30 + $0x48] sm:$0xff]  ;;  %v2306_v25 = vld [vmem:[%s2254_s30 + $0x50] sm:$0xff]  ;;  %v2315_v30 = vld [vmem:[%s2254_s30 + $0x58] sm:$0xff] }
  0x28   : > { %355 = vrot.lane.b32.xlu1 %v320_v12, %s2129_s26  ;;  %v316_v13 = vsel %vm313_vm0, %v314_v6, %v315_v8  ;;  %v322_v14 = vsel %vm313_vm0, %v319_v4, %v321_v9  ;;  %v318_v17 = vsel %vm313_vm0, %v315_v8, %v317_v3  ;;  %v331_v27 = vrot.slane %v2303_v24, 1  ;;  %v2318_v31 = vld [vmem:[%s2254_s30 + $0x60] sm:$0xff]  ;;  %v2327_v36 = vld [vmem:[%s2254_s30 + $0x68] sm:$0xff]  ;;  %v2330_v37 = vld [vmem:[%s2254_s30 + $0x70] sm:$0xff] }
  0x29   : > { %351 = vrot.lane.b32.xlu0 %v316_v13, %s2129_s26  ;;  %v326_v20 = vsel %vm313_vm0, %v323_v15, %v325_v16  ;;  %v324_v23 = vsel %vm313_vm0, %v321_v9, %v323_v15  ;;  %v330_v26 = vsel %vm313_vm0, %v327_v21, %v329_v22  ;;  %v333_v28 = vrot.slane %v2306_v25, 1  ;;  %v1137_v6 = vld [vmem:[%s3359_s1] sm:$0xff]  ;;  %v1138_v8 = vld [vmem:[%s3359_s1 + $0x8] sm:$0xff] }
  0x2a   : > { %v328_v29 = vsel %vm313_vm0, %v325_v16, %v327_v21  ;;  %v335_v33 = vrot.slane %v2315_v30, 1  ;;  %v337_v34 = vrot.slane %v2318_v31, 1  ;;  %v332_v35 = vsel %vm313_vm0, %v329_v22, %v331_v27  ;;  %v1139_v16 = vld [vmem:[%s3359_s1 + $0x10] sm:$0xff] }
  0x2b   : > { %v334_v32 = vsel %vm313_vm0, %v331_v27, %v333_v28  ;;  %v339_v39 = vrot.slane %v2327_v36, 1  ;;  %v341_v40 = vrot.slane %v2330_v37, 1  ;;  %v407_v43 = vrot.slane %v2268_v5, 2 }
  0x2c   : > { %357 = vrot.lane.b32.xlu1 %v322_v14, %s2129_s26  ;;  %v338_v38 = vsel %vm313_vm0, %v335_v33, %v337_v34  ;;  %v336_v41 = vsel %vm313_vm0, %v333_v28, %v335_v33  ;;  %v409_v44 = vrot.slane %v2257_v0, 2  ;;  %v406_v46 = vrot.slane %v2263_v2, 2 }
  0x2d   : > { %353 = vrot.lane.b32.xlu0 %v318_v17, %s2129_s26  ;;  %v342_v42 = vsel %vm313_vm0, %v339_v39, %v341_v40  ;;  %v340_v45 = vsel %vm313_vm0, %v337_v34, %v339_v39  ;;  %v411_v48 = vrot.slane %v2260_v1, 2  ;;  %v413_v49 = vrot.slane %v2272_v7, 2  ;;  %v1140_v17 = vld [vmem:[%s3359_s1 + $0x18] sm:$0xff] }
  0x2e   : > { %v410_v47 = vsel %vm405_vm1, %v407_v43, %v409_v44  ;;  %v408_v50 = vsel %vm405_vm1, %v406_v46, %v407_v43  ;;  %v559_v52 = vrot.slane %v2260_v1, 3  ;;  %v561_v53 = vrot.slane %v2272_v7, 3 }
  0x2f   : > { %v414_v51 = vsel %vm405_vm1, %v411_v48, %v413_v49  ;;  %v412_v54 = vsel %vm405_vm1, %v409_v44, %v411_v48  ;;  %v558_v55 = vrot.slane %v2257_v0, 3  ;;  %v650_v58 = vrot.slane %v2257_v0, 4 }
  0x30   : > { %361 = vrot.lane.b32.xlu1 %v326_v20, %s2129_s26  ;;  %v562_v56 = vsel %vm557_vm2, %v559_v52, %v561_v53  ;;  %v651_v59 = vrot.slane %v2260_v1, 4  ;;  %v653_v60 = vrot.slane %v2272_v7, 4  ;;  %v655_v61 = vrot.slane %v2277_v10, 4 }
  0x31   : > { %359 = vrot.lane.b32.xlu0 %v324_v23, %s2129_s26  ;;  %v560_v57 = vsel %vm557_vm2, %v558_v55, %v559_v52  ;;  %v415_v3 = vrot.slane %v2277_v10, 2  ;;  %v802_v12 = vrot.slane %v2272_v7, 5  ;;  %v803_v13 = vrot.slane %v2277_v10, 5 }
  0x32   : > { %v652_v62 = vsel %vm649_vm3, %v650_v58, %v651_v59  ;;  %v656_v63 = vsel %vm649_vm3, %v653_v60, %v655_v61  ;;  %v654_v4 = vsel %vm649_vm3, %v651_v59, %v653_v60  ;;  %v1853_v14 = vpack.c.bf16 %v1138_v8, %v1137_v6 }
  0x33   : > { %v416_v9 = vsel %vm405_vm1, %v413_v49, %v415_v3  ;;  %v657_v15 = vrot.slane %v2280_v11, 4  ;;  %v804_v20 = vsel %vm801_vm4, %v802_v12, %v803_v13  ;;  %v563_v21 = vrot.slane %v2277_v10, 3 }
  0x34   : > { %365 = vrot.lane.b32.xlu1 %v330_v26, %s2129_s26  ;;  %1854 = vmatprep.subr.bf16.mxu0 %v1853_v14  ;;  %v1857_v22 = vpack.c.bf16 %v1140_v17, %v1139_v16  ;;  %v417_v26 = vrot.slane %v2280_v11, 2  ;;  %v894_v28 = vrot.slane %v2272_v7, 6  ;;  %v805_v34 = vrot.slane %v2280_v11, 5 }
  0x35   : > { %363 = vrot.lane.b32.xlu0 %v328_v29, %s2129_s26  ;;  %1861 = vmatprep.subr.bf16.mxu1 %v1853_v14  ;;  %v658_v23 = vsel %vm649_vm3, %v655_v61, %v657_v15  ;;  %v564_v27 = vsel %vm557_vm2, %v561_v53, %v563_v21  ;;  %v895_v29 = vrot.slane %v2277_v10, 6  ;;  %v565_v39 = vrot.slane %v2280_v11, 3 }
  0x36   : > { %1856 = vmatpush3.bf16.msra.mxu0 %v1853_v14  ;;  %1864 = vmatpush3.bf16.msra.mxu1 %v1853_v14  ;;  %v418_v33 = vsel %vm405_vm1, %v415_v3, %v417_v26  ;;  %v659_v43 = vrot.slane %v2291_v18, 4  ;;  %v419_v46 = vrot.slane %v2291_v18, 2  ;;  %v807_v48 = vrot.slane %v2291_v18, 5 }
  0x37   : > { %1858 = vmatprep.subr.bf16.mxu0 %v1857_v22  ;;  %1862 = vmatprep.subr.bf16.mxu1 %v1857_v22  ;;  %v661_v49 = vrot.slane %v2294_v19, 4  ;;  %v421_v53 = vrot.slane %v2294_v19, 2  ;;  %v899_v55 = vrot.slane %v2291_v18, 6  ;;  %v569_v60 = vrot.slane %v2294_v19, 3 }
  0x38   : > { %369 = vrot.lane.b32.xlu1 %v334_v32, %s2129_s26  ;;  %v1141_v32 = vld [vmem:[%s3359_s1 + $0x20] sm:$0xf]  ;;  %v901_v61 = vrot.slane %v2294_v19, 6  ;;  %v811_v6 = vrot.slane %v2303_v24, 5  ;;  %v665_v8 = vrot.slane %v2306_v25, 4  ;;  %v571_v12 = vrot.slane %v2303_v24, 3 }
  0x39   : > { %367 = vrot.lane.b32.xlu0 %v332_v35, %s2129_s26  ;;  %v896_v35 = vsel %vm893_vm5, %v894_v28, %v895_v29  ;;  %v662_v52 = vsel %vm649_vm3, %v659_v43, %v661_v49  ;;  %v425_v14 = vrot.slane %v2306_v25, 2  ;;  %v903_v16 = vrot.slane %v2303_v24, 6 }
  0x3a   : > { %1860 = vmatpush3.bf16.msra.mxu0 %v1857_v22  ;;  %1865 = vmatpush3.bf16.msra.mxu1 %v1857_v22 }
  0x3b   : > { %1824 = vmatprep.subr.msk.mxu0 %vm649_vm3, %v1141_v32  ;;  %1863 = vmatprep.subr.msk.mxu1 %vm649_vm3, %v1141_v32 }
  0x3c   : > { %373 = vrot.lane.b32.xlu1 %v338_v38, %s2129_s26  ;;  %v806_v38 = vsel %vm801_vm4, %v803_v13, %v805_v34 }
  0x3d   : > { %371 = vrot.lane.b32.xlu0 %v336_v41, %s2129_s26  ;;  %v566_v41 = vsel %vm557_vm2, %v563_v21, %v565_v39  ;;  %v904_v21 = vsel %vm893_vm5, %v901_v61, %v903_v16 }
  0x3e   : > { %1825 = vmatpush3.msk.msra.mxu0 %vm649_vm3, %v1141_v32  ;;  %1866 = vmatpush3.msk.msra.mxu1 %vm649_vm3, %v1141_v32 }
  0x40   : > { %377 = vrot.lane.b32.xlu1 %v342_v42, %s2129_s26  ;;  %v897_v42 = vrot.slane %v2280_v11, 6 }
  0x41   : > { %375 = vrot.lane.b32.xlu0 %v340_v45, %s2129_s26  ;;  %v660_v45 = vsel %vm649_vm3, %v657_v15, %v659_v43  ;;  %v572_v15 = vsel %vm557_vm2, %v569_v60, %v571_v12 }
  0x42   : > { %v898_v44 = vsel %vm893_vm5, %v895_v29, %v897_v42  ;;  %v900_v58 = vsel %vm893_vm5, %v897_v42, %v899_v55  ;;  %v905_v29 = vrot.slane %v2306_v25, 6 }
  0x44   : > { %445 = vrot.lane.b32.xlu1 %v410_v47, %s2130_s27  ;;  %v420_v47 = vsel %vm405_vm1, %v417_v26, %v419_v46  ;;  %v573_v26 = vrot.slane %v2306_v25, 3 }
  0x45   : > { %443 = vrot.lane.b32.xlu0 %v408_v50, %s2130_s27  ;;  %v808_v50 = vsel %vm801_vm4, %v805_v34, %v807_v48 }
  0x46   : > { %v574_v28 = vsel %vm557_vm2, %v571_v12, %v573_v26 }
  0x48   : > { %505 = vrot.lane.b32.xlu1 %v414_v51, %s2131_s8 }
  0x49   : > { %503 = vrot.lane.b32.xlu0 %v412_v54, %s2131_s8 }
  0x4c   : > { %597 = vrot.lane.b32.xlu1 %v562_v56, %s2132_s9  ;;  %v422_v56 = vsel %vm405_vm1, %v419_v46, %v421_v53  ;;  %v669_v46 = vrot.slane %v2318_v31, 4 }
  0x4d   : > { %595 = vrot.lane.b32.xlu0 %v560_v57, %s2132_s9  ;;  %v809_v57 = vrot.slane %v2294_v19, 5 }
  0x4f   : > { %v810_v59 = vsel %vm801_vm4, %v807_v48, %v809_v57 }
  0x50   : > { %447 = vrot.lane.b32.xlu1 %v412_v54, %s2130_s27 }
  0x51   : > { %687 = vrot.lane.b32.xlu0 %v652_v62, %s2133_s10  ;;  %v663_v62 = vrot.slane %v2303_v24, 4 }
  0x53   : > { %v664_v3 = vsel %vm649_vm3, %v661_v49, %v663_v62  ;;  %v666_v13 = vsel %vm649_vm3, %v663_v62, %v665_v8  ;;  %v575_v49 = vrot.slane %v2315_v30, 3 }
  0x54   : > { %747 = vrot.lane.b32.xlu1 %v656_v63, %s2134_s12 }
  0x55   : > { %689 = vrot.lane.b32.xlu0 %v654_v4, %s2133_s10  ;;  %v423_v4 = vrot.slane %v2303_v24, 2 }
  0x57   : > { %v424_v19 = vsel %vm405_vm1, %v421_v53, %v423_v4  ;;  %v426_v17 = vsel %vm405_vm1, %v423_v4, %v425_v14  ;;  %v909_v4 = vrot.slane %v2318_v31, 6 }
  0x58   : > { %507 = vrot.lane.b32.xlu1 %v416_v9, %s2131_s8 }
  0x59   : > { %449 = vrot.lane.b32.xlu0 %v414_v51, %s2130_s27  ;;  %v567_v51 = vrot.slane %v2291_v18, 3 }
  0x5b   : > { %v568_v54 = vsel %vm557_vm2, %v565_v39, %v567_v51  ;;  %v570_v18 = vsel %vm557_vm2, %v567_v51, %v569_v60  ;;  %v427_v39 = vrot.slane %v2315_v30, 2 }
  0x5c   : > { %839 = vrot.lane.b32.xlu1 %v804_v20, %s2135_s16  ;;  %v813_v20 = vrot.slane %v2306_v25, 5 }
  0x5d   : > { %749 = vrot.lane.b32.xlu0 %v658_v23, %s2134_s12  ;;  %v428_v43 = vsel %vm405_vm1, %v425_v14, %v427_v39 }
  0x60   : > { %599 = vrot.lane.b32.xlu1 %v564_v27, %s2132_s9 }
  0x61   : > { %509 = vrot.lane.b32.xlu0 %v418_v33, %s2131_s8 }
  0x64   : > { %931 = vrot.lane.b32.xlu1 %v896_v35, %s2136_s14  ;;  %v906_v35 = vsel %vm893_vm5, %v903_v16, %v905_v29 }
  0x65   : > { %841 = vrot.lane.b32.xlu0 %v806_v38, %s2135_s16 }
  0x68   : > { %691 = vrot.lane.b32.xlu1 %v656_v63, %s2133_s10  ;;  %v902_v63 = vsel %vm893_vm5, %v899_v55, %v901_v61  ;;  %v907_v55 = vrot.slane %v2315_v30, 6 }
  0x69   : > { %601 = vrot.lane.b32.xlu0 %v566_v41, %s2132_s9 }
  0x6a   : > { %v908_v60 = vsel %vm893_vm5, %v905_v29, %v907_v55  ;;  %v579_v29 = vrot.slane %v2327_v36, 3 }
  0x6c   : > { %451 = vrot.lane.b32.xlu1 %v416_v9, %s2130_s27  ;;  %v812_v9 = vsel %vm801_vm4, %v809_v57, %v811_v6 }
  0x6d   : > { %933 = vrot.lane.b32.xlu0 %v898_v44, %s2136_s14  ;;  %v815_v44 = vrot.slane %v2315_v30, 5 }
  0x6f   : > { %v816_v48 = vsel %vm801_vm4, %v813_v20, %v815_v44 }
  0x70   : > { %751 = vrot.lane.b32.xlu1 %v660_v45, %s2134_s12 }
  0x71   : > { %693 = vrot.lane.b32.xlu0 %v658_v23, %s2133_s10  ;;  %v814_v23 = vsel %vm801_vm4, %v811_v6, %v813_v20  ;;  %v671_v6 = vrot.slane %v2327_v36, 4 }
  0x74   : > { %511 = vrot.lane.b32.xlu1 %v420_v47, %s2131_s8 }
  0x75   : > { %453 = vrot.lane.b32.xlu0 %v418_v33, %s2130_s27  ;;  %v667_v33 = vrot.slane %v2315_v30, 4  ;;  %v577_v30 = vrot.slane %v2318_v31, 3 }
  0x77   : > { %v668_v25 = vsel %vm649_vm3, %v665_v8, %v667_v33  ;;  %v670_v51 = vsel %vm649_vm3, %v667_v33, %v669_v46 }
  0x78   : > { %843 = vrot.lane.b32.xlu1 %v808_v50, %s2135_s16 }
  0x79   : > { %753 = vrot.lane.b32.xlu0 %v662_v52, %s2134_s12 }
  0x7c   : > { %603 = vrot.lane.b32.xlu1 %v568_v54, %s2132_s9  ;;  %v576_v54 = vsel %vm557_vm2, %v573_v26, %v575_v49  ;;  %v2137_v26 = vmov 0  }
  0x7d   : > { %513 = vrot.lane.b32.xlu0 %v422_v56, %s2131_s8  ;;  %1964 = vset.pattern.permute.xlu1 %v2137_v26 }
  0x7e   : > { %1963 = vset.pattern.permute.xlu0 %v2137_v26 }
  0x80   : > { %935 = vrot.lane.b32.xlu1 %v900_v58, %s2136_s14  ;;  %v817_v58 = vrot.slane %v2318_v31, 5 }
  0x81   : > { %845 = vrot.lane.b32.xlu0 %v810_v59, %s2135_s16 }
  0x82   : > { %v818_v61 = vsel %vm801_vm4, %v815_v44, %v817_v58  ;;  %v911_v44 = vrot.slane %v2327_v36, 6 }
  0x84   : > { %695 = vrot.lane.b32.xlu1 %v660_v45, %s2133_s10 }
  0x85   : > { %605 = vrot.lane.b32.xlu0 %v570_v18, %s2132_s9 }
  0x88   : > { %455 = vrot.lane.b32.xlu1 %v420_v47, %s2130_s27 }
  0x89   : > { %937 = vrot.lane.b32.xlu0 %v902_v63, %s2136_s14 }
  0x8c   : > { %755 = vrot.lane.b32.xlu1 %v664_v3, %s2134_s12 }
  0x8d   : > { %697 = vrot.lane.b32.xlu0 %v662_v52, %s2133_s10  ;;  %v429_v52 = vrot.slane %v2318_v31, 2  ;;  %v431_v31 = vrot.slane %v2327_v36, 2 }
  0x8f   : > { %v430_v57 = vsel %vm405_vm1, %v427_v39, %v429_v52  ;;  %v2572_v16 = vsel %vm405_vm1, %v429_v52, %v431_v31 }
  0x90   : > { %515 = vrot.lane.b32.xlu1 %v424_v19, %s2131_s8 }
  0x91   : > { %457 = vrot.lane.b32.xlu0 %v422_v56, %s2130_s27 }
  0x94   : > { %847 = vrot.lane.b32.xlu1 %v812_v9, %s2135_s16  ;;  %v910_v9 = vsel %vm893_vm5, %v907_v55, %v909_v4 }
  0x95   : > { %757 = vrot.lane.b32.xlu0 %v666_v13, %s2134_s12 }
  0x98   : > { %607 = vrot.lane.b32.xlu1 %v572_v15, %s2132_s9 }
  0x99   : > { %517 = vrot.lane.b32.xlu0 %v426_v17, %s2131_s8 }
  0x9a   : > { %v2485_v22 = vpop.permute.xlu1 %355 }
  0x9b   : > { %v2489_v27 = vpop.permute.xlu0 %351 }
  0x9c   : > { %939 = vrot.lane.b32.xlu1 %v904_v21, %s2136_s14  ;;  %v673_v21 = vrot.slane %v2330_v37, 4  ;;  %v986_v52 = vsel %vm985_vm6, %v2263_v2, %v2489_v27  ;;  %v581_v27 = vrot.slane %v2330_v37, 3 }
  0x9d   : > { %849 = vrot.lane.b32.xlu0 %v814_v23, %s2135_s16 }
  0x9e   : > { %v2493_v24 = vpop.permute.xlu1 %357 }
  0x9f   : > { %v2497_v32 = vpop.permute.xlu0 %353 }
  0xa0   : > { %699 = vrot.lane.b32.xlu1 %v664_v3, %s2133_s10  ;;  %v578_v3 = vsel %vm557_vm2, %v575_v49, %v577_v30  ;;  %v821_v49 = vrot.slane %v2330_v37, 5 }
  0xa1   : > { %609 = vrot.lane.b32.xlu0 %v574_v28, %s2132_s9 }
  0xa2   : > { %v2502_v34 = vpop.permute.xlu1 %361 }
  0xa3   : > { %v2505_v38 = vpop.permute.xlu0 %359 }
  0xa4   : > { %459 = vrot.lane.b32.xlu1 %v424_v19, %s2130_s27 }
  0xa5   : > { %941 = vrot.lane.b32.xlu0 %v906_v35, %s2136_s14  ;;  %v2588_v35 = vsel %vm649_vm3, %v671_v6, %v673_v21 }
  0xa6   : > { %v2511_v41 = vpop.permute.xlu1 %365 }
  0xa7   : > { %v2513_v42 = vpop.permute.xlu0 %363 }
  0xa8   : > { %759 = vrot.lane.b32.xlu1 %v668_v25, %s2134_s12 }
  0xa9   : > { %701 = vrot.lane.b32.xlu0 %v666_v13, %s2133_s10  ;;  %v672_v13 = vsel %vm649_vm3, %v669_v46, %v671_v6  ;;  %v2627_v6 = vld [vmem:[%s2254_s30 + $0x78] sm:$0xff] }
  0xaa   : > { %v2519_v45 = vpop.permute.xlu1 %369 }
  0xab   : > { %v2522_v47 = vpop.permute.xlu0 %367 }
  0xac   : > { %519 = vrot.lane.b32.xlu1 %v428_v43, %s2131_s8 }
  0xad   : > { %461 = vrot.lane.b32.xlu0 %v426_v17, %s2130_s27  ;;  %v819_v17 = vrot.slane %v2327_v36, 5  ;;  %v912_v36 = vsel %vm893_vm5, %v909_v4, %v911_v44  ;;  %v582_v4 = vsel %vm557_vm2, %v579_v29, %v581_v27 }
  0xae   : > { %v2528_v50 = vpop.permute.xlu1 %373 }
  0xaf   : > { %v2532_v53 = vpop.permute.xlu0 %371  ;;  %v820_v28 = vsel %vm801_vm4, %v817_v58, %v819_v17  ;;  %v822_v2 = vsel %vm801_vm4, %v819_v17, %v821_v49 }
  0xb0   : > { %851 = vrot.lane.b32.xlu1 %v816_v48, %s2135_s16 }
  0xb1   : > { %761 = vrot.lane.b32.xlu0 %v670_v51, %s2134_s12 }
  0xb2   : > { %v2538_v56 = vpop.permute.xlu1 %377 }
  0xb3   : > { %v2542_v59 = vpop.permute.xlu0 %375 }
  0xb4   : > { %611 = vrot.lane.b32.xlu1 %v576_v54, %s2132_s9 }
  0xb5   : > { %521 = vrot.lane.b32.xlu0 %v430_v57, %s2131_s8 }
  0xb6   : > { %v2547_v18 = vpop.permute.xlu1 %445 }
  0xb7   : > { %v444_v62 = vpop.permute.xlu0 %443 }
  0xb8   : > { %943 = vrot.lane.b32.xlu1 %v908_v60, %s2136_s14  ;;  %v1005_v54 = vsel %vm1004_vm7, %v986_v52, %v444_v62 }
  0xb9   : > { %853 = vrot.lane.b32.xlu0 %v818_v61, %s2135_s16 }
  0xba   : > { %v2553_v63 = vpop.permute.xlu1 %505 }
  0xbb   : > { %v504_v19 = vpop.permute.xlu0 %503 }
  0xbc   : > { %703 = vrot.lane.b32.xlu1 %v668_v25, %s2133_s10  ;;  %v433_v25 = vrot.slane %v2330_v37, 2  ;;  %v1024_v55 = vsel %vm1023_vm8, %v1005_v54, %v504_v19  ;;  %v913_v19 = vrot.slane %v2330_v37, 6 }
  0xbd   : > { %613 = vrot.lane.b32.xlu0 %v578_v3, %s2132_s9 }
  0xbe   : > { %v2560_v8 = vpop.permute.xlu1 %597  ;;  %v434_v48 = vsel %vm405_vm1, %v431_v31, %v433_v25  ;;  %v987_v31 = vsel %vm985_vm6, %v2268_v5, %v2497_v32  ;;  %v914_v26 = vsel %vm893_vm5, %v911_v44, %v913_v19 }
  0xbf   : > { %v596_v12 = vpop.permute.xlu0 %595  ;;  %v1006_v17 = vsel %vm1004_vm7, %v987_v31, %v2547_v18  ;;  %v435_v18 = vrot.slane %v2627_v6, 2 }
  0xc0   : > { %463 = vrot.lane.b32.xlu1 %v428_v43, %s2130_s27  ;;  %v580_v43 = vsel %vm557_vm2, %v577_v30, %v579_v29  ;;  %v1043_v58 = vsel %vm1042_vm9, %v1024_v55, %v596_v12 }
  0xc1   : > { %945 = vrot.lane.b32.xlu0 %v910_v9, %s2136_s14 }
  0xc2   : > { %v2567_v14 = vpop.permute.xlu1 %447 }
  0xc3   : > { %v688_v15 = vpop.permute.xlu0 %687 }
  0xc4   : > { %763 = vrot.lane.b32.xlu1 %v672_v13, %s2134_s12  ;;  %v1062_v61 = vsel %vm1061_vm10, %v1043_v58, %v688_v15  ;;  %v675_v15 = vrot.slane %v2627_v6, 4 }
  0xc5   : > { %705 = vrot.lane.b32.xlu0 %v670_v51, %s2133_s10 }
  0xc6   : > { %v748_v20 = vpop.permute.xlu1 %747  ;;  %v2654_v32 = vsel %vm649_vm3, %v673_v21, %v675_v15  ;;  %v2673_v21 = vsel %vm405_vm1, %v433_v25, %v435_v18 }
  0xc7   : > { %v2576_v23 = vpop.permute.xlu0 %689  ;;  %v1081_v30 = vsel %vm1080_vm11, %v1062_v61, %v748_v20 }
  0xc8   : > { %523 = vrot.lane.b32.xlu1 %v2572_v16, %s2131_s8 }
  0xc9   : > { %465 = vrot.lane.b32.xlu0 %v430_v57, %s2130_s27 }
  0xca   : > { %v2583_v33 = vpop.permute.xlu1 %507 }
  0xcb   : > { %v2591_v39 = vpop.permute.xlu0 %449 }
  0xcc   : > { %855 = vrot.lane.b32.xlu1 %v820_v28, %s2135_s16 }
  0xcd   : > { %765 = vrot.lane.b32.xlu0 %v2588_v35, %s2134_s12 }
  0xce   : > { %v840_v46 = vpop.permute.xlu1 %839 }
  0xcf   : > { %v750_v51 = vpop.permute.xlu0 %749  ;;  %v1100_v62 = vsel %vm1099_vm12, %v1081_v30, %v840_v46  ;;  %v823_v46 = vrot.slane %v2627_v6, 5 }
  0xd0   : > { %615 = vrot.lane.b32.xlu1 %v580_v43, %s2132_s9 }
  0xd1   : > { %525 = vrot.lane.b32.xlu0 %v434_v48, %s2131_s8 }
  0xd2   : > { %v2610_v57 = vpop.permute.xlu1 %599 }
  0xd3   : > { %v2617_v60 = vpop.permute.xlu0 %509 }
  0xd4   : > { %947 = vrot.lane.b32.xlu1 %v912_v36, %s2136_s14  ;;  %v583_v36 = vrot.slane %v2627_v6, 3 }
  0xd5   : > { %857 = vrot.lane.b32.xlu0 %v822_v2, %s2135_s16 }
  0xd6   : > { %v932_v3 = vpop.permute.xlu1 %931 }
  0xd7   : > { %v842_v9 = vpop.permute.xlu0 %841  ;;  %v1119_v12 = vsel %vm1118_vm13, %v1100_v62, %v932_v3 }
  0xd8   : > { %707 = vrot.lane.b32.xlu1 %v672_v13, %s2133_s10  ;;  %1826 = vmatprep.mubr.msk.f32.mxu0 %vm1142_vm14, %v1119_v12  ;;  %v1025_v13 = vsel %vm1023_vm8, %v1006_v17, %v2553_v63 }
  0xd9   : > { %617 = vrot.lane.b32.xlu0 %v582_v4, %s2132_s9  ;;  %v1044_v29 = vsel %vm1042_vm9, %v1025_v13, %v2560_v8  ;;  %v988_v4 = vsel %vm985_vm6, %v2257_v0, %v2485_v22  ;;  %v343_v22 = vrot.slane %v2627_v6, 1 }
  0xda   : > { %v692_v20 = vpop.permute.xlu1 %691  ;;  %v1063_v5 = vsel %vm1061_vm10, %v1044_v29, %v2576_v23 }
  0xdb   : > { %v2642_v28 = vpop.permute.xlu0 %601  ;;  %v1082_v63 = vsel %vm1080_vm11, %v1063_v5, %v750_v51 }
  0xdc   : > { %467 = vrot.lane.b32.xlu1 %v2572_v16, %s2130_s27  ;;  %v1101_v8 = vsel %vm1099_vm12, %v1082_v63, %v842_v9  ;;  %v2662_v16 = vld [vmem:[%s2254_s30 + $0x80] sm:$0xff]  ;;  %v989_v63 = vsel %vm985_vm6, %v2260_v1, %v2493_v24 }
  0xdd   : > { %949 = vrot.lane.b32.xlu0 %v914_v26, %s2136_s14  ;;  %v677_v52 = vrot.slane %v2662_v16, 4  ;;  %v437_v2 = vrot.slane %v2662_v16, 2  ;;  %v825_v62 = vrot.slane %v2662_v16, 5  ;;  %v585_v12 = vrot.slane %v2662_v16, 3 }
  0xde   : > { %v2658_v43 = vpop.permute.xlu1 %451  ;;  %v917_v13 = vrot.slane %v2662_v16, 6  ;;  %v1008_v37 = vsel %vm1004_vm7, %v989_v63, %v2591_v39 }
  0xdf   : > { %v934_v44 = vpop.permute.xlu0 %933  ;;  %v2689_v25 = vsel %vm649_vm3, %v675_v15, %v677_v52  ;;  %v2702_v30 = vsel %vm405_vm1, %v435_v18, %v437_v2  ;;  %v826_v0 = vsel %vm801_vm4, %v823_v46, %v825_v62 }
  0xe0   : > { %v1120_v23 = vsel %vm1118_vm13, %v1101_v8, %v934_v44  ;;  %767 = vrot.lane.b32.xlu1 %v2654_v32, %s2134_s12  ;;  %v345_v44 = vrot.slane %v2662_v16, 1 }
  0xe1   : > { %709 = vrot.lane.b32.xlu0 %v2588_v35, %s2133_s10  ;;  %1827 = vmatmul.mubr.msk.f32.vlgmr.msra.gmra.mrb[0].mxu0 %vm1142_vm14, %v1120_v23  ;;  %v824_v35 = vsel %vm801_vm4, %v821_v49, %v823_v46  ;;  %v915_v49 = vrot.slane %v2627_v6, 6  ;;  %v2753_v23 = vld [vmem:[%s2254_s30 + $0x88] sm:$0xff]  ;;  %v1027_v46 = vsel %vm1023_vm8, %v1008_v37, %v2617_v60 }
  0xe2   : > { %v752_v51 = vpop.permute.xlu1 %751  ;;  %v1046_v1 = vsel %vm1042_vm9, %v1027_v46, %v2642_v28  ;;  %v679_v39 = vrot.slane %v2753_v23, 4  ;;  %v346_v60 = vsel %vm313_vm0, %v343_v22, %v345_v44  ;;  %v347_v37 = vrot.slane %v2753_v23, 1 }
  0xe3   : > { %v694_v54 = vpop.permute.xlu0 %693  ;;  %v916_v9 = vsel %vm893_vm5, %v913_v19, %v915_v49  ;;  %v918_v8 = vsel %vm893_vm5, %v915_v49, %v917_v13 }
  0xe4   : > { %527 = vrot.lane.b32.xlu1 %v2673_v21, %s2131_s8  ;;  %v1065_v24 = vsel %vm1061_vm10, %v1046_v1, %v694_v54  ;;  %v439_v54 = vrot.slane %v2753_v23, 2 }
  0xe5   : > { %469 = vrot.lane.b32.xlu0 %v434_v48, %s2130_s27  ;;  %v584_v48 = vsel %vm557_vm2, %v581_v27, %v583_v36  ;;  %v1007_v27 = vsel %vm1004_vm7, %v988_v4, %v2567_v14  ;;  %v2785_v4 = vld [vmem:[%s2254_s30 + $0x90] sm:$0xff] }
  0xe6   : > { %v2684_v55 = vpop.permute.xlu1 %511  ;;  %v1026_v31 = vsel %vm1023_vm8, %v1007_v27, %v2583_v33  ;;  %v586_v33 = vsel %vm557_vm2, %v583_v36, %v585_v12 }
  0xe7   : > { %v2692_v58 = vpop.permute.xlu0 %453  ;;  %v1045_v14 = vsel %vm1042_vm9, %v1026_v31, %v2610_v57 }
  0xe8   : > { %859 = vrot.lane.b32.xlu1 %v824_v35, %s2135_s16  ;;  %v1064_v19 = vsel %vm1061_vm10, %v1045_v14, %v692_v20  ;;  %v344_v20 = vsel %vm313_vm0, %v341_v40, %v343_v22  ;;  %v441_v14 = vrot.slane %v2785_v4, 2 }
  0xe9   : > { %769 = vrot.lane.b32.xlu0 %v2689_v25, %s2134_s12  ;;  %v1083_v26 = vsel %vm1080_vm11, %v1064_v19, %v752_v51 }
  0xea   : > { %v844_v61 = vpop.permute.xlu1 %843 }
  0xeb   : > { %v754_v3 = vpop.permute.xlu0 %753  ;;  %v1102_v29 = vsel %vm1099_vm12, %v1083_v26, %v844_v61  ;;  %v990_v26 = vsel %vm985_vm6, %v2272_v7, %v2505_v38  ;;  %v2835_v7 = vsel %vm405_vm1, %v439_v54, %v441_v14  ;;  %v829_v38 = vrot.slane %v2785_v4, 5 }
  0xec   : > { %619 = vrot.lane.b32.xlu1 %v584_v48, %s2132_s9  ;;  %v1084_v35 = vsel %vm1080_vm11, %v1065_v24, %v754_v3  ;;  %v921_v24 = vrot.slane %v2785_v4, 6 }
  0xed   : > { %529 = vrot.lane.b32.xlu0 %v2702_v30, %s2131_s8 }
  0xee   : > { %v2717_v15 = vpop.permute.xlu1 %603 }
  0xef   : > { %v2725_v17 = vpop.permute.xlu0 %513 }
  0xf0   : > { %951 = vrot.lane.b32.xlu1 %v916_v9, %s2136_s14  ;;  %v681_v9 = vrot.slane %v2785_v4, 4 }
  0xf1   : > { %861 = vrot.lane.b32.xlu0 %v826_v0, %s2135_s16 }
  0xf2   : > { %v936_v57 = vpop.permute.xlu1 %935  ;;  %v2813_v22 = vsel %vm649_vm3, %v679_v39, %v681_v9 }
  0xf3   : > { %v1121_v5 = vsel %vm1118_vm13, %v1102_v29, %v936_v57  ;;  %v846_v18 = vpop.permute.xlu0 %845 }
  0xf4   : > { %621 = vrot.lane.b32.xlu1 %v586_v33, %s2132_s9  ;;  %1829 = vmatprep.mubr.msk.f32.mxu0 %vm1142_vm14, %v1121_v5  ;;  %v1103_v28 = vsel %vm1099_vm12, %v1084_v35, %v846_v18  ;;  %v919_v33 = vrot.slane %v2753_v23, 6  ;;  %v589_v18 = vrot.slane %v2785_v4, 3 }
  0xf5   : > { %379 = vrot.lane.b32.xlu0 %v344_v20, %s2129_s26 }
  0xf6   : > { %v696_v40 = vpop.permute.xlu1 %695  ;;  %v920_v5 = vsel %vm893_vm5, %v917_v13, %v919_v33  ;;  %v991_v13 = vsel %vm985_vm6, %v2277_v10, %v2502_v34 }
  0xf7   : > { %v2757_v51 = vpop.permute.xlu0 %605 }
  0xf8   : > { %953 = vrot.lane.b32.xlu1 %v918_v8, %s2136_s14 }
  0xf9   : > { %711 = vrot.lane.b32.xlu0 %v2654_v32, %s2133_s10  ;;  %v2781_v32 = vsel %vm649_vm3, %v677_v52, %v679_v39  ;;  %v827_v52 = vrot.slane %v2753_v23, 5  ;;  %v1010_v39 = vsel %vm1004_vm7, %v991_v13, %v2692_v58  ;;  %v922_v58 = vsel %vm893_vm5, %v919_v33, %v921_v24 }
  0xfa   : > { %v2767_v36 = vpop.permute.xlu1 %455  ;;  %v1029_v10 = vsel %vm1023_vm8, %v1010_v39, %v2725_v17  ;;  %v349_v17 = vrot.slane %v2785_v4, 1  ;;  %v1965_v39 = vld [vmem:[%s2254_s30 + $0x38] sm:$0xff] }
  0xfb   : > { %v938_v48 = vpop.permute.xlu0 %937  ;;  %v830_v8 = vsel %vm801_vm4, %v827_v52, %v829_v38 }
  0xfc   : > { %v1122_v49 = vsel %vm1118_vm13, %v1103_v28, %v938_v48  ;;  %471 = vrot.lane.b32.xlu1 %v2673_v21, %s2130_s27  ;;  %v2794_v21 = vsel %vm405_vm1, %v437_v2, %v439_v54  ;;  %v587_v2 = vrot.slane %v2753_v23, 3  ;;  %v1048_v28 = vsel %vm1042_vm9, %v1029_v10, %v2757_v51  ;;  %v2889_v54 = vld [vmem:[%s2254_s30 + $0x98] sm:$0xff] }
  0xfd   : > { %381 = vrot.lane.b32.xlu0 %v346_v60, %s2129_s26  ;;  %1830 = vmatmul.mubr.msk.f32.gmra.mrb[2].mxu0 %vm1142_vm14, %v1122_v49  ;;  %v348_v60 = vsel %vm313_vm0, %v345_v44, %v347_v37  ;;  %v831_v33 = vrot.slane %v2889_v54, 5 }
  0xfe   : > { %v756_v61 = vpop.permute.xlu1 %755  ;;  %v590_v1 = vsel %vm557_vm2, %v587_v2, %v589_v18 }
  0xff   : > { %v698_v3 = vpop.permute.xlu0 %697 }
 0x100   : > { %771 = vrot.lane.b32.xlu1 %v2781_v32, %s2134_s12  ;;  %v1067_v48 = vsel %vm1061_vm10, %v1048_v28, %v698_v3 }
 0x101   : > { %713 = vrot.lane.b32.xlu0 %v2689_v25, %s2133_s10  ;;  %v828_v25 = vsel %vm801_vm4, %v825_v62, %v827_v52  ;;  %v588_v62 = vsel %vm557_vm2, %v585_v12, %v587_v2  ;;  %v683_v52 = vrot.slane %v2889_v54, 4  ;;  %v350_v2 = vsel %vm313_vm0, %v347_v37, %v349_v17 }
 0x102   : > { %v2797_v27 = vpop.permute.xlu1 %515 }
 0x103   : > { %v2800_v31 = vpop.permute.xlu0 %457 }
 0x104   : > { %531 = vrot.lane.b32.xlu1 %v2794_v21, %s2131_s8 }
 0x105   : > { %473 = vrot.lane.b32.xlu0 %v2702_v30, %s2130_s27  ;;  %v1009_v30 = vsel %vm1004_vm7, %v990_v26, %v2658_v43  ;;  %v499_v26 = vrot.slane %v2889_v54, 2 }
 0x106   : > { %v848_v0 = vpop.permute.xlu1 %847  ;;  %v1028_v29 = vsel %vm1023_vm8, %v1009_v30, %v2684_v55 }
 0x107   : > { %v758_v19 = vpop.permute.xlu0 %757  ;;  %v1047_v43 = vsel %vm1042_vm9, %v1028_v29, %v2717_v15 }
 0x108   : > { %863 = vrot.lane.b32.xlu1 %v828_v25, %s2135_s16  ;;  %v1066_v12 = vsel %vm1061_vm10, %v1047_v43, %v696_v40  ;;  %v1086_v44 = vsel %vm1080_vm11, %v1067_v48, %v758_v19  ;;  %v684_v19 = vsel %vm649_vm3, %v681_v9, %v683_v52 }
 0x109   : > { %773 = vrot.lane.b32.xlu0 %v2813_v22, %s2134_s12  ;;  %v1085_v55 = vsel %vm1080_vm11, %v1066_v12, %v756_v61  ;;  %v992_v12 = vsel %vm985_vm6, %v2280_v11, %v2513_v42 }
 0x10a   : > { %v2830_v57 = vpop.permute.xlu1 %607  ;;  %v1104_v63 = vsel %vm1099_vm12, %v1085_v55, %v848_v0  ;;  %v1011_v55 = vsel %vm1004_vm7, %v992_v12, %v2767_v36 }
 0x10b   : > { %v2840_v20 = vpop.permute.xlu0 %517 }
 0x10c   : > { %623 = vrot.lane.b32.xlu1 %v588_v62, %s2132_s9  ;;  %v2911_v62 = vld [vmem:[%s2254_s30 + $0xa0] sm:$0xff] }
 0x10d   : > { %533 = vrot.lane.b32.xlu0 %v2835_v7, %s2131_s8  ;;  %v685_v29 = vrot.slane %v2911_v62, 4  ;;  %v501_v42 = vrot.slane %v2911_v62, 2  ;;  %v593_v48 = vrot.slane %v2911_v62, 3 }
 0x10e   : > { %v940_v15 = vpop.permute.xlu1 %939 }
 0x10f   : > { %v1123_v40 = vsel %vm1118_vm13, %v1104_v63, %v940_v15  ;;  %v850_v46 = vpop.permute.xlu0 %849  ;;  %v686_v11 = vsel %vm649_vm3, %v683_v52, %v685_v29 }
 0x110   : > { %955 = vrot.lane.b32.xlu1 %v920_v5, %s2136_s14  ;;  %1832 = vmatprep.mubr.msk.f32.mxu0 %vm1142_vm14, %v1123_v40  ;;  %v1105_v51 = vsel %vm1099_vm12, %v1086_v44, %v850_v46  ;;  %v1030_v5 = vsel %vm1023_vm8, %v1011_v55, %v2797_v27  ;;  %v502_v40 = vsel %vm405_vm1, %v499_v26, %v501_v42  ;;  %v833_v46 = vrot.slane %v2911_v62, 5 }
 0x111   : > { %865 = vrot.lane.b32.xlu0 %v830_v8, %s2135_s16  ;;  %v1049_v36 = vsel %vm1042_vm9, %v1030_v5, %v2830_v57  ;;  %v923_v8 = vrot.slane %v2889_v54, 6 }
 0x112   : > { %v700_v35 = vpop.permute.xlu1 %699  ;;  %v834_v28 = vsel %vm801_vm4, %v831_v33, %v833_v46 }
 0x113   : > { %v2874_v34 = vpop.permute.xlu0 %609 }
 0x114   : > { %625 = vrot.lane.b32.xlu1 %v590_v1, %s2132_s9 }
 0x115   : > { %383 = vrot.lane.b32.xlu0 %v348_v60, %s2129_s26 }
 0x116   : > { %v2885_v49 = vpop.permute.xlu1 %459 }
 0x117   : > { %v942_v61 = vpop.permute.xlu0 %941 }
 0x118   : > { %v1124_v3 = vsel %vm1118_vm13, %v1105_v51, %v942_v61  ;;  %957 = vrot.lane.b32.xlu1 %v922_v58, %s2136_s14  ;;  %v293_v51 = vld [vmem:[%s2254_s30 + $0xb0] sm:$0xff] }
 0x119   : > { %715 = vrot.lane.b32.xlu0 %v2781_v32, %s2133_s10  ;;  %1833 = vmatmul.mubr.msk.f32.gmra.mrb[4].mxu0 %vm1142_vm14, %v1124_v3 }
 0x11a   : > { %v760_v25 = vpop.permute.xlu1 %759 }
 0x11b   : > { %v702_v0 = vpop.permute.xlu0 %701 }
 0x11c   : > { %475 = vrot.lane.b32.xlu1 %v2794_v21, %s2130_s27  ;;  %v500_v21 = vsel %vm405_vm1, %v441_v14, %v499_v26  ;;  %v591_v14 = vrot.slane %v2889_v54, 3  ;;  %v925_v54 = vrot.slane %v2911_v62, 6 }
 0x11d   : > { %385 = vrot.lane.b32.xlu0 %v350_v2, %s2129_s26 }
 0x11e   : > { %v2906_v32 = vpop.permute.xlu1 %519  ;;  %v592_v15 = vsel %vm557_vm2, %v589_v18, %v591_v14  ;;  %v993_v18 = vsel %vm985_vm6, %v1965_v39, %v2511_v41  ;;  %v594_v17 = vsel %vm557_vm2, %v591_v14, %v593_v48  ;;  %v929_v14 = vrot.slane %v293_v51, 6  ;;  %v1967_v39 = vld [vmem:[%s2254_s30 + $0x48] sm:$0xff] }
 0x11f   : > { %v2908_v30 = vpop.permute.xlu0 %461  ;;  %v1012_v60 = vsel %vm1004_vm7, %v993_v18, %v2800_v31  ;;  %v995_v18 = vsel %vm985_vm6, %v1967_v39, %v2519_v45 }
 0x120   : > { %775 = vrot.lane.b32.xlu1 %v684_v19, %s2134_s12  ;;  %v1031_v58 = vsel %vm1023_vm8, %v1012_v60, %v2840_v20  ;;  %v292_v20 = vld [vmem:[%s2254_s30 + $0xa8] sm:$0xff]  ;;  %v1014_v60 = vsel %vm1004_vm7, %v995_v18, %v2908_v30  ;;  %v1377_v30 = vld [vmem:[%s3360_s2 + $0x20] sm:$0xff] }
 0x121   : > { %717 = vrot.lane.b32.xlu0 %v2813_v22, %s2133_s10  ;;  %v832_v22 = vsel %vm801_vm4, %v829_v38, %v831_v33  ;;  %v1068_v38 = vsel %vm1061_vm10, %v1049_v36, %v700_v35  ;;  %v924_v35 = vsel %vm893_vm5, %v921_v24, %v923_v8  ;;  %v1050_v4 = vsel %vm1042_vm9, %v1031_v58, %v2874_v34  ;;  %v1966_v36 = vld [vmem:[%s2254_s30 + $0x40] sm:$0xff] }
 0x122   : > { %v852_v9 = vpop.permute.xlu1 %851  ;;  %v1087_v27 = vsel %vm1080_vm11, %v1068_v38, %v760_v25  ;;  %v1069_v24 = vsel %vm1061_vm10, %v1050_v4, %v702_v0  ;;  %v743_v52 = vrot.slane %v292_v20, 4  ;;  %v745_v25 = vrot.slane %v293_v51, 4  ;;  %v1389_v18 = vld [vmem:[%s3360_s2 + $0x80] sm:$0xff] }
 0x123   : > { %v762_v43 = vpop.permute.xlu0 %761  ;;  %v1106_v37 = vsel %vm1099_vm12, %v1087_v27, %v852_v9  ;;  %v926_v0 = vsel %vm893_vm5, %v923_v8, %v925_v54  ;;  %v835_v33 = vrot.slane %v292_v20, 5  ;;  %v837_v9 = vrot.slane %v293_v51, 5 }
 0x124   : > { %535 = vrot.lane.b32.xlu1 %v500_v21, %s2131_s8  ;;  %v1088_v31 = vsel %vm1080_vm11, %v1069_v24, %v762_v43  ;;  %v746_v21 = vsel %vm649_vm3, %v743_v52, %v745_v25  ;;  %v744_v43 = vsel %vm649_vm3, %v685_v29, %v743_v52  ;;  %v994_v62 = vsel %vm985_vm6, %v1966_v36, %v2522_v47  ;;  %v1382_v25 = vld [vmem:[%s3360_s2 + $0x48] sm:$0xff] }
 0x125   : > { %477 = vrot.lane.b32.xlu0 %v2835_v7, %s2130_s27  ;;  %v838_v55 = vsel %vm801_vm4, %v835_v33, %v837_v9  ;;  %v1013_v29 = vsel %vm1004_vm7, %v994_v62, %v2885_v49  ;;  %v1968_v9 = vld [vmem:[%s2254_s30 + $0x50] sm:$0xff] }
 0x126   : > { %v2935_v63 = vpop.permute.xlu1 %611  ;;  %v1032_v27 = vsel %vm1023_vm8, %v1013_v29, %v2906_v32  ;;  %v1374_v32 = vld [vmem:[%s3360_s2 + $0x8] sm:$0xff]  ;;  %v1387_v62 = vld [vmem:[%s3360_s2 + $0x70] sm:$0xff] }
 0x127   : > { %v2943_v7 = vpop.permute.xlu0 %521  ;;  %v1051_v47 = vsel %vm1042_vm9, %v1032_v27, %v2935_v63  ;;  %v1373_v63 = vld [vmem:[%s3360_s2] sm:$0xff] }
 0x128   : > { %867 = vrot.lane.b32.xlu1 %v832_v22, %s2135_s16  ;;  %v927_v22 = vrot.slane %v292_v20, 6  ;;  %v1033_v48 = vsel %vm1023_vm8, %v1014_v60, %v2943_v7  ;;  %v1378_v7 = vld [vmem:[%s3360_s2 + $0x28] sm:$0xff]  ;;  %v1379_v20 = vld [vmem:[%s3360_s2 + $0x30] sm:$0xff] }
 0x129   : > { %777 = vrot.lane.b32.xlu0 %v686_v11, %s2134_s12  ;;  %v1390_v60 = vld [vmem:[%s3360_s2 + $0x88] sm:$0xff] }
 0x12a   : > { %v944_v57 = vpop.permute.xlu1 %943  ;;  %v930_v38 = vsel %vm893_vm5, %v927_v22, %v929_v14  ;;  %v928_v8 = vsel %vm893_vm5, %v925_v54, %v927_v22  ;;  %v1385_v22 = vld [vmem:[%s3360_s2 + $0x60] sm:$0xff] }
 0x12b   : > { %v1125_v13 = vsel %vm1118_vm13, %v1106_v37, %v944_v57  ;;  %v854_v1 = vpop.permute.xlu0 %853 }
 0x12c   : > { %627 = vrot.lane.b32.xlu1 %v592_v15, %s2132_s9  ;;  %1835 = vmatprep.mubr.msk.f32.mxu0 %vm1142_vm14, %v1125_v13  ;;  %v1107_v61 = vsel %vm1099_vm12, %v1088_v31, %v854_v1 }
 0x12d   : > { %537 = vrot.lane.b32.xlu0 %v502_v40, %s2131_s8 }
 0x12e   : > { %v704_v10 = vpop.permute.xlu1 %703 }
 0x12f   : > { %v2972_v41 = vpop.permute.xlu0 %613  ;;  %v1070_v57 = vsel %vm1061_vm10, %v1051_v47, %v704_v10 }
 0x130   : > { %959 = vrot.lane.b32.xlu1 %v924_v35, %s2136_s14  ;;  %v1375_v35 = vld [vmem:[%s3360_s2 + $0x10] sm:$0xff]  ;;  %v1052_v45 = vsel %vm1042_vm9, %v1033_v48, %v2972_v41 }
 0x131   : > { %869 = vrot.lane.b32.xlu0 %v834_v28, %s2135_s16  ;;  %v1376_v28 = vld [vmem:[%s3360_s2 + $0x18] sm:$0xff] }
 0x132   : > { %v2980_v44 = vpop.permute.xlu1 %463 }
 0x133   : > { %v946_v3 = vpop.permute.xlu0 %945 }
 0x134   : > { %v1126_v34 = vsel %vm1118_vm13, %v1107_v61, %v946_v3  ;;  %719 = vrot.lane.b32.xlu1 %v684_v19, %s2133_s10  ;;  %v1380_v61 = vld [vmem:[%s3360_s2 + $0x38] sm:$0xff] }
 0x135   : > { %629 = vrot.lane.b32.xlu0 %v594_v17, %s2132_s9  ;;  %1836 = vmatmul.mubr.msk.f32.gmra.mrb[6].mxu0 %vm1142_vm14, %v1126_v34  ;;  %v1381_v34 = vld [vmem:[%s3360_s2 + $0x40] sm:$0xff] }
 0x136   : > { %v764_v2 = vpop.permute.xlu1 %763 }
 0x137   : > { %v706_v26 = vpop.permute.xlu0 %705  ;;  %v1089_v49 = vsel %vm1080_vm11, %v1070_v57, %v764_v2 }
 0x138   : > { %721 = vrot.lane.b32.xlu1 %v686_v11, %s2133_s10  ;;  %v836_v11 = vsel %vm801_vm4, %v833_v46, %v835_v33  ;;  %v1071_v4 = vsel %vm1061_vm10, %v1052_v45, %v706_v26 }
 0x139   : > { %961 = vrot.lane.b32.xlu0 %v926_v0, %s2136_s14  ;;  %v1383_v0 = vld [vmem:[%s3360_s2 + $0x50] sm:$0xff] }
 0x13a   : > { %v2995_v19 = vpop.permute.xlu1 %523 }
 0x13b   : > { %v3000_v12 = vpop.permute.xlu0 %465 }
 0x13c   : > { %781 = vrot.lane.b32.xlu1 %v746_v21, %s2134_s12  ;;  %v1384_v21 = vld [vmem:[%s3360_s2 + $0x58] sm:$0xff] }
 0x13d   : > { %779 = vrot.lane.b32.xlu0 %v744_v43, %s2134_s12  ;;  %v996_v43 = vsel %vm985_vm6, %v1968_v9, %v2532_v53 }
 0x13e   : > { %v856_v5 = vpop.permute.xlu1 %855 }
 0x13f   : > { %v766_v42 = vpop.permute.xlu0 %765  ;;  %v1108_v40 = vsel %vm1099_vm12, %v1089_v49, %v856_v5 }
 0x140   : > { %873 = vrot.lane.b32.xlu1 %v838_v55, %s2135_s16  ;;  %v1090_v24 = vsel %vm1080_vm11, %v1071_v4, %v766_v42  ;;  %v1015_v55 = vsel %vm1004_vm7, %v996_v43, %v2980_v44 }
 0x141   : > { %871 = vrot.lane.b32.xlu0 %v836_v11, %s2135_s16  ;;  %v1034_v14 = vsel %vm1023_vm8, %v1015_v55, %v2995_v19  ;;  %v1386_v11 = vld [vmem:[%s3360_s2 + $0x68] sm:$0xff] }
 0x142   : > { %v3016_v15 = vpop.permute.xlu1 %615 }
 0x143   : > { %v3021_v37 = vpop.permute.xlu0 %525  ;;  %v1053_v53 = vsel %vm1042_vm9, %v1034_v14, %v3016_v15 }
 0x144   : > { %965 = vrot.lane.b32.xlu1 %v930_v38, %s2136_s14 }
 0x145   : > { %963 = vrot.lane.b32.xlu0 %v928_v8, %s2136_s14  ;;  %v1969_v8 = vld [vmem:[%s2254_s30 + $0x58] sm:$0xff]  ;;  %s1871_s14 = smul.u32 36, %s2115_s22 }
 0x146   : > { %v948_v46 = vpop.permute.xlu1 %947  ;;  %v997_v15 = vsel %vm985_vm6, %v1969_v8, %v2528_v50 }
 0x147   : > { %v1127_v13 = vsel %vm1118_vm13, %v1108_v40, %v948_v46  ;;  %v858_v1 = vpop.permute.xlu0 %857  ;;  %v1016_v47 = vsel %vm1004_vm7, %v997_v15, %v3000_v12  ;;  %v1388_v12 = vld [vmem:[%s3360_s2 + $0x78] sm:$0xff]  ;;  %s1586_s26 = sadd.s32 %s1871_s14, %s1870_s13  ;;  %s2138_s14 = smov [#allocation2]  }
 0x148   : > { %1398 = vperm.xlu1 %1964, %v1374_v32   ;;  %1838 = vmatprep.mubr.msk.f32.mxu0 %vm1142_vm14, %v1127_v13  ;;  %v1109_v17 = vsel %vm1099_vm12, %v1090_v24, %v858_v1  ;;  %v1035_v57 = vsel %vm1023_vm8, %v1016_v47, %v3021_v37  ;;  %s1786_s8 = sshll.u32 %s1586_s26, 7  ;;  %s1977_s26 = sshll.u32 %s2138_s14, 4  ;;  %s1978_s26 = int_to_ptr.vmem [resolvable:$false] %s1977_s26 }
 0x149   : > { %1393 = vperm.xlu0 %1963, %v1373_v63   ;;  %s3224_s15 = scalar_lea.hbm %s3361_s3, %s1786_s8  ;;  %s1979_s8 = scalar_lea.vmem %s1978_s26, 4608 }
 0x14a   : > { %v708_v10 = vpop.permute.xlu1 %707 }
 0x14b   : > { %v618_v58 = vpop.permute.xlu0 %617  ;;  %v1072_v44 = vsel %vm1061_vm10, %v1053_v53, %v708_v10 }
 0x14c   : > { %1403 = vperm.xlu1 %1964, %v1375_v35   ;;  %v1054_v32 = vsel %vm1042_vm9, %v1035_v57, %v618_v58 }
 0x14d   : > { %1408 = vperm.xlu0 %1963, %v1376_v28  }
 0x14e   : > { %v3056_v31 = vpop.permute.xlu1 %467 }
 0x14f   : > { %v950_v54 = vpop.permute.xlu0 %949 }
 0x150   : > { %v1128_v41 = vsel %vm1118_vm13, %v1109_v17, %v950_v54  ;;  %1413 = vperm.xlu1 %1964, %v1377_v30   ;;  %v1970_v30 = vld [vmem:[%s2254_s30 + $0x60] sm:$0xff] }
 0x151   : > { %1839 = vmatmul.mubr.msk.f32.gmra.mrb[8].mxu0 %vm1142_vm14, %v1128_v41  ;;  %1418 = vperm.xlu0 %1963, %v1378_v7   ;;  %v998_v24 = vsel %vm985_vm6, %v1970_v30, %v2542_v59 }
 0x152   : > { %v768_v51 = vpop.permute.xlu1 %767  ;;  %v1017_v7 = vsel %vm1004_vm7, %v998_v24, %v3056_v31 }
 0x153   : > { %v710_v3 = vpop.permute.xlu0 %709  ;;  %v1091_v36 = vsel %vm1080_vm11, %v1072_v44, %v768_v51 }
 0x154   : > { %1423 = vperm.xlu1 %1964, %v1379_v20   ;;  %v1073_v46 = vsel %vm1061_vm10, %v1054_v32, %v710_v3 }
 0x155   : > { %1428 = vperm.xlu0 %1963, %v1380_v61  }
 0x156   : > { %v3073_v52 = vpop.permute.xlu1 %527 }
 0x157   : > { %v3078_v2 = vpop.permute.xlu0 %469  ;;  %v1036_v17 = vsel %vm1023_vm8, %v1017_v7, %v3073_v52 }
 0x158   : > { %1433 = vperm.xlu1 %1964, %v1381_v34  }
 0x159   : > { %1438 = vperm.xlu0 %1963, %v1382_v25  }
 0x15a   : > { %v860_v26 = vpop.permute.xlu1 %859 }
 0x15b   : > { %v770_v33 = vpop.permute.xlu0 %769  ;;  %v1110_v19 = vsel %vm1099_vm12, %v1091_v36, %v860_v26 }
 0x15c   : > { %1443 = vperm.xlu1 %1964, %v1383_v0   ;;  %v1092_v63 = vsel %vm1080_vm11, %v1073_v46, %v770_v33  ;;  %v1971_v0 = vld [vmem:[%s2254_s30 + $0x68] sm:$0xff] }
 0x15d   : > { %1448 = vperm.xlu0 %1963, %v1384_v21   ;;  %v999_v31 = vsel %vm985_vm6, %v1971_v0, %v2538_v56 }
 0x15e   : > { %v620_v5 = vpop.permute.xlu1 %619  ;;  %v1018_v52 = vsel %vm1004_vm7, %v999_v31, %v3078_v2 }
 0x15f   : > { %v530_v42 = vpop.permute.xlu0 %529  ;;  %v1055_v41 = vsel %vm1042_vm9, %v1036_v17, %v620_v5 }
 0x160   : > { %1453 = vperm.xlu1 %1964, %v1385_v22   ;;  %v1037_v26 = vsel %vm1023_vm8, %v1018_v52, %v530_v42 }
 0x161   : > { %1458 = vperm.xlu0 %1963, %v1386_v11  }
 0x162   : > { %v952_v29 = vpop.permute.xlu1 %951 }
 0x163   : > { %v862_v38 = vpop.permute.xlu0 %861  ;;  %v1129_v27 = vsel %vm1118_vm13, %v1110_v19, %v952_v29  ;;  %v1972_v29 = vld [vmem:[%s2254_s30 + $0x70] sm:$0xff]  ;;  %s3175_s30 = sand.u32 1, %s2103_s19  }
 0x164   : > { %1841 = vmatprep.mubr.msk.f32.mxu1 %vm1142_vm14, %v1129_v27  ;;  %1463 = vperm.xlu1 %1964, %v1387_v62   ;;  %v1111_v13 = vsel %vm1099_vm12, %v1092_v63, %v862_v38  ;;  %s1867_s16 = smul.u32 144, %s3175_s30 }
 0x165   : > { %1468 = vperm.xlu0 %1963, %v1388_v12  }
 0x166   : > { %v622_v49 = vpop.permute.xlu1 %621  ;;  %s3193_s17 = scalar_lea.vmem [#allocation2], %s1867_s16 }
 0x167   : > { %v380_v40 = vpop.permute.xlu0 %379  ;;  %v1056_v33 = vsel %vm1042_vm9, %v1037_v26, %v622_v49  ;;  %s1589_s9 = sshll.u32 %s3193_s17, 4  ;;  %s3226_s9 = int_to_ptr.vmem [resolvable:$true] %s1589_s9 }
 0x168   : > { %1473 = vperm.xlu1 %1964, %v1389_v18   ;;  %v1000_v38 = vsel %vm985_vm6, %v1972_v29, %v380_v40  ;;  %s1973_s13 = scalar_lea.vmem %s3226_s9, 2304  ;;  %p1980_p4 = scmp.lt.s32.totalorder %s3226_s9, %s1978_s26 }
 0x169   : > { %1478 = vperm.xlu0 %1963, %v1390_v60   ;;  %p1974_p0 = scmp.ne.s32.totalorder %s3226_s9, %s1973_s13  ;;  %p1981_p5 = scmp.lt.s32.totalorder %s1979_s8, %s1973_s13 }
 0x16a   : > { %v954_v50 = vpop.permute.xlu1 %953 }
 0x16b   : > { %v1130_v1 = vsel %vm1118_vm13, %v1111_v13, %v954_v50  ;;  %v712_v39 = vpop.permute.xlu0 %711  ;;  %p1975_p1 = pnand %p1974_p0, %p2225_p3  ;;  %p1982_p6 = por %p1981_p5, %p1980_p4 }
 0x16c   : > { %1842 = vmatmul.mubr.msk.f32.vlgmr.msra.gmra.mrb[0].mxu1 %vm1142_vm14, %v1130_v1  ;;  %v1074_v51 = vsel %vm1061_vm10, %v1055_v41, %v712_v39 }
 0x16d   : > { %p1976_p2 = pneg %p1975_p1 }
 0x16e   : > { %v472_v37 = vpop.permute.xlu1 %471 }
 0x16f   : > { %v382_v35 = vpop.permute.xlu0 %381  ;;  %v1019_v27 = vsel %vm1004_vm7, %v1000_v38, %v472_v37  ;;  %p1983_p7 = pnand %p1982_p6, %p1976_p2 }
 0x170   : > { %v1001_v40 = vsel %vm985_vm6, %v2627_v6, %v382_v35 }
 0x172   : > { %v772_v10 = vpop.permute.xlu1 %771 }
 0x173   : > { %v714_v28 = vpop.permute.xlu0 %713  ;;  %v1093_v61 = vsel %vm1080_vm11, %v1074_v51, %v772_v10 }
 0x174   : > { %v1075_v43 = vsel %vm1061_vm10, %v1056_v33, %v714_v28 }
 0x176   : > { %v532_v48 = vpop.permute.xlu1 %531 }
 0x177   : > { %v474_v58 = vpop.permute.xlu0 %473  ;;  %v1038_v8 = vsel %vm1023_vm8, %v1019_v27, %v532_v48 }
 0x178   : > { %v1020_v1 = vsel %vm1004_vm7, %v1001_v40, %v474_v58 }
 0x17a   : > { %v864_v45 = vpop.permute.xlu1 %863 }
 0x17b   : > { %v774_v4 = vpop.permute.xlu0 %773  ;;  %v1112_v3 = vsel %vm1099_vm12, %v1093_v61, %v864_v45 }
 0x17c   : > { %v1094_v55 = vsel %vm1080_vm11, %v1075_v43, %v774_v4 }
 0x17e   : > { %v624_v54 = vpop.permute.xlu1 %623 }
 0x17f   : > { %v534_v20 = vpop.permute.xlu0 %533  ;;  %v1057_v47 = vsel %vm1042_vm9, %v1038_v8, %v624_v54 }
 0x180   : > { %v1039_v12 = vsel %vm1023_vm8, %v1020_v1, %v534_v20 }
 0x182   : > { %v956_v34 = vpop.permute.xlu1 %955 }
 0x183   : > { %v1131_v25 = vsel %vm1118_vm13, %v1112_v3, %v956_v34  ;;  %v866_v59 = vpop.permute.xlu0 %865 }
 0x184   : > { %1844 = vmatprep.mubr.msk.f32.mxu1 %vm1142_vm14, %v1131_v25  ;;  %v1113_v22 = vsel %vm1099_vm12, %v1094_v55, %v866_v59 }
 0x186   : > { %v626_v21 = vpop.permute.xlu1 %625 }
 0x187   : > { %v384_v9 = vpop.permute.xlu0 %383  ;;  %v1058_v18 = vsel %vm1042_vm9, %v1039_v12, %v626_v21 }
 0x188   : > { %v1002_v30 = vsel %vm985_vm6, %v2662_v16, %v384_v9 }
 0x18a   : > { %v958_v14 = vpop.permute.xlu1 %957 }
 0x18b   : > { %v1132_v56 = vsel %vm1118_vm13, %v1113_v22, %v958_v14  ;;  %v716_v5 = vpop.permute.xlu0 %715 }
 0x18c   : > { %1845 = vmatmul.mubr.msk.f32.gmra.mrb[2].mxu1 %vm1142_vm14, %v1132_v56  ;;  %v1076_v49 = vsel %vm1061_vm10, %v1057_v47, %v716_v5 }
 0x18e   : > { %v476_v2 = vpop.permute.xlu1 %475 }
 0x18f   : > { %v386_v11 = vpop.permute.xlu0 %385  ;;  %v1021_v7 = vsel %vm1004_vm7, %v1002_v30, %v476_v2 }
 0x190   : > { %v1003_v4 = vsel %vm985_vm6, %v2753_v23, %v386_v11 }
 0x192   : > { %v776_v53 = vpop.permute.xlu1 %775 }
 0x193   : > { %v718_v42 = vpop.permute.xlu0 %717  ;;  %v1095_v32 = vsel %vm1080_vm11, %v1076_v49, %v776_v53 }
 0x194   : > { %v1077_v60 = vsel %vm1061_vm10, %v1058_v18, %v718_v42 }
 0x196   : > { %v536_v44 = vpop.permute.xlu1 %535 }
 0x197   : > { %v478_v36 = vpop.permute.xlu0 %477  ;;  %v1040_v41 = vsel %vm1023_vm8, %v1021_v7, %v536_v44 }
 0x198   : > { %v1022_v24 = vsel %vm1004_vm7, %v1003_v4, %v478_v36 }
 0x19a   : > { %v868_v62 = vpop.permute.xlu1 %867 }
 0x19b   : > { %v778_v19 = vpop.permute.xlu0 %777  ;;  %v1114_v46 = vsel %vm1099_vm12, %v1095_v32, %v868_v62 }
 0x19c   : > { %v1096_v10 = vsel %vm1080_vm11, %v1077_v60, %v778_v19 }
 0x19e   : > { %v628_v15 = vpop.permute.xlu1 %627 }
 0x19f   : > { %v538_v57 = vpop.permute.xlu0 %537  ;;  %v1059_v61 = vsel %vm1042_vm9, %v1040_v41, %v628_v15 }
 0x1a0   : > { %v1041_v17 = vsel %vm1023_vm8, %v1022_v24, %v538_v57 }
 0x1a2   : > { %v960_v63 = vpop.permute.xlu1 %959 }
 0x1a3   : > { %v1133_v13 = vsel %vm1118_vm13, %v1114_v46, %v960_v63  ;;  %v870_v50 = vpop.permute.xlu0 %869 }
 0x1a4   : > { %1847 = vmatprep.mubr.msk.f32.mxu1 %vm1142_vm14, %v1133_v13  ;;  %v1115_v48 = vsel %vm1099_vm12, %v1096_v10, %v870_v50 }
 0x1a6   : > { %v720_v39 = vpop.permute.xlu1 %719 }
 0x1a7   : > { %v630_v37 = vpop.permute.xlu0 %629  ;;  %v1078_v34 = vsel %vm1061_vm10, %v1059_v61, %v720_v39 }
 0x1a8   : > { %v1060_v20 = vsel %vm1042_vm9, %v1041_v17, %v630_v37 }
 0x1aa   : > { %v722_v28 = vpop.permute.xlu1 %721 }
 0x1ab   : > { %v962_v45 = vpop.permute.xlu0 %961  ;;  %v1079_v3 = vsel %vm1061_vm10, %v1060_v20, %v722_v28 }
 0x1ac   : > { %v1134_v6 = vsel %vm1118_vm13, %v1115_v48, %v962_v45 }
 0x1ad   : > { %1848 = vmatmul.mubr.msk.f32.gmra.mrb[4].mxu1 %vm1142_vm14, %v1134_v6 }
 0x1ae   : > { %v782_v35 = vpop.permute.xlu1 %781 }
 0x1af   : > { %v780_v58 = vpop.permute.xlu0 %779  ;;  %v1098_v16 = vsel %vm1080_vm11, %v1079_v3, %v782_v35 }
 0x1b0   : > { %v1097_v59 = vsel %vm1080_vm11, %v1078_v34, %v780_v58 }
 0x1b2   : > { %v874_v54 = vpop.permute.xlu1 %873 }
 0x1b3   : > { %v872_v51 = vpop.permute.xlu0 %871  ;;  %v1117_v0 = vsel %vm1099_vm12, %v1098_v16, %v874_v54 }
 0x1b4   : > { %v1828_v23 = vpop.f32.mrb[0].mxu0  ;;  %v1116_v52 = vsel %vm1099_vm12, %v1097_v59, %v872_v51 }
 0x1b5   : > { %1356 = vst [vmem:[%s3193_s17 + $0x8] sm:$0xff] %v1828_v23  ;;  %v1266_v25 = vpop.f32.mrb[1].mxu0 }
 0x1b6   : > { %1355 = vst [vmem:[%s3193_s17] sm:$0xff] %v1266_v25  ;;  %v966_v31 = vpop.permute.xlu1 %965 }
 0x1b7   : > { %v1136_v26 = vsel %vm1118_vm13, %v1117_v0, %v966_v31  ;;  %v964_v21 = vpop.permute.xlu0 %963 }
 0x1b8   : > { %v1135_v33 = vsel %vm1118_vm13, %v1116_v52, %v964_v21 }
 0x1b9   : > { %1850 = vmatprep.mubr.msk.f32.mxu1 %vm1142_vm14, %v1135_v33 }
 0x1ba   : > { %1851 = vmatmul.mubr.msk.f32.gmra.mrb[6].mxu1 %vm1142_vm14, %v1136_v26 }
 0x1c7   : > { %v1399_v9 = vpop.permute.xlu1 %1398 }
 0x1c8   : > { %v1482_v43 = vmul.f32 %v1828_v23, %v1399_v9  ;;  %v1394_v55 = vpop.permute.xlu0 %1393 }
 0x1c9   : > { %v1481_v22 = vmul.f32 %v1394_v55, %v1266_v25 }
 0x1ca   : > { %v1524_v14 = vmul.f32 %v1828_v23, %v1482_v43 }
 0x1cb   : > { %v1499_v56 = vadd.f32 %v1482_v43, %v1481_v22  ;;  %v1523_v5 = vmul.f32 %v1481_v22, %v1266_v25  ;;  %v1404_v53 = vpop.permute.xlu1 %1403 }
 0x1cc   : > { %v1409_v11 = vpop.permute.xlu0 %1408 }
 0x1cd   : > { %v1541_v2 = vadd.f32 %v1524_v14, %v1523_v5 }
 0x1cf   : > { %v1414_v57 = vpop.permute.xlu1 %1413 }
 0x1d0   : > { %v1831_v42 = vpop.f32.mrb[2].mxu0  ;;  %v1419_v47 = vpop.permute.xlu0 %1418 }
 0x1d1   : > { %1358 = vst [vmem:[%s3193_s17 + $0x18] sm:$0xff] %v1831_v42  ;;  %v1276_v44 = vpop.f32.mrb[3].mxu0  ;;  %v1484_v36 = vmul.f32 %v1831_v42, %v1409_v11 }
 0x1d2   : > { %1357 = vst [vmem:[%s3193_s17 + $0x10] sm:$0xff] %v1276_v44  ;;  %v1483_v62 = vmul.f32 %v1404_v53, %v1276_v44 }
 0x1d3   : > { %v1526_v38 = vmul.f32 %v1831_v42, %v1484_v36  ;;  %v1424_v18 = vpop.permute.xlu1 %1423 }
 0x1d4   : > { %v1500_v19 = vadd.f32 %v1499_v56, %v1483_v62  ;;  %v1525_v29 = vmul.f32 %v1483_v62, %v1276_v44  ;;  %v1429_v37 = vpop.permute.xlu0 %1428 }
 0x1d6   : > { %v1542_v27 = vadd.f32 %v1541_v2, %v1525_v29  ;;  %v1501_v8 = vadd.f32 %v1500_v19, %v1484_v36 }
 0x1d7   : > { %v1434_v7 = vpop.permute.xlu1 %1433 }
 0x1d8   : > { %v1543_v15 = vadd.f32 %v1542_v27, %v1526_v38  ;;  %v1439_v24 = vpop.permute.xlu0 %1438 }
 0x1db   : > { %v1444_v59 = vpop.permute.xlu1 %1443 }
 0x1dc   : > { %v1449_v25 = vpop.permute.xlu0 %1448 }
 0x1df   : > { %v1454_v56 = vpop.permute.xlu1 %1453 }
 0x1e0   : > { %v1459_v14 = vpop.permute.xlu0 %1458 }
 0x1e3   : > { %v1464_v38 = vpop.permute.xlu1 %1463 }
 0x1ec   : > { %v1834_v49 = vpop.f32.mrb[4].mxu0 }
 0x1ed   : > { %1360 = vst [vmem:[%s3193_s17 + $0x28] sm:$0xff] %v1834_v49  ;;  %v1286_v32 = vpop.f32.mrb[5].mxu0  ;;  %v1486_v46 = vmul.f32 %v1834_v49, %v1419_v47 }
 0x1ee   : > { %1359 = vst [vmem:[%s3193_s17 + $0x20] sm:$0xff] %v1286_v32  ;;  %v1485_v63 = vmul.f32 %v1414_v57, %v1286_v32 }
 0x1ef   : > { %v1528_v40 = vmul.f32 %v1834_v49, %v1486_v46 }
 0x1f0   : > { %v1502_v13 = vadd.f32 %v1501_v8, %v1485_v63  ;;  %v1527_v50 = vmul.f32 %v1485_v63, %v1286_v32  ;;  %v1469_v8 = vpop.permute.xlu0 %1468 }
 0x1f2   : > { %v1544_v1 = vadd.f32 %v1543_v15, %v1527_v50  ;;  %v1503_v39 = vadd.f32 %v1502_v13, %v1486_v46 }
 0x1f4   : > { %v1545_v12 = vadd.f32 %v1544_v1, %v1528_v40  ;;  %v1474_v40 = vpop.permute.xlu1 %1473 }
 0x208   : > { %v1837_v60 = vpop.f32.mrb[6].mxu0 }
 0x209   : > { %1362 = vst [vmem:[%s3193_s17 + $0x38] sm:$0xff] %v1837_v60  ;;  %v1296_v10 = vpop.f32.mrb[7].mxu0  ;;  %v1488_v28 = vmul.f32 %v1837_v60, %v1429_v37 }
 0x20a   : > { %1361 = vst [vmem:[%s3193_s17 + $0x30] sm:$0xff] %v1296_v10  ;;  %v1487_v48 = vmul.f32 %v1424_v18, %v1296_v10 }
 0x20b   : > { %v1530_v35 = vmul.f32 %v1837_v60, %v1488_v28 }
 0x20c   : > { %v1504_v45 = vadd.f32 %v1503_v39, %v1487_v48  ;;  %v1529_v6 = vmul.f32 %v1487_v48, %v1296_v10  ;;  %v1479_v39 = vpop.permute.xlu0 %1478 }
 0x20e   : > { %v1546_v58 = vadd.f32 %v1545_v12, %v1529_v6  ;;  %v1505_v4 = vadd.f32 %v1504_v45, %v1488_v28 }
 0x210   : > { %v1547_v30 = vadd.f32 %v1546_v58, %v1530_v35 }
 0x224   : > { %v1840_v17 = vpop.f32.mrb[8].mxu0 }
 0x225   : > { %1364 = vst [vmem:[%s3193_s17 + $0x48] sm:$0xff] %v1840_v17  ;;  %v1306_v54 = vpop.f32.mrb[9].mxu0  ;;  %v1490_v41 = vmul.f32 %v1840_v17, %v1439_v24 }
 0x226   : > { %1363 = vst [vmem:[%s3193_s17 + $0x40] sm:$0xff] %v1306_v54  ;;  %v1489_v20 = vmul.f32 %v1434_v7, %v1306_v54 }
 0x227   : > { %v1532_v3 = vmul.f32 %v1840_v17, %v1490_v41 }
 0x228   : > { %v1506_v51 = vadd.f32 %v1505_v4, %v1489_v20  ;;  %v1531_v61 = vmul.f32 %v1489_v20, %v1306_v54 }
 0x22a   : > { %v1507_v23 = vadd.f32 %v1506_v51, %v1490_v41  ;;  %v1548_v34 = vadd.f32 %v1547_v30, %v1531_v61 }
 0x22c   : > { %v1549_v16 = vadd.f32 %v1548_v34, %v1532_v3 }
 0x23f   : > { %v1843_v0 = vpop.f32.mrb[0].mxu1 }
 0x240   : > { %1366 = vst [vmem:[%s3193_s17 + $0x58] sm:$0xff] %v1843_v0  ;;  %v1316_v31 = vpop.f32.mrb[1].mxu1  ;;  %v1492_v52 = vmul.f32 %v1843_v0, %v1449_v25 }
 0x241   : > { %1365 = vst [vmem:[%s3193_s17 + $0x50] sm:$0xff] %v1316_v31  ;;  %v1491_v26 = vmul.f32 %v1444_v59, %v1316_v31 }
 0x242   : > { %v1534_v9 = vmul.f32 %v1843_v0, %v1492_v52 }
 0x243   : > { %v1508_v21 = vadd.f32 %v1507_v23, %v1491_v26  ;;  %v1533_v33 = vmul.f32 %v1491_v26, %v1316_v31 }
 0x245   : > { %v1550_v43 = vadd.f32 %v1549_v16, %v1533_v33  ;;  %v1509_v55 = vadd.f32 %v1508_v21, %v1492_v52 }
 0x247   : > { %v1551_v22 = vadd.f32 %v1550_v43, %v1534_v9 }
 0x25f   : > { %v1846_v5 = vpop.f32.mrb[2].mxu1 }
 0x260   : > { %1368 = vst [vmem:[%s3193_s17 + $0x68] sm:$0xff] %v1846_v5  ;;  %v1326_v2 = vpop.f32.mrb[3].mxu1  ;;  %v1494_v11 = vmul.f32 %v1846_v5, %v1459_v14 }
 0x261   : > { %1367 = vst [vmem:[%s3193_s17 + $0x60] sm:$0xff] %v1326_v2  ;;  %v1493_v53 = vmul.f32 %v1454_v56, %v1326_v2 }
 0x262   : > { %v1536_v36 = vmul.f32 %v1846_v5, %v1494_v11 }
 0x263   : > { %v1510_v42 = vadd.f32 %v1509_v55, %v1493_v53  ;;  %v1535_v44 = vmul.f32 %v1493_v53, %v1326_v2 }
 0x265   : > { %v1552_v62 = vadd.f32 %v1551_v22, %v1535_v44  ;;  %v1511_v19 = vadd.f32 %v1510_v42, %v1494_v11 }
 0x267   : > { %v1553_v29 = vadd.f32 %v1552_v62, %v1536_v36 }
 0x280   : > { %v1849_v27 = vpop.f32.mrb[4].mxu1 }
 0x281   : > { %1370 = vst [vmem:[%s3193_s17 + $0x78] sm:$0xff] %v1849_v27  ;;  %v1336_v15 = vpop.f32.mrb[5].mxu1  ;;  %v1496_v47 = vmul.f32 %v1849_v27, %v1469_v8 }
 0x282   : > { %1369 = vst [vmem:[%s3193_s17 + $0x70] sm:$0xff] %v1336_v15  ;;  %v1495_v57 = vmul.f32 %v1464_v38, %v1336_v15 }
 0x283   : > { %v1538_v46 = vmul.f32 %v1849_v27, %v1496_v47 }
 0x284   : > { %v1512_v49 = vadd.f32 %v1511_v19, %v1495_v57  ;;  %v1537_v32 = vmul.f32 %v1495_v57, %v1336_v15 }
 0x286   : > { %v1554_v63 = vadd.f32 %v1553_v29, %v1537_v32  ;;  %v1513_v13 = vadd.f32 %v1512_v49, %v1496_v47 }
 0x288   : > { %v1555_v50 = vadd.f32 %v1554_v63, %v1538_v46 }
 0x28d   : > { %v1852_v1 = vpop.f32.mrb[6].mxu1 }
 0x28e   : > { %1372 = vst [vmem:[%s3193_s17 + $0x88] sm:$0xff] %v1852_v1  ;;  %v1346_v12 = vpop.f32.mrb[7].mxu1  ;;  %v1498_v37 = vmul.f32 %v1852_v1, %v1479_v39 }
 0x28f   : > { %1371 = vst [vmem:[%s3193_s17 + $0x80] sm:$0xff] %v1346_v12  ;;  %v1497_v18 = vmul.f32 %v1474_v40, %v1346_v12 }
 0x290   : > { %1986 = shalt.err (!%p1983_p7)
}
 0x291   : > { %s1987_s17 = scalar_lea.hbm %s3224_s15, 2304  ;;  %s1991_s14 = scalar_lea.hbm %s3361_s3, 9216 }
 0x292   : > { %p1988_p9 = scmp.ne.s32.totalorder %s3224_s15, %s1987_s17  ;;  %p1992_p12 = scmp.lt.u32.totalorder %s3224_s15, %s3361_s3 }
 0x293   : > { %p1993_p13 = scmp.lt.u32.totalorder %s1991_s14, %s1987_s17  ;;  %p1995_p1 = scmp.lt.u32.totalorder %s1987_s17, %s3224_s15 }
 0x294   : > { %p1989_p10 = pnand %p1988_p9, %p2225_p3 }
 0x295   : > { %p1994_p0 = por %p1993_p13, %p1992_p12 }
 0x296   : > { %p1990_p11 = pneg %p1989_p10 }
 0x297   : > { %p1996_p2 = por %p1995_p1, %p1994_p0 }
 0x299   : > { %p1997_p4 = pnand %p1996_p2, %p1990_p11 }
 0x29b   : > { %2000 = shalt.err (!%p1997_p4)
}
 0x29c   : > { %s2139_s13 = smov 128   ;;  %s3371_s8 = scalar_lea.sflag [#allocation3], %s3175_s30  ;;  %v1514_v60 = vadd.f32 %v1513_v13, %v1497_v18  ;;  %v1539_v10 = vmul.f32 %v1497_v18, %v1346_v12  ;;  %v1540_v28 = vmul.f32 %v1852_v1, %v1498_v37 }
 0x29d   : > { %1872 = dma.vmem_to_hbm [thread:$0]  (%p2225_p3), %s3226_s9, 2304, %s3224_s15, %s3371_s8, %s2139_s13, %s2139_s13, %s2130_s27  }
 0x29e   : > { %v1515_v48 = vadd.f32 %v1514_v60, %v1498_v37  ;;  %v1556_v45 = vadd.f32 %v1555_v50, %v1539_v10  ;;  %s1787_s16 = sshll.u32 %s2115_s22, 1  ;;  %s3372_s27 = sadd.s32 4294967295, %s2127_s25  }
 0x29f   : > { %s1603_s17 = sadd.s32 %s2111_s21, %s1787_s16  ;;  %s3259_s9 = sand.u32 1, %s3372_s27  }
 0x2a0   : > { %v1516_v6 = vrot.slane %v1515_v48, 4  ;;  %v1557_v35 = vadd.f32 %v1556_v45, %v1540_v28  ;;  %s1788_s15 = sshll.u32 %s1603_s17, 4  ;;  %s255_s10 = scalar_lea.vmem [#allocation4], %s3175_s30 }
 0x2a1   : > { %s1607_s12 = sshll.u32 %s255_s10, 4  ;;  %s3366_s14 = scalar_lea.vmem [#allocation6], %s3175_s30  ;;  %s3270_s12 = int_to_ptr.vmem [resolvable:$true] %s1607_s12 }
 0x2a2   : > { %v1517_v58 = vadd.f32 %v1516_v6, %v1515_v48  ;;  %v1558_v4 = vrot.slane %v1557_v35, 4  ;;  %s1622_s22 = sshll.u32 %s3366_s14, 4  ;;  %s3268_s21 = scalar_lea.hbm %s3362_s4, %s1788_s15  ;;  %s3277_s22 = int_to_ptr.vmem [resolvable:$true] %s1622_s22 }
 0x2a3   : > { %s3275_s17 = scalar_lea.hbm %s3363_s5, %s1788_s15  ;;  %s1571_s27 = scalar_lea.sflag [#allocation5], %s3259_s9 }
 0x2a4   : > { %v1559_v30 = vadd.f32 %v1558_v4, %v1557_v35  ;;  %v1518_v24 = vrot.slane %v1517_v58, 2  ;;  %s2001_s14 = scalar_lea.vmem %s3270_s12, 16  ;;  %s2140_s26 = smov [#allocation4]  }
 0x2a5   : > { %p2002_p5 = scmp.ne.s32.totalorder %s3270_s12, %s2001_s14  ;;  %s2005_s13 = sshll.u32 %s2140_s26, 4  ;;  %s2006_s13 = int_to_ptr.vmem [resolvable:$false] %s2005_s13 }
 0x2a6   : > { %v1560_v7 = vrot.slane %v1559_v30, 2  ;;  %v1519_v17 = vadd.f32 %v1518_v24, %v1517_v58  ;;  %s2007_s0 = scalar_lea.vmem %s2006_s13, 32  ;;  %p2008_p9 = scmp.lt.s32.totalorder %s3270_s12, %s2006_s13 }
 0x2a7   : > { %p2003_p6 = pnand %p2002_p5, %p2225_p3  ;;  %p2009_p10 = scmp.lt.s32.totalorder %s2007_s0, %s2001_s14 }
 0x2a8   : > { %v1520_v54 = vrot.slane %v1519_v17, 1  ;;  %v1561_v41 = vadd.f32 %v1560_v7, %v1559_v30 }
 0x2a9   : > { %p2004_p7 = pneg %p2003_p6  ;;  %p2010_p11 = por %p2009_p10, %p2008_p9 }
 0x2aa   : > { %v1521_v20 = vadd.f32 %v1520_v54, %v1519_v17  ;;  %v1562_v51 = vrot.slane %v1561_v41, 1 }
 0x2ab   : > { %p2011_p12 = pnand %p2010_p11, %p2004_p7 }
 0x2ac   : > { %1522 = vst [vmem:[%s255_s10] sm:$0x1] %v1521_v20  ;;  %v1563_v61 = vadd.f32 %v1562_v51, %v1561_v41 }
 0x2ad   : > { %2014 = shalt.err (!%p2011_p12)
}
 0x2ae   : > { %s2015_s15 = scalar_lea.hbm %s3268_s21, 16  ;;  %s2019_s16 = scalar_lea.hbm %s3362_s4, 64 }
 0x2af   : > { %p2016_p13 = scmp.ne.s32.totalorder %s3268_s21, %s2015_s15  ;;  %p2020_p2 = scmp.lt.u32.totalorder %s3268_s21, %s3362_s4 }
 0x2b0   : > { %p2021_p4 = scmp.lt.u32.totalorder %s2019_s16, %s2015_s15  ;;  %p2023_p6 = scmp.lt.u32.totalorder %s2015_s15, %s3268_s21 }
 0x2b1   : > { %p2017_p0 = pnand %p2016_p13, %p2225_p3 }
 0x2b2   : > { %p2022_p5 = por %p2021_p4, %p2020_p2 }
 0x2b3   : > { %p2018_p1 = pneg %p2017_p0 }
 0x2b4   : > { %p2024_p7 = por %p2023_p6, %p2022_p5 }
 0x2b6   : > { %p2025_p9 = pnand %p2024_p7, %p2018_p1 }
 0x2b8   : > { %2028 = shalt.err (!%p2025_p9)
}
 0x2b9   : > { %1873 = dma.vmem_to_hbm [thread:$0]  (%p2225_p3), %s3270_s12, 16, %s3268_s21, %s1571_s27  }
 0x2ba   : > { %s3373_s0 = scalar_lea.vmem [#allocation6], %s3175_s30  ;;  %s2029_s14 = scalar_lea.vmem %s3277_s22, 16 }
 0x2bb   : > { %1564 = vst [vmem:[%s3373_s0] sm:$0x1] %v1563_v61  ;;  %p2030_p10 = scmp.ne.s32.totalorder %s3277_s22, %s2029_s14  ;;  %s2141_s15 = smov [#allocation6]  }
 0x2bc   : > { %s2033_s10 = sshll.u32 %s2141_s15, 4  ;;  %s2034_s10 = int_to_ptr.vmem [resolvable:$false] %s2033_s10 }
 0x2bd   : > { %p2031_p11 = pnand %p2030_p10, %p2225_p3  ;;  %s2035_s8 = scalar_lea.vmem %s2034_s10, 32 }
 0x2be   : > { %p2036_p13 = scmp.lt.s32.totalorder %s3277_s22, %s2034_s10  ;;  %p2037_p0 = scmp.lt.s32.totalorder %s2035_s8, %s2029_s14 }
 0x2bf   : > { %p2032_p12 = pneg %p2031_p11 }
 0x2c0   : > { %p2038_p1 = por %p2037_p0, %p2036_p13 }
 0x2c2   : > { %p2039_p2 = pnand %p2038_p1, %p2032_p12 }
 0x2c4   : > { %2042 = shalt.err (!%p2039_p2)
}
 0x2c5   : > { %s2043_s30 = scalar_lea.hbm %s3275_s17, 16  ;;  %s2047_s16 = scalar_lea.hbm %s3363_s5, 64 }
 0x2c6   : > { %p2044_p4 = scmp.ne.s32.totalorder %s3275_s17, %s2043_s30  ;;  %p2048_p7 = scmp.lt.u32.totalorder %s3275_s17, %s3363_s5 }
 0x2c7   : > { %p2049_p9 = scmp.lt.u32.totalorder %s2047_s16, %s2043_s30  ;;  %p2051_p11 = scmp.lt.u32.totalorder %s2043_s30, %s3275_s17 }
 0x2c8   : > { %p2045_p5 = pnand %p2044_p4, %p2225_p3 }
 0x2c9   : > { %p2050_p10 = por %p2049_p9, %p2048_p7 }
 0x2ca   : > { %p2046_p6 = pneg %p2045_p5 }
 0x2cb   : > { %p2052_p12 = por %p2051_p11, %p2050_p10 }
 0x2cd   : > { %p2053_p13 = pnand %p2052_p12, %p2046_p6 }
 0x2cf   : > { %2056 = shalt.err (!%p2053_p13)
}
 0x2d0   : > { %1874 = dma.vmem_to_hbm [thread:$0]  (%p2225_p3), %s3277_s22, 16, %s3275_s17, %s1571_s27  }
 0x2d1 PF: > { %p1888_p0 = scmp.ge.s32.totalorder %s2127_s25, 2  ;;  %s1634_s0 = sand.u32 1, %s2099_s18  }
 0x2d2   : > { %s1635_s14 = scalar_lea.sflag [#allocation3], %s1634_s0 }
 0x2d3   : > { %p1879_p1 = pnand %p1888_p0, %p2236_p8 }
 0x2d5   : > { %2090 = dma.done.wait (!%p1879_p1), %s1635_s14, 2304  }
 0x2d6   : > { %2092 = vsyncadd (!%p1879_p1), %s1635_s14, 4294964992  ;;  %s3374_s15 = sadd.s32 4294967294, %s2127_s25  }
 0x2d7   : > { %s1643_s10 = sand.u32 1, %s3374_s15  }
 0x2d8   : > { %s1644_s6 = scalar_lea.sflag [#allocation5], %s1643_s10 }
 0x2d9   : > { %2094 = dma.done.wait (!%p1879_p1), %s1644_s6, 32  }
 0x2da   : > { %2096 = vsyncadd (!%p1879_p1), %s1644_s6, 4294967264  ;;  %s22_s25 = sadd.s32 1, %s2127_s25   ;;  %s3375_s18 = smov %s2103_s19 }
 0x2db   : > { %p19_p3 = scmp.ge.s32.totalorder %s22_s25, 6   ;;  %s3376_s19 = smov %s2107_s20 }
 0x2dc   : > { %s3377_s20 = smov %s2245_s11  ;;  %s3378_s21 = smov %s2119_s23 }
 0x2dd   : > { %s3379_s22 = smov %s2123_s24  ;;  %s3380_s23 = smov %s3383_s28 }
 0x2de   : > { %s3381_s24 = smov %s3387_s29  ;;  %21 = sbr.rel (!%p19_p3) target bundleno = 9 (0x9), region = 99 }
 0x2e5   :  { %1656 = vsyncpa [#allocation3], 1 }
 0x2e6   :  { %1658 = vsyncpa [#allocation3 + $0x1], 1 }
 0x2e7   :  { %1659 = vsyncpa [#allocation5], 1 }
 0x2e8   :  { %1661 = vsyncpa [#allocation5 + $0x1], 1 }

// kernel: tpu_custom_call.1
= control target key start
LH: loop header
LB: loop body
LE: loop exit
PB: predicated region body
PF: predicated region fallthrough
CT: control target
= control target key end

     0   :  { %s4974_s0 = inlined_call_operand.vmem [shape: f32[2,2,184,4], index: 0, kind: input, shape index: {}]   ;;  %s4975_s1 = inlined_call_operand.vmem [shape: f32[36,128], index: 1, kind: input, shape index: {}]   ;;  %s4976_s2 = inlined_call_operand.vmem [shape: f32[144,1], index: 2, kind: input, shape index: {}]   ;;  %s4977_s3 = inlined_call_operand.hbm [shape: f32[2,2,144,128], index: 3, kind: output, shape index: {0}]   ;;  %s4978_s4 = inlined_call_operand.hbm [shape: f32[2,2,1,128], index: 4, kind: output, shape index: {1}]   ;;  %s4979_s5 = inlined_call_operand.hbm [shape: f32[2,2,1,128], index: 5, kind: output, shape index: {2}]  }
   0x1   :  { %4992 = sst [smem:[#allocation46_spill]] %s4974_s0 }
   0x2   :  { %11 = vsyncpa [#allocation3], 0 }
   0x3   :  { %13 = vsyncpa [#allocation3 + $0x1], 0 }
   0x4   :  { %14 = vsyncpa [#allocation5], 0 }
   0x5   :  { %16 = vsyncpa [#allocation5 + $0x1], 0  ;;  %s3822_s18 = smov 0   ;;  %s3824_s19 = smov 0  }
   0x6   :  { %s3826_s20 = smov 0   ;;  %s3828_s21 = smov 0  }
   0x7   :  { %s3830_s22 = smov 0   ;;  %s3832_s23 = smov 0  }
   0x8   :  { %s3834_s24 = smov 0   ;;  %s3836_s25 = smov 0  }
   0x9 LB: > { %s4990_s26 = sadd.s32 4294967295, %s3784_s25   ;;  %s4980_s27 = sadd.s32 4294967294, %s3784_s25   ;;  %s3784_s25 = sphi %s3836_s25, %s22_s25   ;;  %s3780_s24 = sphi %s3834_s24, %s5086_s24   ;;  %s3776_s23 = sphi %s3832_s23, %s5085_s23   ;;  %s3772_s22 = sphi %s3830_s22, %s5084_s22   ;;  %s3768_s21 = sphi %s3828_s21, %s5083_s21   ;;  %s3764_s20 = sphi %s3826_s20, %s5082_s20   ;;  %s3760_s19 = sphi %s3824_s19, %s5081_s19   ;;  %s3756_s18 = sphi %s3822_s18, %s5080_s18  }
   0xa   : > { %s31_s28 = sadd.s32 1, %s3776_s23  ;;  %s34_s29 = sadd.s32 1, %s3780_s24 }
   0xb   : > { %p32_p0 = scmp.ge.s32.totalorder %s31_s28, 2  ;;  %p123_p1 = scmp.ne.s32.totalorder %s3764_s20, %s3760_s19 }
   0xc   : > { %p124_p2 = scmp.eq.s32.totalorder %s4990_s26, 3  ;;  %p129_p5 = scmp.ne.s32.totalorder %s3760_s19, %s3756_s18 }
   0xd   : > { %s5088_s28 = smov (%p32_p0, %s31_s28), 0  ;;  %s5090_s29 = smov (!%p32_p0, %s34_s29), %s3780_s24 }
   0xe   : > { %s109_s30 = ssub.s32 %s3776_s23, %s5088_s28  ;;  %p3875_p3 = por %p124_p2, %p123_p1 }
   0xf   : > { %p36_p4 = scmp.ge.s32.totalorder %s5090_s29, 2  ;;  %p130_p6 = scmp.eq.s32.totalorder %s4980_s27, 3 }
  0x10   : > { %p2781_p7 = scmp.ge.s32.totalorder %s3784_s25, 1  ;;  %p222_p9 = scmp.lt.s32.totalorder %s3784_s25, 5 }
  0x11   : > { %s5092_s29 = smov (%p36_p4, %s5090_s29), 0  ;;  %p3886_p8 = por %p130_p6, %p129_p5 }
  0x12   : > { %s108_s8 = ssub.s32 %s3780_s24, %s5092_s29  ;;  %s113_s9 = sadd.s32 1, %s3764_s20 }
  0x13   : > { %s110_s10 = sor.u32 %s109_s30, %s108_s8  ;;  %p223_p10 = pnand %p2781_p7, %p222_p9 }
  0x14   : > { %p111_p11 = scmp.eq.s32.totalorder %s110_s10, 0 }
  0x15   : > { %226 = sbr.rel (%p223_p10) target bundleno = 485 (0x1e5), region = 32 }
  0x16   : > { %s3895_s11 = scalar_select %p111_p11, %s3764_s20, %s113_s9  }
  0x1c   : > { %vm390_vm0 = vcmask 1043456   ;;  %v3900_v0 = vld [vmem:[%s4975_s1 + $0x10] sm:$0xf]  ;;  %v295_v1 = vld [vmem:[%s4975_s1 + $0x4] sm:$0xf]  ;;  %p262_p12 = scmp.lt.s32.totalorder %s3772_s22, 1 }
  0x1d   : > { %3248 = vmatprep.subr.msk.mxu0 %vm390_vm0, %v3900_v0  ;;  %3132 = vmatprep.subr.msk.mxu1 %vm390_vm0, %v295_v1  ;;  %p264_p13 = scmp.lt.s32.totalorder %s3768_s21, 1  ;;  %v1432_v2 = vld [vmem:[%s4975_s1 + $0x14] sm:$0xf]  ;;  %v294_v3 = vld [vmem:[%s4975_s1] sm:$0xf]  ;;  %s4995_s0 = sld [smem:[#allocation46_spill]] }
  0x1e   : > { %3249 = vmatpush3.msk.msra.mxu0 %vm390_vm0, %v3900_v0  ;;  %3133 = vmatpush3.msk.msra.mxu1 %vm390_vm0, %v295_v1  ;;  %s263_s30 = scalar_select %p262_p12, %s3772_s22, 1  ;;  %vm315_vm1 = vcmask 1046528   ;;  %vm353_vm2 = vcmask 31744   ;;  %vm1182_vm3 = vcmask 1044480   ;;  %v3993_v37 = vld [vmem:[%s4975_s1 + $0x18] sm:$0xf] }
  0x1f   : > { %s265_s10 = scalar_select %p264_p13, %s3768_s21, 1  ;;  %3277 = vmatprep.subr.msk.mxu0 %vm390_vm0, %v1432_v2  ;;  %3161 = vmatprep.subr.msk.mxu1 %vm390_vm0, %v294_v3  ;;  %v4011_v46 = vld [vmem:[%s4975_s1 + $0x8] sm:$0xf]  ;;  %vm744_vm4 = vcmask 1045504   ;;  %vm1870_vm5 = vcmask 1042432   ;;  %vm2121_vm6 = vcmask 1041408  }
  0x20   : > { %s3541_s12 = smul.u32 46, %s263_s30  ;;  %s4811_s9 = sand.u32 1, %s3760_s19  }
  0x21   : > { %s3540_s13 = smul.u32 23, %s265_s10 }
  0x22   : > { %s3539_s10 = smul.u32 144, %s4811_s9 }
  0x23   : > { %s268_s14 = sadd.s32 %s3541_s12, %s3540_s13  ;;  %s3542_s13 = smul.u32 18, %s3768_s21 }
  0x24   : > { %s2782_s15 = sshll.u32 %s268_s14, 3  ;;  %s4816_s12 = scalar_lea.vmem [#allocation2], %s3539_s10 }
  0x25   : > { %s3926_s27 = scalar_lea.vmem %s4995_s0, %s2782_s15  ;;  %s3543_s14 = smul.u32 36, %s3772_s22 }
  0x26   : > { %v3929_v4 = vld [vmem:[%s3926_s27] sm:$0xff]  ;;  %v3932_v5 = vld [vmem:[%s3926_s27 + $0x8] sm:$0xff]  ;;  %v3935_v6 = vld [vmem:[%s3926_s27 + $0x10] sm:$0xff]  ;;  %s2605_s16 = sshll.u32 %s4816_s12, 4  ;;  %s2582_s10 = scalar_lea.sflag [#allocation3], %s4811_s9  ;;  %s4843_s16 = int_to_ptr.vmem [resolvable:$true] %s2605_s16 }
  0x27   : > { %v316_v7 = vrot.slane %v3929_v4, 1  ;;  %v317_v8 = vrot.slane %v3932_v5, 1  ;;  %v3940_v9 = vld [vmem:[%s3926_s27 + $0x18] sm:$0xff]  ;;  %v1183_v10 = vrot.slane %v3935_v6, 3  ;;  %v319_v11 = vrot.slane %v3935_v6, 1  ;;  %v3945_v12 = vld [vmem:[%s3926_s27 + $0x20] sm:$0xff]  ;;  %s2602_s15 = sadd.s32 %s3543_s14, %s3542_s13 }
  0x28   : > { %v1184_v13 = vrot.slane %v3940_v9, 3  ;;  %v1186_v14 = vrot.slane %v3945_v12, 3  ;;  %v321_v15 = vrot.slane %v3940_v9, 1  ;;  %v3951_v16 = vld [vmem:[%s3926_s27 + $0x28] sm:$0xff]  ;;  %v323_v17 = vrot.slane %v3945_v12, 1  ;;  %v3955_v18 = vld [vmem:[%s3926_s27 + $0x30] sm:$0xff] }
  0x29   : > { %v318_v19 = vsel %vm315_vm1, %v316_v7, %v317_v8  ;;  %v320_v20 = vsel %vm315_vm1, %v317_v8, %v319_v11  ;;  %v1188_v21 = vrot.slane %v3951_v16, 3  ;;  %v1190_v22 = vrot.slane %v3955_v18, 3  ;;  %v3962_v23 = vld [vmem:[%s3926_s27 + $0x38] sm:$0xff]  ;;  %v3965_v24 = vld [vmem:[%s3926_s27 + $0x40] sm:$0xff]  ;;  %v3977_v31 = vld [vmem:[%s3926_s27 + $0x48] sm:$0xff]  ;;  %s3630_s13 = scalar_lea.vmem %s4843_s16, 2304 }
  0x2a   : > { %3134 = vmatprep.mubr.msk.f32.mxu1 %vm353_vm2, %v318_v19  ;;  %v1185_v25 = vsel %vm1182_vm3, %v1183_v10, %v1184_v13  ;;  %v1187_v26 = vsel %vm1182_vm3, %v1184_v13, %v1186_v14  ;;  %v322_v27 = vsel %vm315_vm1, %v319_v11, %v321_v15  ;;  %v325_v29 = vrot.slane %v3951_v16, 1  ;;  %v3980_v32 = vld [vmem:[%s3926_s27 + $0x50] sm:$0xff]  ;;  %v3988_v36 = vld [vmem:[%s3926_s27 + $0x58] sm:$0xff]  ;;  %v4001_v41 = vld [vmem:[%s3926_s27 + $0x60] sm:$0xff]  ;;  %p3631_p0 = scmp.ne.s32.totalorder %s4843_s16, %s3630_s13  ;;  %s3787_s14 = smov [#allocation2]  }
  0x2b   : > { %3250 = vmatprep.mubr.msk.f32.mxu0 %vm353_vm2, %v1185_v25  ;;  %3135 = vmatmul.mubr.msk.f32.vlgmr.msra.gmra.mrb[0].mxu1 %vm353_vm2, %v320_v20  ;;  %v1189_v28 = vsel %vm1182_vm3, %v1186_v14, %v1188_v21  ;;  %v1192_v30 = vrot.slane %v3962_v23, 3  ;;  %v324_v33 = vsel %vm315_vm1, %v321_v15, %v323_v17  ;;  %v327_v34 = vrot.slane %v3955_v18, 1  ;;  %v4026_v54 = vld [vmem:[%s3926_s27 + $0x68] sm:$0xff]  ;;  %v4034_v59 = vld [vmem:[%s3926_s27 + $0x70] sm:$0xff]  ;;  %v4043_v1 = vld [vmem:[%s3926_s27 + $0x78] sm:$0xff] }
  0x2c   : > { %3251 = vmatmul.mubr.msk.f32.vlgmr.msra.gmra.mrb[0].mxu0 %vm353_vm2, %v1187_v26  ;;  %3137 = vmatprep.mubr.msk.f32.mxu1 %vm353_vm2, %v322_v27  ;;  %v1194_v35 = vrot.slane %v3965_v24, 3  ;;  %v1191_v38 = vsel %vm1182_vm3, %v1188_v21, %v1190_v22  ;;  %v326_v39 = vsel %vm315_vm1, %v323_v17, %v325_v29  ;;  %v329_v40 = vrot.slane %v3962_v23, 1  ;;  %v4051_v10 = vld [vmem:[%s3926_s27 + $0x80] sm:$0xff]  ;;  %v4062_v17 = vld [vmem:[%s3926_s27 + $0x88] sm:$0xff]  ;;  %v4070_v25 = vld [vmem:[%s3926_s27 + $0x90] sm:$0xff]  ;;  %p3632_p1 = pnand %p3631_p0, %p3875_p3 }
  0x2d   : > { %3278 = vmatpush3.msk.msra.mxu0 %vm390_vm0, %v1432_v2  ;;  %3253 = vmatprep.mubr.msk.f32.mxu0 %vm353_vm2, %v1189_v28  ;;  %v1193_v42 = vsel %vm1182_vm3, %v1190_v22, %v1192_v30  ;;  %v1196_v43 = vrot.slane %v3977_v31, 3  ;;  %v331_v44 = vrot.slane %v3965_v24, 1  ;;  %v1198_v45 = vrot.slane %v3980_v32, 3 }
  0x2e   : > { %3162 = vmatpush3.msk.msra.mxu1 %vm390_vm0, %v294_v3  ;;  %v328_v47 = vsel %vm315_vm1, %v325_v29, %v327_v34  ;;  %v333_v48 = vrot.slane %v3977_v31, 1  ;;  %v1200_v49 = vrot.slane %v3988_v36, 3  ;;  %3306 = vmatprep.subr.msk.mxu0 %vm390_vm0, %v3993_v37  ;;  %v1195_v50 = vsel %vm1182_vm3, %v1192_v30, %v1194_v35  ;;  %p3633_p2 = pneg %p3632_p1 }
  0x2f   : > { %3138 = vmatmul.mubr.msk.f32.gmra.mrb[2].mxu1 %vm353_vm2, %v324_v33  ;;  %v335_v51 = vrot.slane %v3980_v32, 1  ;;  %v4981_v52 = vrot.slane %v4001_v41, 3  ;;  %v337_v53 = vrot.slane %v3988_v36, 1  ;;  %v330_v55 = vsel %vm315_vm1, %v327_v34, %v329_v40  ;;  %3190 = vmatprep.subr.msk.mxu1 %vm390_vm0, %v4011_v46 }
  0x30   : > { %3254 = vmatmul.mubr.msk.f32.gmra.mrb[2].mxu0 %vm353_vm2, %v1191_v38  ;;  %3140 = vmatprep.mubr.msk.f32.mxu1 %vm353_vm2, %v326_v39  ;;  %v1433_v56 = vrot.slane %v3935_v6, 4  ;;  %v1434_v57 = vrot.slane %v3940_v9, 4  ;;  %v339_v58 = vrot.slane %v4001_v41, 1  ;;  %v1197_v60 = vsel %vm1182_vm3, %v1194_v35, %v1196_v43 }
  0x31   : > { %3256 = vmatprep.mubr.msk.f32.mxu0 %vm353_vm2, %v1193_v42  ;;  %v332_v61 = vsel %vm315_vm1, %v329_v40, %v331_v44  ;;  %v1199_v62 = vsel %vm1182_vm3, %v1196_v43, %v1198_v45  ;;  %v1436_v63 = vrot.slane %v3945_v12, 4  ;;  %v334_v2 = vsel %vm315_vm1, %v331_v44, %v333_v48 }
  0x32   : > { %v1201_v3 = vsel %vm1182_vm3, %v1198_v45, %v1200_v49  ;;  %v341_v7 = vrot.slane %v4026_v54, 1  ;;  %v1438_v8 = vrot.slane %v3951_v16, 4  ;;  %v336_v11 = vsel %vm315_vm1, %v333_v48, %v335_v51 }
  0x33   : > { %3141 = vmatmul.mubr.msk.f32.gmra.mrb[4].mxu1 %vm353_vm2, %v328_v47  ;;  %v1203_v13 = vsel %vm1182_vm3, %v1200_v49, %v4981_v52  ;;  %v338_v14 = vsel %vm315_vm1, %v335_v51, %v337_v53  ;;  %v343_v15 = vrot.slane %v4034_v59, 1  ;;  %v1435_v19 = vsel %vm390_vm0, %v1433_v56, %v1434_v57 }
  0x34   : > { %3257 = vmatmul.mubr.msk.f32.gmra.mrb[4].mxu0 %vm353_vm2, %v1195_v50  ;;  %3143 = vmatprep.mubr.msk.f32.mxu1 %vm353_vm2, %v330_v55  ;;  %v340_v20 = vsel %vm315_vm1, %v337_v53, %v339_v58  ;;  %v1440_v21 = vrot.slane %v3955_v18, 4  ;;  %v345_v22 = vrot.slane %v4043_v1, 1  ;;  %v1437_v26 = vsel %vm390_vm0, %v1434_v57, %v1436_v63 }
  0x35   : > { %3259 = vmatprep.mubr.msk.f32.mxu0 %vm353_vm2, %v1197_v60  ;;  %v1442_v27 = vrot.slane %v3962_v23, 4  ;;  %v347_v28 = vrot.slane %v4051_v10, 1  ;;  %v1444_v29 = vrot.slane %v3965_v24, 4  ;;  %v342_v30 = vsel %vm315_vm1, %v339_v58, %v341_v7  ;;  %v4118_v58 = vld [vmem:[%s3926_s27 + $0x98] sm:$0xff] }
  0x36   : > { %v4079_v33 = vsel %vm390_vm0, %v1436_v63, %v1438_v8  ;;  %v349_v34 = vrot.slane %v4062_v17, 1  ;;  %v1446_v35 = vrot.slane %v3977_v31, 4  ;;  %v344_v38 = vsel %vm315_vm1, %v341_v7, %v343_v15 }
  0x37   : > { %3144 = vmatmul.mubr.msk.f32.gmra.mrb[6].mxu1 %vm353_vm2, %v332_v61  ;;  %v351_v39 = vrot.slane %v4070_v25, 1  ;;  %v1448_v40 = vrot.slane %v3980_v32, 4  ;;  %v1450_v42 = vrot.slane %v3988_v36, 4  ;;  %v4091_v43 = vsel %vm390_vm0, %v1438_v8, %v1440_v21 }
  0x38   : > { %3260 = vmatmul.mubr.msk.f32.gmra.mrb[6].mxu0 %vm353_vm2, %v1199_v62  ;;  %3146 = vmatprep.mubr.msk.f32.mxu1 %vm353_vm2, %v334_v2  ;;  %v346_v44 = vsel %vm315_vm1, %v343_v15, %v345_v22  ;;  %v1452_v45 = vrot.slane %v4001_v41, 4  ;;  %v1454_v47 = vrot.slane %v4026_v54, 4  ;;  %v4097_v48 = vsel %vm390_vm0, %v1440_v21, %v1442_v27 }
  0x39   : > { %3262 = vmatprep.mubr.msk.f32.mxu0 %vm353_vm2, %v1201_v3  ;;  %v4100_v49 = vsel %vm315_vm1, %v345_v22, %v347_v28  ;;  %v4103_v50 = vsel %vm390_vm0, %v1442_v27, %v1444_v29  ;;  %v1456_v51 = vrot.slane %v4034_v59, 4  ;;  %v4108_v53 = vsel %vm315_vm1, %v347_v28, %v349_v34  ;;  %v4159_v28 = vld [vmem:[%s3926_s27 + $0xa0] sm:$0xff] }
  0x3a   : > { %v4111_v55 = vsel %vm390_vm0, %v1444_v29, %v1446_v35  ;;  %v4114_v56 = vsel %vm315_vm1, %v349_v34, %v351_v39  ;;  %v1458_v57 = vrot.slane %v4043_v1, 4  ;;  %v4123_v60 = vsel %vm390_vm0, %v1446_v35, %v1448_v40 }
  0x3b   : > { %3147 = vmatmul.mubr.msk.f32.gmra.mrb[8].mxu1 %vm353_vm2, %v336_v11  ;;  %v4126_v61 = vsel %vm390_vm0, %v1448_v40, %v1450_v42  ;;  %v4129_v62 = vsel %vm390_vm0, %v1450_v42, %v1452_v45  ;;  %v4133_v63 = vsel %vm390_vm0, %v1452_v45, %v1454_v47  ;;  %v4136_v2 = vsel %vm390_vm0, %v1454_v47, %v1456_v51 }
  0x3c   : > { %3263 = vmatmul.mubr.msk.f32.gmra.mrb[8].mxu0 %vm353_vm2, %v1203_v13  ;;  %3149 = vmatprep.mubr.msk.f32.mxu1 %vm353_vm2, %v338_v14  ;;  %v1460_v3 = vrot.slane %v4051_v10, 4  ;;  %v745_v7 = vrot.slane %v3929_v4, 2  ;;  %v1462_v8 = vrot.slane %v4062_v17, 4  ;;  %v4982_v11 = vrot.slane %v4070_v25, 4 }
  0x3d   : > { %3279 = vmatprep.mubr.msk.f32.mxu0 %vm353_vm2, %v1435_v19  ;;  %v746_v14 = vrot.slane %v3932_v5, 2  ;;  %v4146_v15 = vsel %vm390_vm0, %v1456_v51, %v1458_v57  ;;  %v4151_v19 = vld [vmem:[%s4975_s1 + $0x1c] sm:$0xf]  ;;  %v748_v21 = vrot.slane %v3935_v6, 2  ;;  %v750_v22 = vrot.slane %v3940_v9, 2 }
  0x3e   : > { %v752_v27 = vrot.slane %v3945_v12, 2  ;;  %v754_v29 = vrot.slane %v3951_v16, 2  ;;  %v756_v34 = vrot.slane %v3955_v18, 2  ;;  %v758_v35 = vrot.slane %v3962_v23, 2 }
  0x3f   : > { %3150 = vmatmul.mubr.msk.f32.gmra.mrb[10].mxu1 %vm353_vm2, %v340_v20  ;;  %v4162_v20 = vsel %vm744_vm4, %v745_v7, %v746_v14  ;;  %v760_v40 = vrot.slane %v3965_v24, 2  ;;  %v762_v47 = vrot.slane %v3977_v31, 2  ;;  %v4195_v51 = vsel %vm390_vm0, %v1458_v57, %v1460_v3 }
  0x40   : > { %3280 = vmatmul.mubr.msk.f32.vlgmr.msra.gmra.mrb[0].mxu0 %vm353_vm2, %v1437_v26  ;;  %3152 = vmatprep.mubr.msk.f32.mxu1 %vm353_vm2, %v342_v30  ;;  %v4172_v26 = vsel %vm744_vm4, %v746_v14, %v748_v21  ;;  %v4175_v30 = vsel %vm744_vm4, %v748_v21, %v750_v22  ;;  %v4178_v39 = vsel %vm744_vm4, %v750_v22, %v752_v27  ;;  %v764_v21 = vrot.slane %v3980_v32, 2 }
  0x41   : > { %3307 = vmatpush3.msk.msra.mxu0 %vm390_vm0, %v3993_v37  ;;  %3282 = vmatprep.mubr.msk.f32.mxu0 %vm353_vm2, %v4079_v33  ;;  %v4184_v42 = vsel %vm744_vm4, %v752_v27, %v754_v29  ;;  %v4187_v37 = vsel %vm744_vm4, %v754_v29, %v756_v34  ;;  %v4190_v45 = vsel %vm744_vm4, %v756_v34, %v758_v35  ;;  %v1871_v57 = vrot.slane %v3945_v12, 5 }
  0x42   : > { %3335 = vmatprep.subr.msk.mxu0 %vm390_vm0, %v4151_v19  ;;  %v4199_v14 = vsel %vm744_vm4, %v758_v35, %v760_v40  ;;  %v4206_v22 = vsel %vm744_vm4, %v760_v40, %v762_v47  ;;  %v1872_v27 = vrot.slane %v3951_v16, 5  ;;  %v4214_v29 = vsel %vm390_vm0, %v1460_v3, %v1462_v8 }
  0x43   : > { %3153 = vmatmul.mubr.msk.f32.gmra.mrb[12].mxu1 %vm353_vm2, %v344_v38  ;;  %v766_v38 = vrot.slane %v3988_v36, 2  ;;  %v4219_v34 = vsel %vm390_vm0, %v1462_v8, %v4982_v11  ;;  %v768_v35 = vrot.slane %v4001_v41, 2  ;;  %v1874_v7 = vrot.slane %v3955_v18, 5 }
  0x44   : > { %3283 = vmatmul.mubr.msk.f32.gmra.mrb[2].mxu0 %vm353_vm2, %v4091_v43  ;;  %3155 = vmatprep.mubr.msk.f32.mxu1 %vm353_vm2, %v346_v44  ;;  %v4222_v44 = vsel %vm744_vm4, %v762_v47, %v764_v21  ;;  %v4229_v52 = vsel %vm1870_vm5, %v1871_v57, %v1872_v27  ;;  %v770_v3 = vrot.slane %v4026_v54, 2  ;;  %v1876_v47 = vrot.slane %v3962_v23, 5 }
  0x45   : > { %3285 = vmatprep.mubr.msk.f32.mxu0 %vm353_vm2, %v4097_v48  ;;  %v4226_v40 = vsel %vm744_vm4, %v764_v21, %v766_v38  ;;  %4997 = vst [vmem:[#allocation10_spill] sm:$0xff] %v4229_v52  ;;  %v4236_v8 = vsel %vm744_vm4, %v766_v38, %v768_v35  ;;  %v772_v11 = vrot.slane %v4034_v59, 2  ;;  %v1878_v21 = vrot.slane %v3965_v24, 5 }
  0x46   : > { %4996 = vst [vmem:[#allocation9_spill] sm:$0xff] %v4226_v40  ;;  %4998 = vst [vmem:[#allocation11_spill] sm:$0xff] %v4236_v8  ;;  %v4246_v57 = vsel %vm1870_vm5, %v1872_v27, %v1874_v7  ;;  %v774_v38 = vrot.slane %v4043_v1, 2  ;;  %v1880_v13 = vrot.slane %v3977_v31, 5  ;;  %v4256_v8 = vsel %vm1870_vm5, %v1874_v7, %v1876_v47 }
  0x47   : > { %3156 = vmatmul.mubr.msk.f32.gmra.mrb[14].mxu1 %vm353_vm2, %v4100_v49  ;;  %4999 = vst [vmem:[#allocation12_spill] sm:$0xff] %v4246_v57  ;;  %v4249_v49 = vsel %vm744_vm4, %v768_v35, %v770_v3  ;;  %v4259_v52 = vsel %vm744_vm4, %v770_v3, %v772_v11  ;;  %v776_v27 = vrot.slane %v4051_v10, 2  ;;  %v1882_v57 = vrot.slane %v3980_v32, 5 }
  0x48   : > { %3286 = vmatmul.mubr.msk.f32.gmra.mrb[4].mxu0 %vm353_vm2, %v4103_v50  ;;  %3158 = vmatprep.mubr.msk.f32.mxu1 %vm353_vm2, %v4108_v53  ;;  %5000 = vst [vmem:[#allocation13_spill] sm:$0xff] %v4249_v49  ;;  %v4262_v53 = vsel %vm1870_vm5, %v1876_v47, %v1878_v21  ;;  %v4266_v35 = vsel %vm744_vm4, %v772_v11, %v774_v38  ;;  %v778_v40 = vrot.slane %v4062_v17, 2  ;;  %v1884_v3 = vrot.slane %v3988_v36, 5 }
  0x49   : > { %3288 = vmatprep.mubr.msk.f32.mxu0 %vm353_vm2, %v4111_v55  ;;  %5001 = vst [vmem:[#allocation14_spill] sm:$0xff] %v4262_v53  ;;  %5002 = vst [vmem:[#allocation15_spill] sm:$0xff] %v4266_v35  ;;  %v4269_v49 = vsel %vm1870_vm5, %v1878_v21, %v1880_v13  ;;  %v4276_v7 = vsel %vm744_vm4, %v774_v38, %v776_v27  ;;  %v780_v47 = vrot.slane %v4070_v25, 2  ;;  %v1886_v11 = vrot.slane %v4001_v41, 5 }
  0x4a   : > { %5003 = vst [vmem:[#allocation16_spill] sm:$0xff] %v4269_v49  ;;  %5004 = vst [vmem:[#allocation17_spill] sm:$0xff] %v4276_v7  ;;  %v4286_v21 = vsel %vm1870_vm5, %v1880_v13, %v1882_v57  ;;  %v1888_v38 = vrot.slane %v4026_v54, 5  ;;  %v1890_v7 = vrot.slane %v4034_v59, 5  ;;  %v4296_v49 = vsel %vm1870_vm5, %v1882_v57, %v1884_v3  ;;  %v4321_v57 = vld [vmem:[%s3926_s27 + $0xa8] sm:$0xff] }
  0x4b   : > { %3159 = vmatmul.mubr.msk.f32.gmra.mrb[16].mxu1 %vm353_vm2, %v4114_v56  ;;  %5005 = vst [vmem:[#allocation18_spill] sm:$0xff] %v4286_v21  ;;  %v4289_v56 = vsel %vm744_vm4, %v776_v27, %v778_v40  ;;  %5007 = vst [vmem:[#allocation20_spill] sm:$0xff] %v4296_v49  ;;  %v4299_v35 = vsel %vm744_vm4, %v778_v40, %v780_v47  ;;  %v1892_v13 = vrot.slane %v4043_v1, 5  ;;  %v1894_v21 = vrot.slane %v4051_v10, 5  ;;  %v4318_v40 = vld [vmem:[%s4975_s1 + $0xc] sm:$0xf] }
  0x4c   : > { %3289 = vmatmul.mubr.msk.f32.gmra.mrb[6].mxu0 %vm353_vm2, %v4123_v60  ;;  %3163 = vmatprep.mubr.msk.f32.mxu1 %vm353_vm2, %v3929_v4  ;;  %5006 = vst [vmem:[#allocation19_spill] sm:$0xff] %v4289_v56  ;;  %5008 = vst [vmem:[#allocation21_spill] sm:$0xff] %v4299_v35  ;;  %v4302_v4 = vsel %vm1870_vm5, %v1884_v3, %v1886_v11  ;;  %v4306_v27 = vsel %vm1870_vm5, %v1886_v11, %v1888_v38  ;;  %v1896_v53 = vrot.slane %v4062_v17, 5 }
  0x4d   : > { %3291 = vmatprep.mubr.msk.f32.mxu0 %vm353_vm2, %v4126_v61  ;;  %5009 = vst [vmem:[#allocation22_spill] sm:$0xff] %v4302_v4  ;;  %5010 = vst [vmem:[#allocation23_spill] sm:$0xff] %v4306_v27  ;;  %v4309_v56 = vsel %vm1870_vm5, %v1888_v38, %v1890_v7  ;;  %v4324_v3 = vsel %vm1870_vm5, %v1890_v7, %v1892_v13  ;;  %v1898_v11 = vrot.slane %v4070_v25, 5  ;;  %v1900_v38 = vrot.slane %v4118_v58, 5 }
  0x4e   : > { %5011 = vst [vmem:[#allocation24_spill] sm:$0xff] %v4309_v56  ;;  %5012 = vst [vmem:[#allocation25_spill] sm:$0xff] %v4324_v3  ;;  %v1902_v56 = vrot.slane %v4159_v28, 5  ;;  %v5014_v27 = vrot.slane %v4070_v25, 4  ;;  %v4341_v7 = vsel %vm1870_vm5, %v1892_v13, %v1894_v21  ;;  %v4344_v3 = vsel %vm1870_vm5, %v1894_v21, %v1896_v53 }
  0x4f   : > { %3164 = vmatmul.mubr.msk.f32.vlgmr.msra.gmra.mrb[0].mxu1 %vm353_vm2, %v3932_v5  ;;  %v5013_v5 = vrot.slane %v4118_v58, 4  ;;  %5015 = vst [vmem:[#allocation26_spill] sm:$0xff] %v4341_v7  ;;  %5016 = vst [vmem:[#allocation27_spill] sm:$0xff] %v4344_v3  ;;  %v5020_v21 = vrot.slane %v4159_v28, 4 }
  0x50   : > { %3292 = vmatmul.mubr.msk.f32.gmra.mrb[8].mxu0 %vm353_vm2, %v4129_v62  ;;  %3166 = vmatprep.mubr.msk.f32.mxu1 %vm353_vm2, %v3935_v6  ;;  %v4352_v6 = vsel %vm1870_vm5, %v1896_v53, %v1898_v11  ;;  %v4358_v13 = vsel %vm1870_vm5, %v1900_v38, %v1902_v56 }
  0x51   : > { %v4338_v4 = vsel %vm390_vm0, %v5014_v27, %v5013_v5  ;;  %3294 = vmatprep.mubr.msk.f32.mxu0 %vm353_vm2, %v4133_v63  ;;  %3191 = vmatpush3.msk.msra.mxu1 %vm390_vm0, %v4011_v46  ;;  %5017 = vst [vmem:[#allocation28_spill] sm:$0xff] %v4352_v6  ;;  %v4355_v27 = vsel %vm1870_vm5, %v1898_v11, %v1900_v38  ;;  %5019 = vst [vmem:[#allocation30_spill] sm:$0xff] %v4358_v13  ;;  %v5021_v46 = vrot.slane %v4321_v57, 5 }
  0x52   : > { %5018 = vst [vmem:[#allocation29_spill] sm:$0xff] %v4355_v27  ;;  %v4365_v35 = vsel %vm390_vm0, %v5013_v5, %v5020_v21  ;;  %3219 = vmatprep.subr.msk.mxu1 %vm390_vm0, %v4318_v40  ;;  %v2122_v11 = vrot.slane %v3945_v12, 6  ;;  %v2123_v38 = vrot.slane %v3951_v16, 6  ;;  %v2125_v13 = vrot.slane %v3955_v18, 6 }
  0x53   : > { %v4372_v53 = vsel %vm1870_vm5, %v1902_v56, %v5021_v46  ;;  %3167 = vmatmul.mubr.msk.f32.gmra.mrb[2].mxu1 %vm353_vm2, %v3940_v9  ;;  %v2127_v21 = vrot.slane %v3962_v23, 6  ;;  %v2129_v5 = vrot.slane %v3965_v24, 6  ;;  %v2131_v27 = vrot.slane %v3977_v31, 6 }
  0x54   : > { %5022 = vst [vmem:[#allocation31_spill] sm:$0xff] %v4372_v53  ;;  %3295 = vmatmul.mubr.msk.f32.gmra.mrb[10].mxu0 %vm353_vm2, %v4136_v2  ;;  %3169 = vmatprep.mubr.msk.f32.mxu1 %vm353_vm2, %v3945_v12  ;;  %v4387_v56 = vsel %vm2121_vm6, %v2122_v11, %v2123_v38  ;;  %v2133_v46 = vrot.slane %v3980_v32, 6  ;;  %v997_v9 = vrot.slane %v4118_v58, 2  ;;  %v2135_v53 = vrot.slane %v3988_v36, 6 }
  0x55   : > { %5023 = vst [vmem:[#allocation32_spill] sm:$0xff] %v4387_v56  ;;  %3297 = vmatprep.mubr.msk.f32.mxu0 %vm353_vm2, %v4146_v15  ;;  %v4395_v6 = vsel %vm2121_vm6, %v2123_v38, %v2125_v13  ;;  %v4398_v3 = vsel %vm2121_vm6, %v2125_v13, %v2127_v21  ;;  %v4401_v12 = vsel %vm2121_vm6, %v2127_v21, %v2129_v5  ;;  %v999_v38 = vrot.slane %v4159_v28, 2 }
  0x56   : > { %v4404_v11 = vsel %vm2121_vm6, %v2129_v5, %v2131_v27  ;;  %v4407_v56 = vsel %vm2121_vm6, %v2131_v27, %v2133_v46  ;;  %v4410_v7 = vsel %vm744_vm4, %v780_v47, %v997_v9  ;;  %v4413_v49 = vsel %vm2121_vm6, %v2133_v46, %v2135_v53 }
  0x57   : > { %5024 = vst [vmem:[#allocation33_spill] sm:$0xff] %v4404_v11  ;;  %5025 = vst [vmem:[#allocation34_spill] sm:$0xff] %v4407_v56  ;;  %3170 = vmatmul.mubr.msk.f32.gmra.mrb[4].mxu1 %vm353_vm2, %v3951_v16  ;;  %v2137_v13 = vrot.slane %v4001_v41, 6  ;;  %v1204_v21 = vrot.slane %v4026_v54, 3  ;;  %v2139_v5 = vrot.slane %v4026_v54, 6  ;;  %v1206_v27 = vrot.slane %v4034_v59, 3 }
  0x58   : > { %5026 = vst [vmem:[#allocation35_spill] sm:$0xff] %v4410_v7  ;;  %5027 = vst [vmem:[#allocation36_spill] sm:$0xff] %v4413_v49  ;;  %3298 = vmatmul.mubr.msk.f32.gmra.mrb[12].mxu0 %vm353_vm2, %v4195_v51  ;;  %3172 = vmatprep.mubr.msk.f32.mxu1 %vm353_vm2, %v3955_v18  ;;  %v4427_v47 = vsel %vm744_vm4, %v997_v9, %v999_v38  ;;  %v2141_v46 = vrot.slane %v4034_v59, 6  ;;  %v1208_v16 = vrot.slane %v4043_v1, 3  ;;  %v2143_v49 = vrot.slane %v4043_v1, 6 }
  0x59   : > { %5028 = vst [vmem:[#allocation37_spill] sm:$0xff] %v4427_v47  ;;  %3300 = vmatprep.mubr.msk.f32.mxu0 %vm353_vm2, %v4214_v29  ;;  %v4435_v7 = vsel %vm2121_vm6, %v2135_v53, %v2137_v13  ;;  %v5030_v56 = vrot.slane %v4001_v41, 3  ;;  %v4443_v18 = vsel %vm2121_vm6, %v2137_v13, %v2139_v5  ;;  %v4446_v9 = vsel %vm1182_vm3, %v1204_v21, %v1206_v27 }
  0x5a   : > { %5029 = vst [vmem:[#allocation38_spill] sm:$0xff] %v4435_v7  ;;  %v4449_v38 = vsel %vm2121_vm6, %v2139_v5, %v2141_v46  ;;  %v4452_v47 = vsel %vm1182_vm3, %v1206_v27, %v1208_v16  ;;  %v4455_v53 = vsel %vm2121_vm6, %v2141_v46, %v2143_v49  ;;  %v1210_v7 = vrot.slane %v4051_v10, 3 }
  0x5b   : > { %v4440_v11 = vsel %vm1182_vm3, %v5030_v56, %v1204_v21  ;;  %5031 = vst [vmem:[#allocation39_spill] sm:$0xff] %v4449_v38  ;;  %5032 = vst [vmem:[#allocation40_spill] sm:$0xff] %v4452_v47  ;;  %3173 = vmatmul.mubr.msk.f32.gmra.mrb[6].mxu1 %vm353_vm2, %v3962_v23  ;;  %v2145_v56 = vrot.slane %v4051_v10, 6  ;;  %v1212_v13 = vrot.slane %v4062_v17, 3  ;;  %v2147_v21 = vrot.slane %v4062_v17, 6 }
  0x5c   : > { %5033 = vst [vmem:[#allocation41_spill] sm:$0xff] %v4455_v53  ;;  %v1214_v5 = vrot.slane %v4070_v25, 3  ;;  %3301 = vmatmul.mubr.msk.f32.gmra.mrb[14].mxu0 %vm353_vm2, %v4219_v34  ;;  %3175 = vmatprep.mubr.msk.f32.mxu1 %vm353_vm2, %v3965_v24  ;;  %v4469_v27 = vsel %vm1182_vm3, %v1208_v16, %v1210_v7  ;;  %v2149_v23 = vrot.slane %v4070_v25, 6  ;;  %v1216_v46 = vrot.slane %v4118_v58, 3  ;;  %v4489_v25 = vld [vmem:[%s3926_s27 + $0xb0] sm:$0xff]  ;;  %s2954_s27 = sshll.u32 %s2602_s15, 7 }
  0x5d   : > { %5034 = vst [vmem:[#allocation42_spill] sm:$0xff] %v4469_v27  ;;  %v2151_v53 = vrot.slane %v4118_v58, 6  ;;  %3303 = vmatprep.mubr.msk.f32.mxu0 %vm353_vm2, %v4338_v4  ;;  %v4477_v47 = vsel %vm2121_vm6, %v2143_v49, %v2145_v56  ;;  %v4480_v38 = vsel %vm1182_vm3, %v1210_v7, %v1212_v13  ;;  %v4483_v24 = vsel %vm2121_vm6, %v2145_v56, %v2147_v21  ;;  %s4841_s8 = scalar_lea.hbm %s4977_s3, %s2954_s27  ;;  %s3634_s15 = sshll.u32 %s3787_s14, 4  ;;  %s3635_s15 = int_to_ptr.vmem [resolvable:$false] %s3634_s15 }
  0x5e   : > { %v4486_v16 = vsel %vm1182_vm3, %v1212_v13, %v1214_v5  ;;  %v4492_v27 = vsel %vm2121_vm6, %v2147_v21, %v2149_v23  ;;  %v4495_v58 = vsel %vm1182_vm3, %v1214_v5, %v1216_v46  ;;  %v1218_v7 = vrot.slane %v4159_v28, 3  ;;  %v2389_v21 = vld [vmem:[%s4976_s2] sm:$0xff]  ;;  %s3636_s27 = scalar_lea.vmem %s3635_s15, 4608  ;;  %p3637_p4 = scmp.lt.s32.totalorder %s4843_s16, %s3635_s15 }
  0x5f   : > { %5035 = vst [vmem:[#allocation43_spill] sm:$0xff] %v4486_v16  ;;  %5036 = vst [vmem:[#allocation44_spill] sm:$0xff] %v4495_v58  ;;  %v4498_v49 = vsel %vm2121_vm6, %v2149_v23, %v2151_v53  ;;  %3176 = vmatmul.mubr.msk.f32.gmra.mrb[8].mxu1 %vm353_vm2, %v3977_v31  ;;  %v2153_v56 = vrot.slane %v4159_v28, 6  ;;  %v2155_v13 = vrot.slane %v4321_v57, 6  ;;  %v2157_v16 = vrot.slane %v4489_v25, 6  ;;  %v2391_v31 = vld [vmem:[%s4976_s2 + $0x10] sm:$0xff]  ;;  %p3638_p5 = scmp.lt.s32.totalorder %s3636_s27, %s3630_s13 }
  0x60   : > { %5037 = vst [vmem:[#allocation45_spill] sm:$0xff] %v4498_v49  ;;  %3304 = vmatmul.mubr.msk.f32.gmra.mrb[16].mxu0 %vm353_vm2, %v4365_v35  ;;  %3178 = vmatprep.mubr.msk.f32.mxu1 %vm353_vm2, %v3980_v32  ;;  %v4514_v5 = vsel %vm1182_vm3, %v1216_v46, %v1218_v7  ;;  %v3786_v32 = vmov 0   ;;  %v5046_v46 = vld [vmem:[#allocation16_spill] sm:$0xff]  ;;  %v5048_v7 = vld [vmem:[#allocation18_spill] sm:$0xff] }
  0x61   : > { %3308 = vmatprep.mubr.msk.f32.mxu0 %vm353_vm2, %v4079_v33  ;;  %v4522_v23 = vsel %vm2121_vm6, %v2151_v53, %v2153_v56  ;;  %v4525_v49 = vsel %vm2121_vm6, %v2153_v56, %v2155_v13  ;;  %v4528_v58 = vsel %vm2121_vm6, %v2155_v13, %v2157_v16  ;;  %3628 = vset.pattern.permute.xlu0 %v3786_v32  ;;  %v4535_v33 = vld [vmem:[%s4975_s1 + $0x20] sm:$0xf]  ;;  %v2390_v53 = vld [vmem:[%s4976_s2 + $0x8] sm:$0xff]  ;;  %v5049_v56 = vld [vmem:[#allocation19_spill] sm:$0xff]  ;;  %p3639_p6 = por %p3638_p5, %p3637_p4 }
  0x62   : > { %2409 = vperm.xlu0 %3628, %v2389_v21   ;;  %3629 = vset.pattern.permute.xlu1 %v3786_v32  ;;  %v5047_v16 = vld [vmem:[#allocation17_spill] sm:$0xff]  ;;  %v5052_v21 = vld [vmem:[#allocation22_spill] sm:$0xff]  ;;  %v5054_v32 = vld [vmem:[#allocation24_spill] sm:$0xff] }
  0x63   : > { %3179 = vmatmul.mubr.msk.f32.gmra.mrb[10].mxu1 %vm353_vm2, %v3988_v36  ;;  %2419 = vperm.xlu1 %3629, %v2391_v31   ;;  %v2392_v36 = vld [vmem:[%s4976_s2 + $0x18] sm:$0xff]  ;;  %v5051_v13 = vld [vmem:[#allocation21_spill] sm:$0xff]  ;;  %p3640_p7 = pnand %p3639_p6, %p3633_p2 }
  0x64   : > { %3309 = vmatmul.mubr.msk.f32.vlgmr.msra.gmra.mrb[0].mxu0 %vm353_vm2, %v4091_v43  ;;  %3181 = vmatprep.mubr.msk.f32.mxu1 %vm353_vm2, %v4001_v41  ;;  %v2393_v41 = vld [vmem:[%s4976_s2 + $0x20] sm:$0xff]  ;;  %v2394_v43 = vld [vmem:[%s4976_s2 + $0x28] sm:$0xff]  ;;  %v5053_v31 = vld [vmem:[#allocation23_spill] sm:$0xff] }
  0x65   : > { %3336 = vmatpush3.msk.msra.mxu0 %vm390_vm0, %v4151_v19  ;;  %3311 = vmatprep.mubr.msk.f32.mxu0 %vm353_vm2, %v4097_v48  ;;  %v2400_v48 = vld [vmem:[%s4976_s2 + $0x58] sm:$0xff]  ;;  %v2405_v19 = vld [vmem:[%s4976_s2 + $0x80] sm:$0xff] }
  0x66   : > { %3364 = vmatprep.subr.msk.mxu0 %vm390_vm0, %v4535_v33  ;;  %2414 = vperm.xlu0 %3628, %v2390_v53   ;;  %v5062_v53 = vrot.slane %v4321_v57, 5 }
  0x67   : > { %3182 = vmatmul.mubr.msk.f32.gmra.mrb[12].mxu1 %vm353_vm2, %v4026_v54  ;;  %2424 = vperm.xlu1 %3629, %v2392_v36   ;;  %v2395_v54 = vld [vmem:[%s4976_s2 + $0x30] sm:$0xff] }
  0x68   : > { %3312 = vmatmul.mubr.msk.f32.gmra.mrb[2].mxu0 %vm353_vm2, %v4103_v50  ;;  %3184 = vmatprep.mubr.msk.f32.mxu1 %vm353_vm2, %v4034_v59  ;;  %v2396_v59 = vld [vmem:[%s4976_s2 + $0x38] sm:$0xff]  ;;  %v2401_v50 = vld [vmem:[%s4976_s2 + $0x60] sm:$0xff] }
  0x69   : > { %3314 = vmatprep.mubr.msk.f32.mxu0 %vm353_vm2, %v4111_v55  ;;  %v2402_v55 = vld [vmem:[%s4976_s2 + $0x68] sm:$0xff]  ;;  %v5070_v36 = vld [vmem:[#allocation39_spill] sm:$0xff] }
  0x6a   : > { %2429 = vperm.xlu0 %3628, %v2393_v41   ;;  %v5071_v41 = vld [vmem:[#allocation40_spill] sm:$0xff] }
  0x6b   : > { %3185 = vmatmul.mubr.msk.f32.gmra.mrb[14].mxu1 %vm353_vm2, %v4043_v1  ;;  %2434 = vperm.xlu1 %3629, %v2394_v43   ;;  %v2397_v1 = vld [vmem:[%s4976_s2 + $0x40] sm:$0xff] }
  0x6c   : > { %3315 = vmatmul.mubr.msk.f32.gmra.mrb[4].mxu0 %vm353_vm2, %v4123_v60  ;;  %3187 = vmatprep.mubr.msk.f32.mxu1 %vm353_vm2, %v4051_v10  ;;  %v2398_v10 = vld [vmem:[%s4976_s2 + $0x48] sm:$0xff]  ;;  %v1685_v60 = vrot.slane %v4321_v57, 4 }
  0x6d   : > { %3317 = vmatprep.mubr.msk.f32.mxu0 %vm353_vm2, %v4126_v61  ;;  %v2403_v61 = vld [vmem:[%s4976_s2 + $0x70] sm:$0xff]  ;;  %v5064_v57 = vld [vmem:[#allocation33_spill] sm:$0xff] }
  0x6e   : > { %2439 = vperm.xlu0 %3628, %v2395_v54   ;;  %v5072_v43 = vld [vmem:[#allocation41_spill] sm:$0xff]  ;;  %v5073_v54 = vld [vmem:[#allocation42_spill] sm:$0xff] }
  0x6f   : > { %3188 = vmatmul.mubr.msk.f32.gmra.mrb[16].mxu1 %vm353_vm2, %v4062_v17  ;;  %2444 = vperm.xlu1 %3629, %v2396_v59   ;;  %v2399_v17 = vld [vmem:[%s4976_s2 + $0x50] sm:$0xff] }
  0x70   : > { %3318 = vmatmul.mubr.msk.f32.gmra.mrb[6].mxu0 %vm353_vm2, %v4129_v62  ;;  %3192 = vmatprep.mubr.msk.f32.mxu1 %vm353_vm2, %v4162_v20  ;;  %v2404_v62 = vld [vmem:[%s4976_s2 + $0x78] sm:$0xff] }
  0x71   : > { %3320 = vmatprep.mubr.msk.f32.mxu0 %vm353_vm2, %v4133_v63  ;;  %v1687_v63 = vrot.slane %v4489_v25, 4 }
  0x72   : > { %2449 = vperm.xlu0 %3628, %v2397_v1  }
  0x73   : > { %3193 = vmatmul.mubr.msk.f32.vlgmr.msra.gmra.mrb[0].mxu1 %vm353_vm2, %v4172_v26  ;;  %2454 = vperm.xlu1 %3629, %v2398_v10   ;;  %v1688_v20 = vsel %vm390_vm0, %v1685_v60, %v1687_v63  ;;  %v5039_v26 = vld [vmem:[#allocation9_spill] sm:$0xff] }
  0x74   : > { %3321 = vmatmul.mubr.msk.f32.gmra.mrb[8].mxu0 %vm353_vm2, %v4136_v2  ;;  %3195 = vmatprep.mubr.msk.f32.mxu1 %vm353_vm2, %v4175_v30  ;;  %v5038_v2 = vrot.slane %v4159_v28, 4  ;;  %v2406_v28 = vld [vmem:[%s4976_s2 + $0x88] sm:$0xff] }
  0x75   : > { %3323 = vmatprep.mubr.msk.f32.mxu0 %vm353_vm2, %v4146_v15  ;;  %3220 = vmatpush3.msk.msra.mxu1 %vm390_vm0, %v4318_v40  ;;  %v5045_v40 = vld [vmem:[#allocation15_spill] sm:$0xff] }
  0x76   : > { %3393 = vmatprep.subr.msk.mxu1 %vm390_vm0, %v3900_v0  ;;  %2459 = vperm.xlu0 %3628, %v2399_v17   ;;  %v1686_v15 = vsel %vm390_vm0, %v5038_v2, %v1685_v60 }
  0x77   : > { %3196 = vmatmul.mubr.msk.f32.gmra.mrb[2].mxu1 %vm353_vm2, %v4178_v39  ;;  %2464 = vperm.xlu1 %3629, %v2400_v48  }
  0x78   : > { %3324 = vmatmul.mubr.msk.f32.gmra.mrb[10].mxu0 %vm353_vm2, %v4195_v51  ;;  %3198 = vmatprep.mubr.msk.f32.mxu1 %vm353_vm2, %v4184_v42  ;;  %v5040_v51 = vld [vmem:[#allocation10_spill] sm:$0xff] }
  0x79   : > { %3326 = vmatprep.mubr.msk.f32.mxu0 %vm353_vm2, %v4214_v29  ;;  %v5041_v29 = vld [vmem:[#allocation11_spill] sm:$0xff] }
  0x7a   : > { %2469 = vperm.xlu0 %3628, %v2401_v50  }
  0x7b   : > { %3199 = vmatmul.mubr.msk.f32.gmra.mrb[4].mxu1 %vm353_vm2, %v4187_v37  ;;  %2474 = vperm.xlu1 %3629, %v2402_v55  }
  0x7c   : > { %3327 = vmatmul.mubr.msk.f32.gmra.mrb[12].mxu0 %vm353_vm2, %v4219_v34  ;;  %3201 = vmatprep.mubr.msk.f32.mxu1 %vm353_vm2, %v4190_v45  ;;  %v5042_v34 = vld [vmem:[#allocation12_spill] sm:$0xff] }
  0x7d   : > { %3329 = vmatprep.mubr.msk.f32.mxu0 %vm353_vm2, %v4338_v4  ;;  %v5044_v4 = vld [vmem:[#allocation14_spill] sm:$0xff] }
  0x7e   : > { %2479 = vperm.xlu0 %3628, %v2403_v61  }
  0x7f   : > { %3202 = vmatmul.mubr.msk.f32.gmra.mrb[6].mxu1 %vm353_vm2, %v4199_v14  ;;  %2484 = vperm.xlu1 %3629, %v2404_v62  }
  0x80   : > { %3330 = vmatmul.mubr.msk.f32.gmra.mrb[14].mxu0 %vm353_vm2, %v4365_v35  ;;  %3204 = vmatprep.mubr.msk.f32.mxu1 %vm353_vm2, %v4206_v22  ;;  %v5043_v35 = vld [vmem:[#allocation13_spill] sm:$0xff] }
  0x81   : > { %3332 = vmatprep.mubr.msk.f32.mxu0 %vm353_vm2, %v1686_v15 }
  0x82   : > { %2489 = vperm.xlu0 %3628, %v2405_v19  }
  0x83   : > { %3205 = vmatmul.mubr.msk.f32.gmra.mrb[8].mxu1 %vm353_vm2, %v4222_v44  ;;  %2494 = vperm.xlu1 %3629, %v2406_v28  }
  0x84   : > { %3333 = vmatmul.mubr.msk.f32.gmra.mrb[16].mxu0 %vm353_vm2, %v1688_v20  ;;  %3207 = vmatprep.mubr.msk.f32.mxu1 %vm353_vm2, %v5039_v26 }
  0x85   : > { %3337 = vmatprep.mubr.msk.f32.mxu0 %vm353_vm2, %v5040_v51 }
  0x87   : > { %3208 = vmatmul.mubr.msk.f32.gmra.mrb[10].mxu1 %vm353_vm2, %v5041_v29 }
  0x88   : > { %3338 = vmatmul.mubr.msk.f32.vlgmr.msra.gmra.mrb[0].mxu0 %vm353_vm2, %v5042_v34  ;;  %3210 = vmatprep.mubr.msk.f32.mxu1 %vm353_vm2, %v5043_v35 }
  0x89   : > { %3365 = vmatpush3.msk.msra.mxu0 %vm390_vm0, %v4535_v33  ;;  %3340 = vmatprep.mubr.msk.f32.mxu0 %vm353_vm2, %v4256_v8  ;;  %v5050_v8 = vld [vmem:[#allocation20_spill] sm:$0xff]  ;;  %v5055_v33 = vld [vmem:[#allocation25_spill] sm:$0xff] }
  0x8b   : > { %3211 = vmatmul.mubr.msk.f32.gmra.mrb[12].mxu1 %vm353_vm2, %v4259_v52 }
  0x8c   : > { %3341 = vmatmul.mubr.msk.f32.gmra.mrb[2].mxu0 %vm353_vm2, %v5044_v4  ;;  %3213 = vmatprep.mubr.msk.f32.mxu1 %vm353_vm2, %v5045_v40 }
  0x8d   : > { %3343 = vmatprep.mubr.msk.f32.mxu0 %vm353_vm2, %v5046_v46 }
  0x8f   : > { %3214 = vmatmul.mubr.msk.f32.gmra.mrb[14].mxu1 %vm353_vm2, %v5047_v16 }
  0x90   : > { %3344 = vmatmul.mubr.msk.f32.gmra.mrb[4].mxu0 %vm353_vm2, %v5048_v7  ;;  %3216 = vmatprep.mubr.msk.f32.mxu1 %vm353_vm2, %v5049_v56 }
  0x91   : > { %3346 = vmatprep.mubr.msk.f32.mxu0 %vm353_vm2, %v5050_v8 }
  0x93   : > { %3217 = vmatmul.mubr.msk.f32.gmra.mrb[16].mxu1 %vm353_vm2, %v5051_v13 }
  0x94   : > { %3347 = vmatmul.mubr.msk.f32.gmra.mrb[6].mxu0 %vm353_vm2, %v5052_v21  ;;  %3221 = vmatprep.mubr.msk.f32.mxu1 %vm353_vm2, %v4175_v30  ;;  %v5056_v30 = vld [vmem:[#allocation26_spill] sm:$0xff] }
  0x95   : > { %3349 = vmatprep.mubr.msk.f32.mxu0 %vm353_vm2, %v5053_v31 }
  0x97   : > { %3222 = vmatmul.mubr.msk.f32.vlgmr.msra.gmra.mrb[0].mxu1 %vm353_vm2, %v4178_v39  ;;  %v5057_v39 = vld [vmem:[#allocation27_spill] sm:$0xff] }
  0x98   : > { %3350 = vmatmul.mubr.msk.f32.gmra.mrb[8].mxu0 %vm353_vm2, %v5054_v32  ;;  %3224 = vmatprep.mubr.msk.f32.mxu1 %vm353_vm2, %v4184_v42  ;;  %v5058_v42 = vld [vmem:[#allocation28_spill] sm:$0xff] }
  0x99   : > { %3352 = vmatprep.mubr.msk.f32.mxu0 %vm353_vm2, %v5055_v33  ;;  %3394 = vmatpush3.msk.msra.mxu1 %vm390_vm0, %v3900_v0  ;;  %v5059_v0 = vld [vmem:[#allocation29_spill] sm:$0xff] }
  0x9b   : > { %3225 = vmatmul.mubr.msk.f32.gmra.mrb[2].mxu1 %vm353_vm2, %v4187_v37  ;;  %v1906_v37 = vrot.slane %v4489_v25, 5  ;;  %v5068_v25 = vld [vmem:[#allocation37_spill] sm:$0xff] }
  0x9c   : > { %3353 = vmatmul.mubr.msk.f32.gmra.mrb[10].mxu0 %vm353_vm2, %v5056_v30  ;;  %3227 = vmatprep.mubr.msk.f32.mxu1 %vm353_vm2, %v4190_v45  ;;  %v5060_v45 = vld [vmem:[#allocation30_spill] sm:$0xff] }
  0x9d   : > { %3355 = vmatprep.mubr.msk.f32.mxu0 %vm353_vm2, %v5057_v39 }
  0x9f   : > { %3228 = vmatmul.mubr.msk.f32.gmra.mrb[4].mxu1 %vm353_vm2, %v4199_v14  ;;  %v5061_v14 = vld [vmem:[#allocation31_spill] sm:$0xff] }
  0xa0   : > { %3356 = vmatmul.mubr.msk.f32.gmra.mrb[12].mxu0 %vm353_vm2, %v5058_v42  ;;  %3230 = vmatprep.mubr.msk.f32.mxu1 %vm353_vm2, %v4206_v22  ;;  %v1907_v22 = vsel %vm1870_vm5, %v5062_v53, %v1906_v37 }
  0xa1   : > { %3358 = vmatprep.mubr.msk.f32.mxu0 %vm353_vm2, %v5059_v0 }
  0xa3   : > { %3231 = vmatmul.mubr.msk.f32.gmra.mrb[6].mxu1 %vm353_vm2, %v4222_v44  ;;  %v5063_v44 = vld [vmem:[#allocation32_spill] sm:$0xff] }
  0xa4   : > { %3359 = vmatmul.mubr.msk.f32.gmra.mrb[14].mxu0 %vm353_vm2, %v5060_v45  ;;  %3233 = vmatprep.mubr.msk.f32.mxu1 %vm353_vm2, %v5039_v26 }
  0xa5   : > { %3361 = vmatprep.mubr.msk.f32.mxu0 %vm353_vm2, %v5061_v14 }
  0xa7   : > { %3234 = vmatmul.mubr.msk.f32.gmra.mrb[8].mxu1 %vm353_vm2, %v5041_v29 }
  0xa8   : > { %3362 = vmatmul.mubr.msk.f32.gmra.mrb[16].mxu0 %vm353_vm2, %v1907_v22  ;;  %3236 = vmatprep.mubr.msk.f32.mxu1 %vm353_vm2, %v5043_v35 }
  0xa9   : > { %3366 = vmatprep.mubr.msk.f32.mxu0 %vm353_vm2, %v5063_v44 }
  0xab   : > { %3237 = vmatmul.mubr.msk.f32.gmra.mrb[10].mxu1 %vm353_vm2, %v4259_v52  ;;  %v5065_v52 = vld [vmem:[#allocation34_spill] sm:$0xff] }
  0xac   : > { %3367 = vmatmul.mubr.msk.f32.vlgmr.msra.gmra.mrb[0].mxu0 %vm353_vm2, %v4395_v6  ;;  %3239 = vmatprep.mubr.msk.f32.mxu1 %vm353_vm2, %v5045_v40  ;;  %v5066_v6 = vld [vmem:[#allocation35_spill] sm:$0xff] }
  0xad   : > { %3369 = vmatprep.mubr.msk.f32.mxu0 %vm353_vm2, %v4398_v3  ;;  %v5067_v3 = vld [vmem:[#allocation36_spill] sm:$0xff] }
  0xaf   : > { %3240 = vmatmul.mubr.msk.f32.gmra.mrb[12].mxu1 %vm353_vm2, %v5047_v16 }
  0xb0   : > { %3370 = vmatmul.mubr.msk.f32.gmra.mrb[2].mxu0 %vm353_vm2, %v4401_v12  ;;  %3242 = vmatprep.mubr.msk.f32.mxu1 %vm353_vm2, %v5049_v56  ;;  %v5069_v12 = vld [vmem:[#allocation38_spill] sm:$0xff] }
  0xb1   : > { %3372 = vmatprep.mubr.msk.f32.mxu0 %vm353_vm2, %v5064_v57 }
  0xb3   : > { %3243 = vmatmul.mubr.msk.f32.gmra.mrb[14].mxu1 %vm353_vm2, %v5051_v13 }
  0xb4   : > { %3373 = vmatmul.mubr.msk.f32.gmra.mrb[4].mxu0 %vm353_vm2, %v5065_v52  ;;  %3245 = vmatprep.mubr.msk.f32.mxu1 %vm353_vm2, %v5066_v6 }
  0xb5   : > { %3375 = vmatprep.mubr.msk.f32.mxu0 %vm353_vm2, %v5067_v3 }
  0xb7   : > { %3246 = vmatmul.mubr.msk.f32.gmra.mrb[16].mxu1 %vm353_vm2, %v5068_v25 }
  0xb8   : > { %3376 = vmatmul.mubr.msk.f32.gmra.mrb[6].mxu0 %vm353_vm2, %v5069_v12  ;;  %3265 = vmatprep.mubr.msk.f32.mxu1 %vm353_vm2, %v4440_v11  ;;  %v5074_v11 = vld [vmem:[#allocation43_spill] sm:$0xff] }
  0xb9   : > { %3378 = vmatprep.mubr.msk.f32.mxu0 %vm353_vm2, %v4443_v18  ;;  %v5075_v18 = vld [vmem:[#allocation44_spill] sm:$0xff] }
  0xbb   : > { %3266 = vmatmul.mubr.msk.f32.vlgmr.msra.gmra.mrb[10].mxu1 %vm353_vm2, %v4446_v9  ;;  %v5076_v9 = vld [vmem:[#allocation45_spill] sm:$0xff] }
  0xbc   : > { %3379 = vmatmul.mubr.msk.f32.gmra.mrb[8].mxu0 %vm353_vm2, %v5070_v36  ;;  %3268 = vmatprep.mubr.msk.f32.mxu1 %vm353_vm2, %v5071_v41 }
  0xbd   : > { %3381 = vmatprep.mubr.msk.f32.mxu0 %vm353_vm2, %v5072_v43 }
  0xbf   : > { %3269 = vmatmul.mubr.msk.f32.gmra.mrb[12].mxu1 %vm353_vm2, %v5073_v54 }
  0xc0   : > { %3382 = vmatmul.mubr.msk.f32.gmra.mrb[10].mxu0 %vm353_vm2, %v4477_v47  ;;  %3271 = vmatprep.mubr.msk.f32.mxu1 %vm353_vm2, %v4480_v38 }
  0xc1   : > { %3384 = vmatprep.mubr.msk.f32.mxu0 %vm353_vm2, %v4483_v24 }
  0xc3   : > { %3272 = vmatmul.mubr.msk.f32.gmra.mrb[14].mxu1 %vm353_vm2, %v5074_v11 }
  0xc4   : > { %3385 = vmatmul.mubr.msk.f32.gmra.mrb[12].mxu0 %vm353_vm2, %v4492_v27  ;;  %3274 = vmatprep.mubr.msk.f32.mxu1 %vm353_vm2, %v5075_v18 }
  0xc5   : > { %3387 = vmatprep.mubr.msk.f32.mxu0 %vm353_vm2, %v5076_v9 }
  0xc7   : > { %3275 = vmatmul.mubr.msk.f32.gmra.mrb[16].mxu1 %vm353_vm2, %v4514_v5 }
  0xc8   : > { %3388 = vmatmul.mubr.msk.f32.gmra.mrb[14].mxu0 %vm353_vm2, %v4522_v23 }
  0xc9   : > { %3390 = vmatprep.mubr.msk.f32.mxu0 %vm353_vm2, %v4525_v49 }
  0xcc   : > { %3391 = vmatmul.mubr.msk.f32.gmra.mrb[16].mxu0 %vm353_vm2, %v4528_v58 }
  0xe1   : > { %v2410_v59 = vpop.permute.xlu0 %2409 }
  0xe2   : > { %v2420_v1 = vpop.permute.xlu1 %2419 }
  0xe5   : > { %v2415_v48 = vpop.permute.xlu0 %2414 }
  0xe6   : > { %v2425_v55 = vpop.permute.xlu1 %2424 }
  0xe9   : > { %v2430_v58 = vpop.permute.xlu0 %2429 }
  0xea   : > { %v2435_v60 = vpop.permute.xlu1 %2434 }
  0xed   : > { %v2440_v15 = vpop.permute.xlu0 %2439 }
  0xee   : > { %v2445_v26 = vpop.permute.xlu1 %2444 }
  0xf1   : > { %v2450_v8 = vpop.permute.xlu0 %2449 }
  0xf2   : > { %v2455_v30 = vpop.permute.xlu1 %2454 }
  0xf5   : > { %v2460_v3 = vpop.permute.xlu0 %2459 }
  0xf6   : > { %v2465_v9 = vpop.permute.xlu1 %2464 }
 0x16a   : > { %v3223_v47 = vpop.f32.mrb[0].mxu1 }
 0x16b   : > { %v1074_v38 = vpop.f32.mrb[1].mxu1 }
 0x16e   : > { %v3226_v27 = vpop.f32.mrb[2].mxu1 }
 0x16f   : > { %v1084_v24 = vpop.f32.mrb[3].mxu1 }
 0x172   : > { %v3229_v10 = vpop.f32.mrb[4].mxu1 }
 0x173   : > { %v1094_v17 = vpop.f32.mrb[5].mxu1 }
 0x176   : > { %v3232_v5 = vpop.f32.mrb[6].mxu1 }
 0x177   : > { %v1104_v50 = vpop.f32.mrb[7].mxu1 }
 0x17a   : > { %v3235_v23 = vpop.f32.mrb[8].mxu1 }
 0x17b   : > { %v4813_v49 = vpop.f32.mrb[9].mxu1 }
 0x17f   : > { %v3368_v61 = vpop.f32.mrb[0].mxu0 }
 0x180   : > { %v3395_v62 = vadd.f32 %v3368_v61, %v3223_v47  ;;  %v2264_v63 = vpop.f32.mrb[1].mxu0 }
 0x181   : > { %v3396_v2 = vadd.f32 %v2264_v63, %v1074_v38 }
 0x182   : > { %2372 = vst [vmem:[%s4816_s12 + $0x8] sm:$0xff] %v3395_v62  ;;  %v2498_v19 = vmul.f32 %v3395_v62, %v2415_v48 }
 0x183   : > { %2371 = vst [vmem:[%s4816_s12] sm:$0xff] %v3396_v2  ;;  %v2497_v28 = vmul.f32 %v3396_v2, %v2410_v59  ;;  %v3371_v20 = vpop.f32.mrb[2].mxu0 }
 0x184   : > { %v2540_v51 = vmul.f32 %v3395_v62, %v2498_v19  ;;  %v3397_v29 = vadd.f32 %v3371_v20, %v3226_v27  ;;  %v2274_v34 = vpop.f32.mrb[3].mxu0 }
 0x185   : > { %v2515_v35 = vadd.f32 %v2498_v19, %v2497_v28  ;;  %v2539_v4 = vmul.f32 %v3396_v2, %v2497_v28  ;;  %v3398_v40 = vadd.f32 %v2274_v34, %v1084_v24  ;;  %v2475_v19 = vpop.permute.xlu1 %2474 }
 0x186   : > { %2374 = vst [vmem:[%s4816_s12 + $0x18] sm:$0xff] %v3397_v29  ;;  %v2500_v46 = vmul.f32 %v3397_v29, %v2425_v55 }
 0x187   : > { %v2557_v16 = vadd.f32 %v2540_v51, %v2539_v4  ;;  %2373 = vst [vmem:[%s4816_s12 + $0x10] sm:$0xff] %v3398_v40  ;;  %v2499_v7 = vmul.f32 %v3398_v40, %v2420_v1  ;;  %v3374_v56 = vpop.f32.mrb[4].mxu0 }
 0x188   : > { %v3399_v13 = vadd.f32 %v3374_v56, %v3229_v10  ;;  %v2284_v21 = vpop.f32.mrb[5].mxu0  ;;  %v2542_v39 = vmul.f32 %v3397_v29, %v2500_v46 }
 0x189   : > { %v2516_v31 = vadd.f32 %v2515_v35, %v2499_v7  ;;  %v2541_v32 = vmul.f32 %v3398_v40, %v2499_v7  ;;  %v3400_v33 = vadd.f32 %v2284_v21, %v1094_v17 }
 0x18a   : > { %2376 = vst [vmem:[%s4816_s12 + $0x28] sm:$0xff] %v3399_v13  ;;  %v2502_v0 = vmul.f32 %v3399_v13, %v2435_v60 }
 0x18b   : > { %v2558_v42 = vadd.f32 %v2557_v16, %v2541_v32  ;;  %2375 = vst [vmem:[%s4816_s12 + $0x20] sm:$0xff] %v3400_v33  ;;  %v2501_v37 = vmul.f32 %v3400_v33, %v2430_v58  ;;  %v2517_v45 = vadd.f32 %v2516_v31, %v2500_v46  ;;  %v3377_v14 = vpop.f32.mrb[6].mxu0 }
 0x18c   : > { %v3401_v53 = vadd.f32 %v3377_v14, %v3232_v5  ;;  %v2294_v22 = vpop.f32.mrb[7].mxu0  ;;  %v2544_v36 = vmul.f32 %v3399_v13, %v2502_v0 }
 0x18d   : > { %v2518_v44 = vadd.f32 %v2517_v45, %v2501_v37  ;;  %v2543_v57 = vmul.f32 %v3400_v33, %v2501_v37  ;;  %v2559_v52 = vadd.f32 %v2558_v42, %v2542_v39  ;;  %v3402_v6 = vadd.f32 %v2294_v22, %v1104_v50  ;;  %v2485_v37 = vpop.permute.xlu1 %2484 }
 0x18e   : > { %2378 = vst [vmem:[%s4816_s12 + $0x38] sm:$0xff] %v3401_v53  ;;  %v2504_v25 = vmul.f32 %v3401_v53, %v2445_v26  ;;  %v3267_v12 = vpop.f32.mrb[10].mxu1 }
 0x18f   : > { %v2560_v41 = vadd.f32 %v2559_v52, %v2543_v57  ;;  %2377 = vst [vmem:[%s4816_s12 + $0x30] sm:$0xff] %v3402_v6  ;;  %v2503_v43 = vmul.f32 %v3402_v6, %v2440_v15  ;;  %v2519_v54 = vadd.f32 %v2518_v44, %v2502_v0  ;;  %v3380_v11 = vpop.f32.mrb[8].mxu0  ;;  %v1375_v18 = vpop.f32.mrb[11].mxu1 }
 0x190   : > { %v3403_v47 = vadd.f32 %v3380_v11, %v3235_v23  ;;  %v2304_v38 = vpop.f32.mrb[9].mxu0  ;;  %v2546_v10 = vmul.f32 %v3401_v53, %v2504_v25  ;;  %v2470_v23 = vpop.permute.xlu0 %2469 }
 0x191   : > { %v2520_v27 = vadd.f32 %v2519_v54, %v2503_v43  ;;  %v2545_v24 = vmul.f32 %v3402_v6, %v2503_v43  ;;  %v2561_v59 = vadd.f32 %v2560_v41, %v2544_v36  ;;  %v3404_v1 = vadd.f32 %v2304_v38, %v4813_v49  ;;  %v2495_v38 = vpop.permute.xlu1 %2494 }
 0x192   : > { %2380 = vst [vmem:[%s4816_s12 + $0x48] sm:$0xff] %v3403_v47  ;;  %v3270_v17 = vpop.f32.mrb[12].mxu1  ;;  %v2506_v5 = vmul.f32 %v3403_v47, %v2455_v30 }
 0x193   : > { %v2562_v48 = vadd.f32 %v2561_v59, %v2545_v24  ;;  %2379 = vst [vmem:[%s4816_s12 + $0x40] sm:$0xff] %v3404_v1  ;;  %v2505_v50 = vmul.f32 %v3404_v1, %v2450_v8  ;;  %v2521_v55 = vadd.f32 %v2520_v27, %v2504_v25  ;;  %v3383_v58 = vpop.f32.mrb[10].mxu0  ;;  %v1385_v60 = vpop.f32.mrb[13].mxu1 }
 0x194   : > { %v3405_v61 = vadd.f32 %v3383_v58, %v3267_v12  ;;  %v2314_v62 = vpop.f32.mrb[11].mxu0  ;;  %v2548_v26 = vmul.f32 %v3403_v47, %v2506_v5  ;;  %v2480_v13 = vpop.permute.xlu0 %2479 }
 0x195   : > { %v2522_v63 = vadd.f32 %v2521_v55, %v2505_v50  ;;  %v2547_v2 = vmul.f32 %v3404_v1, %v2505_v50  ;;  %v2563_v49 = vadd.f32 %v2562_v48, %v2546_v10  ;;  %v3406_v15 = vadd.f32 %v2314_v62, %v1375_v18 }
 0x196   : > { %2382 = vst [vmem:[%s4816_s12 + $0x58] sm:$0xff] %v3405_v61  ;;  %v2508_v28 = vmul.f32 %v3405_v61, %v2465_v9  ;;  %v3273_v20 = vpop.f32.mrb[14].mxu1 }
 0x197   : > { %v2564_v51 = vadd.f32 %v2563_v49, %v2547_v2  ;;  %2381 = vst [vmem:[%s4816_s12 + $0x50] sm:$0xff] %v3406_v15  ;;  %v2507_v29 = vmul.f32 %v3406_v15, %v2460_v3  ;;  %v2523_v34 = vadd.f32 %v2522_v63, %v2506_v5  ;;  %v3386_v35 = vpop.f32.mrb[12].mxu0  ;;  %v1395_v4 = vpop.f32.mrb[15].mxu1 }
 0x198   : > { %v3407_v40 = vadd.f32 %v3386_v35, %v3270_v17  ;;  %v2324_v46 = vpop.f32.mrb[13].mxu0  ;;  %v2550_v21 = vmul.f32 %v3405_v61, %v2508_v28  ;;  %v2490_v47 = vpop.permute.xlu0 %2489 }
 0x199   : > { %v2524_v16 = vadd.f32 %v2523_v34, %v2507_v29  ;;  %v2549_v7 = vmul.f32 %v3406_v15, %v2507_v29  ;;  %v2565_v56 = vadd.f32 %v2564_v51, %v2548_v26  ;;  %v3408_v8 = vadd.f32 %v2324_v46, %v1385_v60 }
 0x19a   : > { %2384 = vst [vmem:[%s4816_s12 + $0x68] sm:$0xff] %v3407_v40  ;;  %v3276_v31 = vpop.f32.mrb[16].mxu1  ;;  %v2510_v33 = vmul.f32 %v3407_v40, %v2475_v19 }
 0x19b   : > { %v2566_v32 = vadd.f32 %v2565_v56, %v2549_v7  ;;  %2383 = vst [vmem:[%s4816_s12 + $0x60] sm:$0xff] %v3408_v8  ;;  %v2509_v30 = vmul.f32 %v3408_v8, %v2470_v23  ;;  %v2525_v39 = vadd.f32 %v2524_v16, %v2508_v28  ;;  %v3389_v42 = vpop.f32.mrb[14].mxu0  ;;  %v1405_v0 = vpop.f32.mrb[17].mxu1 }
 0x19c   : > { %v3409_v45 = vadd.f32 %v3389_v42, %v3273_v20  ;;  %v2334_v14 = vpop.f32.mrb[15].mxu0  ;;  %v2552_v6 = vmul.f32 %v3407_v40, %v2510_v33 }
 0x19d   : > { %v2526_v53 = vadd.f32 %v2525_v39, %v2509_v30  ;;  %v2551_v22 = vmul.f32 %v3408_v8, %v2509_v30  ;;  %v2567_v44 = vadd.f32 %v2566_v32, %v2550_v21  ;;  %v3410_v57 = vadd.f32 %v2334_v14, %v1395_v4 }
 0x19e   : > { %2386 = vst [vmem:[%s4816_s12 + $0x78] sm:$0xff] %v3409_v45  ;;  %v2512_v52 = vmul.f32 %v3409_v45, %v2485_v37 }
 0x19f   : > { %v2568_v3 = vadd.f32 %v2567_v44, %v2551_v22  ;;  %2385 = vst [vmem:[%s4816_s12 + $0x70] sm:$0xff] %v3410_v57  ;;  %v2511_v25 = vmul.f32 %v3410_v57, %v2480_v13  ;;  %v2527_v12 = vadd.f32 %v2526_v53, %v2510_v33  ;;  %v3392_v36 = vpop.f32.mrb[16].mxu0 }
 0x1a0   : > { %v3411_v41 = vadd.f32 %v3392_v36, %v3276_v31  ;;  %v2344_v43 = vpop.f32.mrb[17].mxu0  ;;  %v2554_v27 = vmul.f32 %v3409_v45, %v2512_v52 }
 0x1a1   : > { %v2528_v54 = vadd.f32 %v2527_v12, %v2511_v25  ;;  %v2553_v11 = vmul.f32 %v3410_v57, %v2511_v25  ;;  %v2569_v18 = vadd.f32 %v2568_v3, %v2552_v6  ;;  %v3412_v9 = vadd.f32 %v2344_v43, %v1405_v0 }
 0x1a2   : > { %2388 = vst [vmem:[%s4816_s12 + $0x88] sm:$0xff] %v3411_v41  ;;  %v2514_v59 = vmul.f32 %v3411_v41, %v2495_v38 }
 0x1a3   : > { %v2570_v24 = vadd.f32 %v2569_v18, %v2553_v11  ;;  %2387 = vst [vmem:[%s4816_s12 + $0x80] sm:$0xff] %v3412_v9  ;;  %v2513_v1 = vmul.f32 %v3412_v9, %v2490_v47  ;;  %v2529_v10 = vadd.f32 %v2528_v54, %v2512_v52 }
 0x1a4   : > { %3643 = shalt.err (!%p3640_p7)
}
 0x1a5   : > { %s3644_s12 = scalar_lea.hbm %s4841_s8, 2304  ;;  %s3648_s14 = scalar_lea.hbm %s4977_s3, 9216 }
 0x1a6   : > { %p3645_p9 = scmp.ne.s32.totalorder %s4841_s8, %s3644_s12  ;;  %p3649_p12 = scmp.lt.u32.totalorder %s4841_s8, %s4977_s3 }
 0x1a7   : > { %p3650_p13 = scmp.lt.u32.totalorder %s3648_s14, %s3644_s12  ;;  %p3652_p1 = scmp.lt.u32.totalorder %s3644_s12, %s4841_s8 }
 0x1a8   : > { %p3646_p10 = pnand %p3645_p9, %p3875_p3 }
 0x1a9   : > { %p3651_p0 = por %p3650_p13, %p3649_p12 }
 0x1aa   : > { %p3647_p11 = pneg %p3646_p10 }
 0x1ab   : > { %p3653_p2 = por %p3652_p1, %p3651_p0 }
 0x1ad   : > { %p3654_p4 = pnand %p3653_p2, %p3647_p11 }
 0x1af   : > { %3657 = shalt.err (!%p3654_p4)
}
 0x1b0   : > { %s3788_s13 = smov 128   ;;  %s3789_s27 = smov 8   ;;  %v2530_v17 = vadd.f32 %v2529_v10, %v2513_v1  ;;  %v2555_v48 = vmul.f32 %v3412_v9, %v2513_v1  ;;  %v2571_v5 = vadd.f32 %v2570_v24, %v2554_v27  ;;  %v2556_v50 = vmul.f32 %v3411_v41, %v2514_v59 }
 0x1b1   : > { %3544 = dma.vmem_to_hbm [thread:$0]  (%p3875_p3), %s4843_s16, 2304, %s4841_s8, %s2582_s10, %s3788_s13, %s3788_s13, %s3789_s27  }
 0x1b2   : > { %v2531_v55 = vadd.f32 %v2530_v17, %v2514_v59  ;;  %v2572_v58 = vadd.f32 %v2571_v5, %v2555_v48  ;;  %s2955_s26 = sshll.u32 %s3772_s22, 1  ;;  %s5077_s16 = sadd.s32 4294967295, %s3784_s25  }
 0x1b3   : > { %s2619_s12 = sadd.s32 %s3768_s21, %s2955_s26  ;;  %s4875_s8 = sand.u32 1, %s5077_s16  }
 0x1b4   : > { %v2532_v60 = vrot.slane %v2531_v55, 4  ;;  %v2573_v23 = vadd.f32 %v2572_v58, %v2556_v50  ;;  %s2956_s10 = sshll.u32 %s2619_s12, 4  ;;  %s255_s17 = scalar_lea.vmem [#allocation4], %s4811_s9 }
 0x1b5   : > { %s2623_s30 = sshll.u32 %s255_s17, 4  ;;  %s4991_s14 = scalar_lea.vmem [#allocation6], %s4811_s9  ;;  %s4886_s30 = int_to_ptr.vmem [resolvable:$true] %s2623_s30 }
 0x1b6   : > { %v2574_v61 = vrot.slane %v2573_v23, 4  ;;  %v2533_v62 = vadd.f32 %v2532_v60, %v2531_v55  ;;  %s2638_s22 = sshll.u32 %s4991_s14, 4  ;;  %s4884_s21 = scalar_lea.hbm %s4978_s4, %s2956_s10  ;;  %s4893_s22 = int_to_ptr.vmem [resolvable:$true] %s2638_s22 }
 0x1b7   : > { %s4891_s12 = scalar_lea.hbm %s4979_s5, %s2956_s10  ;;  %s2587_s16 = scalar_lea.sflag [#allocation5], %s4875_s8 }
 0x1b8   : > { %v2575_v63 = vadd.f32 %v2574_v61, %v2573_v23  ;;  %v2534_v2 = vrot.slane %v2533_v62, 2  ;;  %s3658_s14 = scalar_lea.vmem %s4886_s30, 16  ;;  %s3790_s15 = smov [#allocation4]  }
 0x1b9   : > { %p3659_p5 = scmp.ne.s32.totalorder %s4886_s30, %s3658_s14  ;;  %s3662_s13 = sshll.u32 %s3790_s15, 4  ;;  %s3663_s13 = int_to_ptr.vmem [resolvable:$false] %s3662_s13 }
 0x1ba   : > { %v2535_v49 = vadd.f32 %v2534_v2, %v2533_v62  ;;  %v2576_v15 = vrot.slane %v2575_v63, 2  ;;  %s3664_s0 = scalar_lea.vmem %s3663_s13, 32  ;;  %p3665_p9 = scmp.lt.s32.totalorder %s4886_s30, %s3663_s13 }
 0x1bb   : > { %p3660_p6 = pnand %p3659_p5, %p3875_p3  ;;  %p3666_p10 = scmp.lt.s32.totalorder %s3664_s0, %s3658_s14 }
 0x1bc   : > { %v2536_v19 = vrot.slane %v2535_v49, 1  ;;  %v2577_v28 = vadd.f32 %v2576_v15, %v2575_v63 }
 0x1bd   : > { %p3661_p7 = pneg %p3660_p6  ;;  %p3667_p11 = por %p3666_p10, %p3665_p9 }
 0x1be   : > { %v2537_v20 = vadd.f32 %v2536_v19, %v2535_v49  ;;  %v2578_v26 = vrot.slane %v2577_v28, 1 }
 0x1bf   : > { %p3668_p12 = pnand %p3667_p11, %p3661_p7 }
 0x1c0   : > { %2538 = vst [vmem:[%s255_s17] sm:$0x1] %v2537_v20  ;;  %v2579_v51 = vadd.f32 %v2578_v26, %v2577_v28 }
 0x1c1   : > { %3671 = shalt.err (!%p3668_p12)
}
 0x1c2   : > { %s3672_s10 = scalar_lea.hbm %s4884_s21, 16  ;;  %s3676_s26 = scalar_lea.hbm %s4978_s4, 64 }
 0x1c3   : > { %p3673_p13 = scmp.ne.s32.totalorder %s4884_s21, %s3672_s10  ;;  %p3677_p2 = scmp.lt.u32.totalorder %s4884_s21, %s4978_s4 }
 0x1c4   : > { %p3678_p4 = scmp.lt.u32.totalorder %s3676_s26, %s3672_s10  ;;  %p3680_p6 = scmp.lt.u32.totalorder %s3672_s10, %s4884_s21 }
 0x1c5   : > { %p3674_p0 = pnand %p3673_p13, %p3875_p3 }
 0x1c6   : > { %p3679_p5 = por %p3678_p4, %p3677_p2 }
 0x1c7   : > { %p3675_p1 = pneg %p3674_p0 }
 0x1c8   : > { %p3681_p7 = por %p3680_p6, %p3679_p5 }
 0x1ca   : > { %p3682_p9 = pnand %p3681_p7, %p3675_p1 }
 0x1cc   : > { %3685 = shalt.err (!%p3682_p9)
}
 0x1cd   : > { %3545 = dma.vmem_to_hbm [thread:$0]  (%p3875_p3), %s4886_s30, 16, %s4884_s21, %s2587_s16  }
 0x1ce   : > { %s5078_s0 = scalar_lea.vmem [#allocation6], %s4811_s9  ;;  %s3686_s14 = scalar_lea.vmem %s4893_s22, 16 }
 0x1cf   : > { %2580 = vst [vmem:[%s5078_s0] sm:$0x1] %v2579_v51  ;;  %p3687_p10 = scmp.ne.s32.totalorder %s4893_s22, %s3686_s14  ;;  %s3791_s10 = smov [#allocation6]  }
 0x1d0   : > { %s3690_s17 = sshll.u32 %s3791_s10, 4  ;;  %s3691_s17 = int_to_ptr.vmem [resolvable:$false] %s3690_s17 }
 0x1d1   : > { %p3688_p11 = pnand %p3687_p10, %p3875_p3  ;;  %s3692_s27 = scalar_lea.vmem %s3691_s17, 32 }
 0x1d2   : > { %p3693_p13 = scmp.lt.s32.totalorder %s4893_s22, %s3691_s17  ;;  %p3694_p0 = scmp.lt.s32.totalorder %s3692_s27, %s3686_s14 }
 0x1d3   : > { %p3689_p12 = pneg %p3688_p11 }
 0x1d4   : > { %p3695_p1 = por %p3694_p0, %p3693_p13 }
 0x1d6   : > { %p3696_p2 = pnand %p3695_p1, %p3689_p12 }
 0x1d8   : > { %3699 = shalt.err (!%p3696_p2)
}
 0x1d9   : > { %s3700_s9 = scalar_lea.hbm %s4891_s12, 16  ;;  %s3704_s26 = scalar_lea.hbm %s4979_s5, 64 }
 0x1da   : > { %p3701_p4 = scmp.ne.s32.totalorder %s4891_s12, %s3700_s9  ;;  %p3705_p7 = scmp.lt.u32.totalorder %s4891_s12, %s4979_s5 }
 0x1db   : > { %p3706_p9 = scmp.lt.u32.totalorder %s3704_s26, %s3700_s9  ;;  %p3708_p11 = scmp.lt.u32.totalorder %s3700_s9, %s4891_s12 }
 0x1dc   : > { %p3702_p5 = pnand %p3701_p4, %p3875_p3 }
 0x1dd   : > { %p3707_p10 = por %p3706_p9, %p3705_p7 }
 0x1de   : > { %p3703_p6 = pneg %p3702_p5 }
 0x1df   : > { %p3709_p12 = por %p3708_p11, %p3707_p10 }
 0x1e1   : > { %p3710_p13 = pnand %p3709_p12, %p3703_p6 }
 0x1e3   : > { %3713 = shalt.err (!%p3710_p13)
}
 0x1e4   : > { %3546 = dma.vmem_to_hbm [thread:$0]  (%p3875_p3), %s4893_s22, 16, %s4891_s12, %s2587_s16  }
 0x1e5 PF: > { %p3560_p0 = scmp.ge.s32.totalorder %s3784_s25, 2  ;;  %s2650_s0 = sand.u32 1, %s3756_s18  }
 0x1e6   : > { %s2651_s14 = scalar_lea.sflag [#allocation3], %s2650_s0 }
 0x1e7   : > { %p3551_p1 = pnand %p3560_p0, %p3886_p8 }
 0x1e9   : > { %3747 = dma.done.wait (!%p3551_p1), %s2651_s14, 2304  }
 0x1ea   : > { %3749 = vsyncadd (!%p3551_p1), %s2651_s14, 4294964992  ;;  %s5079_s10 = sadd.s32 4294967294, %s3784_s25  }
 0x1eb   : > { %s2659_s17 = sand.u32 1, %s5079_s10  }
 0x1ec   : > { %s2660_s6 = scalar_lea.sflag [#allocation5], %s2659_s17 }
 0x1ed   : > { %3751 = dma.done.wait (!%p3551_p1), %s2660_s6, 32  }
 0x1ee   : > { %3753 = vsyncadd (!%p3551_p1), %s2660_s6, 4294967264  ;;  %s22_s25 = sadd.s32 1, %s3784_s25   ;;  %s5080_s18 = smov %s3760_s19 }
 0x1ef   : > { %p19_p3 = scmp.ge.s32.totalorder %s22_s25, 6   ;;  %s5081_s19 = smov %s3764_s20 }
 0x1f0   : > { %s5082_s20 = smov %s3895_s11  ;;  %s5083_s21 = smov %s3776_s23 }
 0x1f1   : > { %s5084_s22 = smov %s3780_s24  ;;  %s5085_s23 = smov %s5088_s28 }
 0x1f2   : > { %s5086_s24 = smov %s5092_s29  ;;  %21 = sbr.rel (!%p19_p3) target bundleno = 9 (0x9), region = 99 }
 0x1f9   :  { %2672 = vsyncpa [#allocation3], 1 }
 0x1fa   :  { %2674 = vsyncpa [#allocation3 + $0x1], 1 }
 0x1fb   :  { %2675 = vsyncpa [#allocation5], 1 }
 0x1fc   :  { %2677 = vsyncpa [#allocation5 + $0x1], 1 }

</bundles_post_ra>
